<compile_context>
chip_gen: v7x
topology: tpu7x:2x2x1
jax: 0.10.0
libtpu: 0.0.40
codegen_flags: <defaults>
</compile_context>

<pallas_src>
import functools
import math

import jax
import jax.numpy as jnp
import numpy as np
from jax.experimental import pallas as pl
from jax.experimental.pallas import tpu as pltpu


_TAPS = tuple((dy, dx) for dy in (-1, 0, 1) for dx in (-1, 0, 1))
_SP = 8   # conv1 output channels padded to one sublane tile (rows S.._SP-1 are zero)


def _tap_kernel(x_ref, w1_ref, w2_ref, bnb_ref, vmask_ref, out_ref,
                xp_ref, ys_ref, *, Wp, LA, LD, a0, d0, P, H, W, S, C):
    Lp = xp_ref.shape[1]                     # Hp * Wp

    # ---- in-kernel zero padding (no jnp.pad HBM round trip) -----------------
    # xp_ref rows [g*C, (g+1)*C) hold x_pad shifted by (g-1)*Wp lanes, i.e. the
    # dy = g-1 row slab of the padded image.  Group 1 is x_pad itself.
    xp_ref[...] = jnp.zeros(xp_ref.shape, xp_ref.dtype)
    for r in range(H):                       # TODO(synk): switch to pl.loop / row tiles for large H
        xp_ref[pl.ds(C, C), pl.ds((P + r) * Wp + P, W)] = x_ref[:, r * W:(r + 1) * W]
    g1 = xp_ref[pl.ds(C, C), :]              # (C, Lp) padded image, bf16
    xp_ref[pl.ds(0, C), pl.ds(Wp, Lp - Wp)] = g1[:, :Lp - Wp]   # dy = -1 slab
    xp_ref[pl.ds(2 * C, C), pl.ds(0, Lp - Wp)] = g1[:, Wp:]     # dy = +1 slab

    # ---- conv1 (3x3, pad=1, no bias; BN scale folded into weights) ----------
    # 3 bf16 MXU matmuls with K = 3*C (one per column tap dx = -1, 0, +1),
    # f32 accumulation.  Output has _SP rows (rows S.._SP-1 are exactly zero).
    y1 = jnp.dot(w1_ref[0], xp_ref[:, pl.ds(a0 - 1, LA)],
                 preferred_element_type=jnp.float32)
    y1 = y1 + jnp.dot(w1_ref[1], xp_ref[:, pl.ds(a0, LA)],
                      preferred_element_type=jnp.float32)
    y1 = y1 + jnp.dot(w1_ref[2], xp_ref[:, pl.ds(a0 + 1, LA)],
                      preferred_element_type=jnp.float32)
    # BN bias, then zero everything outside the true HxW image so conv2's
    # implicit zero-padding of its *input* is reproduced exactly.
    y1 = (y1 + bnb_ref[...]) * vmask_ref[...]                    # (_SP, LA) f32

    # ---- conv2 (3x3, pad=1, no bias), fused into ONE MXU matmul -------------
    # Stack the 9 shifted y1 slices sublane-aligned into a (9*_SP, LD) scratch
    # and contract against the (S, 9*_SP) weight slab (1/temperature folded in).
    base = d0 - a0
    for t, (dy, dx) in enumerate(_TAPS):
        off = base + dy * Wp + dx
        ys_ref[pl.ds(t * _SP, _SP), :] = y1[:, off:off + LD]
    y2 = jnp.dot(w2_ref[...], ys_ref[...],
                 preferred_element_type=jnp.float32)             # (S, LD)

    # ---- dilation-predictor softmax over the scale (sublane) axis -----------
    y2 = y2 - jnp.max(y2, axis=0, keepdims=True)
    p = jnp.exp(y2)
    mask = p * pl.reciprocal(jnp.sum(p, axis=0, keepdims=True), approx=True)

    # ---- dilated 3x3 average pooling (separable) + scale-weighted sum -------
    # Each scale reads its horizontal slab ONCE (wide load covering the three
    # +-i column taps); adds are done in f32 (safe on v5e as well).
    acc = xp_ref[pl.ds(C, C), pl.ds(d0, LD)].astype(jnp.float32) * mask[0:1, :]
    for i in range(1, S):
        h0 = (P - i) * Wp                                        # slab start
        LH = (H + 2 * i) * Wp                                    # slab length
        xw = xp_ref[pl.ds(C, C), pl.ds(h0 - i, LH + 2 * i)].astype(jnp.float32)
        h = xw[:, 0:LH] + xw[:, i:i + LH] + xw[:, 2 * i:2 * i + LH]   # horizontal taps
        b0 = d0 - h0                                             # = i * Wp
        pooled = (h[:, b0 - i * Wp:b0 - i * Wp + LD]
                  + h[:, b0:b0 + LD]
                  + h[:, b0 + i * Wp:b0 + i * Wp + LD]) * (1.0 / 9.0)  # vertical taps
        acc = acc + pooled * mask[i:i + 1, :]
    out_ref[...] = acc.astype(out_ref.dtype)                     # lane-dense store


def tap_forward(x_nchw, conv1_w, conv2_w, bn_gamma, bn_beta, bn_mean, bn_var,
                *, num_scales=4, temperature=1.0, eps=1e-5):
    B, C, H, W = x_nchw.shape
    S = num_scales
    # Padding big enough for the conv chain (including the corner-wrap of the
    # flat-index trick) and for the maximum pooling dilation S-1.
    P = max(4, num_scales)
    Hp, Wp = H + 2 * P, W + 2 * P
    Lp = Hp * Wp

    # Channel-major, unpadded, flattened spatial axis; bf16 on the wire.
    x_flat = x_nchw.reshape(B, C, H * W).astype(jnp.bfloat16)

    # conv1 weights: fold BN scale, regroup as (dx, out-channel, dy*C + c),
    # pad out-channels S -> _SP with zeros, cast to bf16.
    bn_scale = (bn_gamma / jnp.sqrt(bn_var + eps)).astype(jnp.float32)
    w1_t = jnp.transpose(conv1_w, (3, 0, 2, 1)).reshape(3, S, 3 * C).astype(jnp.float32)
    w1_t = w1_t * bn_scale[None, :, None]
    w1s = jnp.zeros((3, _SP, 3 * C), jnp.float32).at[:, :S, :].set(w1_t)
    w1s = w1s.astype(jnp.bfloat16)

    # conv2 weights: (out, tap, in) with in padded S -> _SP, 1/temperature folded.
    w2_t = jnp.transpose(conv2_w, (0, 2, 3, 1)).reshape(S, 9, S).astype(jnp.float32)
    w2_t = w2_t / float(temperature)
    w2s = jnp.zeros((S, 9, _SP), jnp.float32).at[:, :, :S].set(w2_t).reshape(S, 9 * _SP)

    # TODO(synk): BatchNorm2d is applied in inference mode (running stats);
    # training-mode batch statistics are not computed inside the kernel.
    bn_bias = jnp.zeros((_SP, 1), jnp.float32).at[:S, 0].set(
        (bn_beta - bn_mean * bn_scale).astype(jnp.float32))

    # flat-index bookkeeping
    a0 = (P - 2) * Wp          # first flat index of the conv1 (y1) slab
    LA = (H + 4) * Wp          # conv1 slab length
    d0 = P * Wp                # first flat index of the output slab
    LD = H * Wp                # output slab length (full padded width; cols sliced later)

    # validity mask over the conv1 slab (1 inside the real HxW image, 0 elsewhere)
    jj = np.arange(LA) + a0
    rows, cols = jj // Wp, jj % Wp
    valid = (rows >= P) & (rows < P + H) & (cols >= P) & (cols < P + W)
    vmask = jnp.asarray(valid.astype(np.float32).reshape(1, LA))

    kernel = functools.partial(_tap_kernel, Wp=Wp, LA=LA, LD=LD, a0=a0, d0=d0,
                               P=P, H=H, W=W, S=S, C=C)

    out_flat = pl.pallas_call(
        kernel,
        out_shape=jax.ShapeDtypeStruct((B, C, LD), x_nchw.dtype),
        grid_spec=pltpu.PrefetchScalarGridSpec(
            num_scalar_prefetch=0,
            grid=(B,),
            in_specs=[
                pl.BlockSpec((None, C, H * W), lambda b: (b, 0, 0)),   # x (unpadded, flat, bf16)
                pl.BlockSpec((3, _SP, 3 * C), lambda b: (0, 0, 0)),    # conv1 taps (BN-scaled)
                pl.BlockSpec((S, 9 * _SP), lambda b: (0, 0)),          # conv2 taps (1/T folded)
                pl.BlockSpec((_SP, 1), lambda b: (0, 0)),              # BN bias
                pl.BlockSpec((1, LA), lambda b: (0, 0)),               # validity mask
            ],
            out_specs=pl.BlockSpec((None, C, LD), lambda b: (b, 0, 0)),
            scratch_shapes=[
                pltpu.VMEM((3 * C, Lp), jnp.bfloat16),   # padded image, 3 row-shifted slabs
                pltpu.VMEM((9 * _SP, LD), jnp.float32),  # stacked conv2 operand
            ],
        ),
        # Batch items are fully independent -> shard across v7x's 2 TensorCores.
        compiler_params=pltpu.CompilerParams(
            dimension_semantics=("parallel",),
            vmem_limit_bytes=48 * 1024 * 1024,           # well under v7x's 64 MiB
        ),
    )(x_flat, w1s, w2s, bn_bias, vmask)
    # TODO(synk): for production image sizes add a spatial (row-tile + halo)
    # grid axis (marked "parallel" too) so the working set scales and the DMA
    # pipelines; one block per batch item is only appropriate at small H, W, C.

    # drop padded columns; data is already NCHW (channel-major throughout)
    return out_flat.reshape(B, C, H, Wp)[:, :, :, P:P + W]


def tap_reference(x_nchw, conv1_w, conv2_w, bn_gamma, bn_beta, bn_mean, bn_var,
                  num_scales=4, temperature=1.0, eps=1e-5):
    """Pure-JAX reference mirroring the PyTorch TAP forward (eval-mode BN)."""
    B, C, H, W = x_nchw.shape
    S = num_scales
    x = x_nchw.astype(jnp.float32)

    def conv3x3(inp, w):
        padded = jnp.pad(inp, ((0, 0), (0, 0), (1, 1), (1, 1)))
        out = jnp.zeros((B, w.shape[0], H, W), jnp.float32)
        for ky in range(3):
            for kx in range(3):
                sl = padded[:, :, ky:ky + H, kx:kx + W]
                out = out + jnp.einsum('bchw,oc->bohw', sl, w[:, :, ky, kx])
        return out

    y1 = conv3x3(x, conv1_w)
    scale = bn_gamma / jnp.sqrt(bn_var + eps)
    y1 = y1 * scale[None, :, None, None] + (bn_beta - bn_mean * scale)[None, :, None, None]
    y2 = conv3x3(y1, conv2_w)
    mask = jax.nn.softmax(y2 / temperature, axis=1)   # (B, S, H, W)

    out = jnp.zeros_like(x)
    for i in range(S):
        if i == 0:
            pooled = x
        else:
            d = i
            padded = jnp.pad(x, ((0, 0), (0, 0), (d, d), (d, d)))
            pooled = jnp.zeros_like(x)
            for ky in range(3):
                for kx in range(3):
                    pooled = pooled + padded[:, :, ky * d:ky * d + H, kx * d:kx * d + W]
            pooled = pooled / 9.0
        out = out + pooled * mask[:, i:i + 1]
    return out


if __name__ == "__main__":
    B, C, H, W = 2, 32, 16, 16      # embed_dims = 32
    S = 4                           # num_scales = 4

    key = jax.random.PRNGKey(0)
    kx, k1, k2 = jax.random.split(key, 3)
    x = jax.random.normal(kx, (B, C, H, W), dtype=jnp.float32)

    # Conv2d init from _init_weights: normal(0, sqrt(2 / fan_out)), fan_out = 3*3*out_channels
    std = math.sqrt(2.0 / (3 * 3 * S))
    conv1_w = std * jax.random.normal(k1, (S, C, 3, 3), dtype=jnp.float32)
    conv2_w = std * jax.random.normal(k2, (S, S, 3, 3), dtype=jnp.float32)

    # Use bf16-representable test data so the (intentional) bf16 kernel inputs
    # are lossless and the comparison against the f32 reference stays tight.
    x = x.astype(jnp.bfloat16).astype(jnp.float32)
    conv1_w = conv1_w.astype(jnp.bfloat16).astype(jnp.float32)
    conv2_w = conv2_w.astype(jnp.bfloat16).astype(jnp.float32)

    # BatchNorm2d defaults (eval mode): gamma=1, beta=0, running_mean=0, running_var=1
    bn_gamma = jnp.ones((S,), jnp.float32)
    bn_beta = jnp.zeros((S,), jnp.float32)
    bn_mean = jnp.zeros((S,), jnp.float32)
    bn_var = jnp.ones((S,), jnp.float32)

    out = tap_forward(x, conv1_w, conv2_w, bn_gamma, bn_beta, bn_mean, bn_var,
                      num_scales=S, temperature=1.0)
    out = jax.block_until_ready(out)

    ref = tap_reference(x, conv1_w, conv2_w, bn_gamma, bn_beta, bn_mean, bn_var,
                        num_scales=S, temperature=1.0)
    # Tolerance covers bf16 matmul operands (f32 accumulation) and the
    # approximate EUP reciprocal in the softmax denominator.
    np.testing.assert_allclose(np.asarray(out), np.asarray(ref), rtol=2e-2, atol=2e-2)
    print("KERNEL_OK")
</pallas_src>

<mosaic_0001>
module attributes {stable_mosaic.version = 11 : i64} {
  func.func @_tap_kernel(%arg0: i32, %arg1: memref<1x32x256xbf16, #tpu.memory_space<vmem>>, %arg2: memref<3x8x96xbf16, #tpu.memory_space<vmem>>, %arg3: memref<4x72xf32, #tpu.memory_space<vmem>>, %arg4: memref<8x1xf32, #tpu.memory_space<vmem>>, %arg5: memref<1x480xf32, #tpu.memory_space<vmem>>, %arg6: memref<1x32x384xf32, #tpu.memory_space<vmem>>, %arg7: memref<96x576xbf16, #tpu.memory_space<vmem>>, %arg8: memref<72x384xf32, #tpu.memory_space<vmem>>) attributes {dimension_semantics = [#tpu.dimension_semantics<parallel>], iteration_bounds = array<i64: 2>, scalar_prefetch = 0 : i64, scratch_operands = 2 : i64, tpu.core_type = #tpu.core_type<tc>, window_params = [{transform_indices = @transform_0, window_bounds = array<i64: 1, 32, 256>}, {pipeline_mode = #tpu.pipeline_mode<synchronous>, transform_indices = @transform_1, window_bounds = array<i64: 3, 8, 96>}, {pipeline_mode = #tpu.pipeline_mode<synchronous>, transform_indices = @transform_2, window_bounds = array<i64: 4, 72>}, {pipeline_mode = #tpu.pipeline_mode<synchronous>, transform_indices = @transform_3, window_bounds = array<i64: 8, 1>}, {pipeline_mode = #tpu.pipeline_mode<synchronous>, transform_indices = @transform_4, window_bounds = array<i64: 1, 480>}, {transform_indices = @transform_5, window_bounds = array<i64: 1, 32, 384>}]} {
    %cst = arith.constant 0.000000e+00 : bf16
    %0 = vector.broadcast %cst : bf16 to vector<96x576xbf16>
    %c0 = arith.constant 0 : index
    %c0_0 = arith.constant 0 : index
    %1 = vector.load %arg7[%c0, %c0_0] : memref<96x576xbf16, #tpu.memory_space<vmem>>, vector<96x576xbf16>
    tpu.vector_store %arg7[%c0, %c0_0], %0 {strides = array<i32>} : memref<96x576xbf16, #tpu.memory_space<vmem>>, vector<96x576xbf16>,
    %c0_1 = arith.constant 0 : index
    %c0_2 = arith.constant 0 : index
    %c0_3 = arith.constant 0 : index
    %2 = vector.load %arg1[%c0_1, %c0_2, %c0_3] : memref<1x32x256xbf16, #tpu.memory_space<vmem>>, vector<1x32x16xbf16>
    %3 = vector.shape_cast %2 : vector<1x32x16xbf16> to vector<32x16xbf16>
    %c32 = arith.constant 32 : index
    %c100 = arith.constant 100 : index
    %4 = vector.load %arg7[%c32, %c100] : memref<96x576xbf16, #tpu.memory_space<vmem>>, vector<32x16xbf16>
    tpu.vector_store %arg7[%c32, %c100], %3 {strides = array<i32>} : memref<96x576xbf16, #tpu.memory_space<vmem>>, vector<32x16xbf16>,
    %c0_4 = arith.constant 0 : index
    %c0_5 = arith.constant 0 : index
    %c16 = arith.constant 16 : index
    %5 = vector.load %arg1[%c0_4, %c0_5, %c16] : memref<1x32x256xbf16, #tpu.memory_space<vmem>>, vector<1x32x16xbf16>
    %6 = vector.shape_cast %5 : vector<1x32x16xbf16> to vector<32x16xbf16>
    %c32_6 = arith.constant 32 : index
    %c124 = arith.constant 124 : index
    %7 = vector.load %arg7[%c32_6, %c124] : memref<96x576xbf16, #tpu.memory_space<vmem>>, vector<32x16xbf16>
    tpu.vector_store %arg7[%c32_6, %c124], %6 {strides = array<i32>} : memref<96x576xbf16, #tpu.memory_space<vmem>>, vector<32x16xbf16>,
    %c0_7 = arith.constant 0 : index
    %c0_8 = arith.constant 0 : index
    %c32_9 = arith.constant 32 : index
    %8 = vector.load %arg1[%c0_7, %c0_8, %c32_9] : memref<1x32x256xbf16, #tpu.memory_space<vmem>>, vector<1x32x16xbf16>
    %9 = vector.shape_cast %8 : vector<1x32x16xbf16> to vector<32x16xbf16>
    %c32_10 = arith.constant 32 : index
    %c148 = arith.constant 148 : index
    %10 = vector.load %arg7[%c32_10, %c148] : memref<96x576xbf16, #tpu.memory_space<vmem>>, vector<32x16xbf16>
    tpu.vector_store %arg7[%c32_10, %c148], %9 {strides = array<i32>} : memref<96x576xbf16, #tpu.memory_space<vmem>>, vector<32x16xbf16>,
    %c0_11 = arith.constant 0 : index
    %c0_12 = arith.constant 0 : index
    %c48 = arith.constant 48 : index
    %11 = vector.load %arg1[%c0_11, %c0_12, %c48] : memref<1x32x256xbf16, #tpu.memory_space<vmem>>, vector<1x32x16xbf16>
    %12 = vector.shape_cast %11 : vector<1x32x16xbf16> to vector<32x16xbf16>
    %c32_13 = arith.constant 32 : index
    %c172 = arith.constant 172 : index
    %13 = vector.load %arg7[%c32_13, %c172] : memref<96x576xbf16, #tpu.memory_space<vmem>>, vector<32x16xbf16>
    tpu.vector_store %arg7[%c32_13, %c172], %12 {strides = array<i32>} : memref<96x576xbf16, #tpu.memory_space<vmem>>, vector<32x16xbf16>,
    %c0_14 = arith.constant 0 : index
    %c0_15 = arith.constant 0 : index
    %c64 = arith.constant 64 : index
    %14 = vector.load %arg1[%c0_14, %c0_15, %c64] : memref<1x32x256xbf16, #tpu.memory_space<vmem>>, vector<1x32x16xbf16>
    %15 = vector.shape_cast %14 : vector<1x32x16xbf16> to vector<32x16xbf16>
    %c32_16 = arith.constant 32 : index
    %c196 = arith.constant 196 : index
    %16 = vector.load %arg7[%c32_16, %c196] : memref<96x576xbf16, #tpu.memory_space<vmem>>, vector<32x16xbf16>
    tpu.vector_store %arg7[%c32_16, %c196], %15 {strides = array<i32>} : memref<96x576xbf16, #tpu.memory_space<vmem>>, vector<32x16xbf16>,
    %c0_17 = arith.constant 0 : index
    %c0_18 = arith.constant 0 : index
    %c80 = arith.constant 80 : index
    %17 = vector.load %arg1[%c0_17, %c0_18, %c80] : memref<1x32x256xbf16, #tpu.memory_space<vmem>>, vector<1x32x16xbf16>
    %18 = vector.shape_cast %17 : vector<1x32x16xbf16> to vector<32x16xbf16>
    %c32_19 = arith.constant 32 : index
    %c220 = arith.constant 220 : index
    %19 = vector.load %arg7[%c32_19, %c220] : memref<96x576xbf16, #tpu.memory_space<vmem>>, vector<32x16xbf16>
    tpu.vector_store %arg7[%c32_19, %c220], %18 {strides = array<i32>} : memref<96x576xbf16, #tpu.memory_space<vmem>>, vector<32x16xbf16>,
    %c0_20 = arith.constant 0 : index
    %c0_21 = arith.constant 0 : index
    %c96 = arith.constant 96 : index
    %20 = vector.load %arg1[%c0_20, %c0_21, %c96] : memref<1x32x256xbf16, #tpu.memory_space<vmem>>, vector<1x32x16xbf16>
    %21 = vector.shape_cast %20 : vector<1x32x16xbf16> to vector<32x16xbf16>
    %c32_22 = arith.constant 32 : index
    %c244 = arith.constant 244 : index
    %22 = vector.load %arg7[%c32_22, %c244] : memref<96x576xbf16, #tpu.memory_space<vmem>>, vector<32x16xbf16>
    tpu.vector_store %arg7[%c32_22, %c244], %21 {strides = array<i32>} : memref<96x576xbf16, #tpu.memory_space<vmem>>, vector<32x16xbf16>,
    %c0_23 = arith.constant 0 : index
    %c0_24 = arith.constant 0 : index
    %c112 = arith.constant 112 : index
    %23 = vector.load %arg1[%c0_23, %c0_24, %c112] : memref<1x32x256xbf16, #tpu.memory_space<vmem>>, vector<1x32x16xbf16>
    %24 = vector.shape_cast %23 : vector<1x32x16xbf16> to vector<32x16xbf16>
    %c32_25 = arith.constant 32 : index
    %c268 = arith.constant 268 : index
    %25 = vector.load %arg7[%c32_25, %c268] : memref<96x576xbf16, #tpu.memory_space<vmem>>, vector<32x16xbf16>
    tpu.vector_store %arg7[%c32_25, %c268], %24 {strides = array<i32>} : memref<96x576xbf16, #tpu.memory_space<vmem>>, vector<32x16xbf16>,
    %c0_26 = arith.constant 0 : index
    %c0_27 = arith.constant 0 : index
    %c128 = arith.constant 128 : index
    %26 = vector.load %arg1[%c0_26, %c0_27, %c128] : memref<1x32x256xbf16, #tpu.memory_space<vmem>>, vector<1x32x16xbf16>
    %27 = vector.shape_cast %26 : vector<1x32x16xbf16> to vector<32x16xbf16>
    %c32_28 = arith.constant 32 : index
    %c292 = arith.constant 292 : index
    %28 = vector.load %arg7[%c32_28, %c292] : memref<96x576xbf16, #tpu.memory_space<vmem>>, vector<32x16xbf16>
    tpu.vector_store %arg7[%c32_28, %c292], %27 {strides = array<i32>} : memref<96x576xbf16, #tpu.memory_space<vmem>>, vector<32x16xbf16>,
    %c0_29 = arith.constant 0 : index
    %c0_30 = arith.constant 0 : index
    %c144 = arith.constant 144 : index
    %29 = vector.load %arg1[%c0_29, %c0_30, %c144] : memref<1x32x256xbf16, #tpu.memory_space<vmem>>, vector<1x32x16xbf16>
    %30 = vector.shape_cast %29 : vector<1x32x16xbf16> to vector<32x16xbf16>
    %c32_31 = arith.constant 32 : index
    %c316 = arith.constant 316 : index
    %31 = vector.load %arg7[%c32_31, %c316] : memref<96x576xbf16, #tpu.memory_space<vmem>>, vector<32x16xbf16>
    tpu.vector_store %arg7[%c32_31, %c316], %30 {strides = array<i32>} : memref<96x576xbf16, #tpu.memory_space<vmem>>, vector<32x16xbf16>,
    %c0_32 = arith.constant 0 : index
    %c0_33 = arith.constant 0 : index
    %c160 = arith.constant 160 : index
    %32 = vector.load %arg1[%c0_32, %c0_33, %c160] : memref<1x32x256xbf16, #tpu.memory_space<vmem>>, vector<1x32x16xbf16>
    %33 = vector.shape_cast %32 : vector<1x32x16xbf16> to vector<32x16xbf16>
    %c32_34 = arith.constant 32 : index
    %c340 = arith.constant 340 : index
    %34 = vector.load %arg7[%c32_34, %c340] : memref<96x576xbf16, #tpu.memory_space<vmem>>, vector<32x16xbf16>
    tpu.vector_store %arg7[%c32_34, %c340], %33 {strides = array<i32>} : memref<96x576xbf16, #tpu.memory_space<vmem>>, vector<32x16xbf16>,
    %c0_35 = arith.constant 0 : index
    %c0_36 = arith.constant 0 : index
    %c176 = arith.constant 176 : index
    %35 = vector.load %arg1[%c0_35, %c0_36, %c176] : memref<1x32x256xbf16, #tpu.memory_space<vmem>>, vector<1x32x16xbf16>
    %36 = vector.shape_cast %35 : vector<1x32x16xbf16> to vector<32x16xbf16>
    %c32_37 = arith.constant 32 : index
    %c364 = arith.constant 364 : index
    %37 = vector.load %arg7[%c32_37, %c364] : memref<96x576xbf16, #tpu.memory_space<vmem>>, vector<32x16xbf16>
    tpu.vector_store %arg7[%c32_37, %c364], %36 {strides = array<i32>} : memref<96x576xbf16, #tpu.memory_space<vmem>>, vector<32x16xbf16>,
    %c0_38 = arith.constant 0 : index
    %c0_39 = arith.constant 0 : index
    %c192 = arith.constant 192 : index
    %38 = vector.load %arg1[%c0_38, %c0_39, %c192] : memref<1x32x256xbf16, #tpu.memory_space<vmem>>, vector<1x32x16xbf16>
    %39 = vector.shape_cast %38 : vector<1x32x16xbf16> to vector<32x16xbf16>
    %c32_40 = arith.constant 32 : index
    %c388 = arith.constant 388 : index
    %40 = vector.load %arg7[%c32_40, %c388] : memref<96x576xbf16, #tpu.memory_space<vmem>>, vector<32x16xbf16>
    tpu.vector_store %arg7[%c32_40, %c388], %39 {strides = array<i32>} : memref<96x576xbf16, #tpu.memory_space<vmem>>, vector<32x16xbf16>,
    %c0_41 = arith.constant 0 : index
    %c0_42 = arith.constant 0 : index
    %c208 = arith.constant 208 : index
    %41 = vector.load %arg1[%c0_41, %c0_42, %c208] : memref<1x32x256xbf16, #tpu.memory_space<vmem>>, vector<1x32x16xbf16>
    %42 = vector.shape_cast %41 : vector<1x32x16xbf16> to vector<32x16xbf16>
    %c32_43 = arith.constant 32 : index
    %c412 = arith.constant 412 : index
    %43 = vector.load %arg7[%c32_43, %c412] : memref<96x576xbf16, #tpu.memory_space<vmem>>, vector<32x16xbf16>
    tpu.vector_store %arg7[%c32_43, %c412], %42 {strides = array<i32>} : memref<96x576xbf16, #tpu.memory_space<vmem>>, vector<32x16xbf16>,
    %c0_44 = arith.constant 0 : index
    %c0_45 = arith.constant 0 : index
    %c224 = arith.constant 224 : index
    %44 = vector.load %arg1[%c0_44, %c0_45, %c224] : memref<1x32x256xbf16, #tpu.memory_space<vmem>>, vector<1x32x16xbf16>
    %45 = vector.shape_cast %44 : vector<1x32x16xbf16> to vector<32x16xbf16>
    %c32_46 = arith.constant 32 : index
    %c436 = arith.constant 436 : index
    %46 = vector.load %arg7[%c32_46, %c436] : memref<96x576xbf16, #tpu.memory_space<vmem>>, vector<32x16xbf16>
    tpu.vector_store %arg7[%c32_46, %c436], %45 {strides = array<i32>} : memref<96x576xbf16, #tpu.memory_space<vmem>>, vector<32x16xbf16>,
    %c0_47 = arith.constant 0 : index
    %c0_48 = arith.constant 0 : index
    %c240 = arith.constant 240 : index
    %47 = vector.load %arg1[%c0_47, %c0_48, %c240] : memref<1x32x256xbf16, #tpu.memory_space<vmem>>, vector<1x32x16xbf16>
    %48 = vector.shape_cast %47 : vector<1x32x16xbf16> to vector<32x16xbf16>
    %c32_49 = arith.constant 32 : index
    %c460 = arith.constant 460 : index
    %49 = vector.load %arg7[%c32_49, %c460] : memref<96x576xbf16, #tpu.memory_space<vmem>>, vector<32x16xbf16>
    tpu.vector_store %arg7[%c32_49, %c460], %48 {strides = array<i32>} : memref<96x576xbf16, #tpu.memory_space<vmem>>, vector<32x16xbf16>,
    %c32_50 = arith.constant 32 : index
    %c0_51 = arith.constant 0 : index
    %50 = vector.load %arg7[%c32_50, %c0_51] : memref<96x576xbf16, #tpu.memory_space<vmem>>, vector<32x576xbf16>
    %51 = vector.extract_strided_slice %50 {offsets = [0, 0], sizes = [32, 552], strides = [1, 1]} : vector<32x576xbf16> to vector<32x552xbf16>
    %c0_52 = arith.constant 0 : index
    %c24 = arith.constant 24 : index
    %52 = vector.load %arg7[%c0_52, %c24] : memref<96x576xbf16, #tpu.memory_space<vmem>>, vector<32x552xbf16>
    tpu.vector_store %arg7[%c0_52, %c24], %51 {strides = array<i32>} : memref<96x576xbf16, #tpu.memory_space<vmem>>, vector<32x552xbf16>,
    %53 = vector.extract_strided_slice %50 {offsets = [0, 24], sizes = [32, 552], strides = [1, 1]} : vector<32x576xbf16> to vector<32x552xbf16>
    %c64_53 = arith.constant 64 : index
    %c0_54 = arith.constant 0 : index
    %54 = vector.load %arg7[%c64_53, %c0_54] : memref<96x576xbf16, #tpu.memory_space<vmem>>, vector<32x552xbf16>
    tpu.vector_store %arg7[%c64_53, %c0_54], %53 {strides = array<i32>} : memref<96x576xbf16, #tpu.memory_space<vmem>>, vector<32x552xbf16>,
    %c0_55 = arith.constant 0 : index
    %c0_56 = arith.constant 0 : index
    %c0_57 = arith.constant 0 : index
    %55 = vector.load %arg2[%c0_55, %c0_56, %c0_57] : memref<3x8x96xbf16, #tpu.memory_space<vmem>>, vector<1x8x96xbf16>
    %56 = vector.shape_cast %55 : vector<1x8x96xbf16> to vector<8x96xbf16>
    %c0_58 = arith.constant 0 : index
    %c47 = arith.constant 47 : index
    %57 = vector.load %arg7[%c0_58, %c47] : memref<96x576xbf16, #tpu.memory_space<vmem>>, vector<96x480xbf16>
    %cst_59 = arith.constant dense<0.000000e+00> : vector<8x480xf32>
    %58 = tpu.matmul %56, %57, %cst_59 {dimension_numbers = #tpu.dot_dimension_numbers<[1], [0], [0], [1], [0, 0, 1, 1], [], []>} : vector<8x96xbf16>, vector<96x480xbf16>, vector<8x480xf32> -> vector<8x480xf32>
    %c1 = arith.constant 1 : index
    %c0_60 = arith.constant 0 : index
    %c0_61 = arith.constant 0 : index
    %59 = vector.load %arg2[%c1, %c0_60, %c0_61] : memref<3x8x96xbf16, #tpu.memory_space<vmem>>, vector<1x8x96xbf16>
    %60 = vector.shape_cast %59 : vector<1x8x96xbf16> to vector<8x96xbf16>
    %c0_62 = arith.constant 0 : index
    %c48_63 = arith.constant 48 : index
    %61 = vector.load %arg7[%c0_62, %c48_63] : memref<96x576xbf16, #tpu.memory_space<vmem>>, vector<96x480xbf16>
    %cst_64 = arith.constant dense<0.000000e+00> : vector<8x480xf32>
    %62 = tpu.matmul %60, %61, %cst_64 {dimension_numbers = #tpu.dot_dimension_numbers<[1], [0], [0], [1], [0, 0, 1, 1], [], []>} : vector<8x96xbf16>, vector<96x480xbf16>, vector<8x480xf32> -> vector<8x480xf32>
    %63 = arith.addf %58, %62 : vector<8x480xf32>
    %c2 = arith.constant 2 : index
    %c0_65 = arith.constant 0 : index
    %c0_66 = arith.constant 0 : index
    %64 = vector.load %arg2[%c2, %c0_65, %c0_66] : memref<3x8x96xbf16, #tpu.memory_space<vmem>>, vector<1x8x96xbf16>
    %65 = vector.shape_cast %64 : vector<1x8x96xbf16> to vector<8x96xbf16>
    %c0_67 = arith.constant 0 : index
    %c49 = arith.constant 49 : index
    %66 = vector.load %arg7[%c0_67, %c49] : memref<96x576xbf16, #tpu.memory_space<vmem>>, vector<96x480xbf16>
    %cst_68 = arith.constant dense<0.000000e+00> : vector<8x480xf32>
    %67 = tpu.matmul %65, %66, %cst_68 {dimension_numbers = #tpu.dot_dimension_numbers<[1], [0], [0], [1], [0, 0, 1, 1], [], []>} : vector<8x96xbf16>, vector<96x480xbf16>, vector<8x480xf32> -> vector<8x480xf32>
    %68 = arith.addf %63, %67 : vector<8x480xf32>
    %c0_69 = arith.constant 0 : index
    %c0_70 = arith.constant 0 : index
    %69 = vector.load %arg4[%c0_69, %c0_70] : memref<8x1xf32, #tpu.memory_space<vmem>>, vector<8x1xf32>
    %70 = vector.broadcast %69 : vector<8x1xf32> to vector<8x480xf32>
    %71 = arith.addf %68, %70 : vector<8x480xf32>
    %c0_71 = arith.constant 0 : index
    %c0_72 = arith.constant 0 : index
    %72 = vector.load %arg5[%c0_71, %c0_72] : memref<1x480xf32, #tpu.memory_space<vmem>>, vector<1x480xf32>
    %73 = vector.broadcast %72 : vector<1x480xf32> to vector<8x480xf32>
    %74 = arith.mulf %71, %73 : vector<8x480xf32>
    %75 = vector.extract_strided_slice %74 {offsets = [0, 23], sizes = [8, 384], strides = [1, 1]} : vector<8x480xf32> to vector<8x384xf32>
    %c0_73 = arith.constant 0 : index
    %c0_74 = arith.constant 0 : index
    %76 = vector.load %arg8[%c0_73, %c0_74] : memref<72x384xf32, #tpu.memory_space<vmem>>, vector<8x384xf32>
    tpu.vector_store %arg8[%c0_73, %c0_74], %75 {strides = array<i32>} : memref<72x384xf32, #tpu.memory_space<vmem>>, vector<8x384xf32>,
    %77 = vector.extract_strided_slice %74 {offsets = [0, 24], sizes = [8, 384], strides = [1, 1]} : vector<8x480xf32> to vector<8x384xf32>
    %c8 = arith.constant 8 : index
    %c0_75 = arith.constant 0 : index
    %78 = vector.load %arg8[%c8, %c0_75] : memref<72x384xf32, #tpu.memory_space<vmem>>, vector<8x384xf32>
    tpu.vector_store %arg8[%c8, %c0_75], %77 {strides = array<i32>} : memref<72x384xf32, #tpu.memory_space<vmem>>, vector<8x384xf32>,
    %79 = vector.extract_strided_slice %74 {offsets = [0, 25], sizes = [8, 384], strides = [1, 1]} : vector<8x480xf32> to vector<8x384xf32>
    %c16_76 = arith.constant 16 : index
    %c0_77 = arith.constant 0 : index
    %80 = vector.load %arg8[%c16_76, %c0_77] : memref<72x384xf32, #tpu.memory_space<vmem>>, vector<8x384xf32>
    tpu.vector_store %arg8[%c16_76, %c0_77], %79 {strides = array<i32>} : memref<72x384xf32, #tpu.memory_space<vmem>>, vector<8x384xf32>,
    %81 = vector.extract_strided_slice %74 {offsets = [0, 47], sizes = [8, 384], strides = [1, 1]} : vector<8x480xf32> to vector<8x384xf32>
    %c24_78 = arith.constant 24 : index
    %c0_79 = arith.constant 0 : index
    %82 = vector.load %arg8[%c24_78, %c0_79] : memref<72x384xf32, #tpu.memory_space<vmem>>, vector<8x384xf32>
    tpu.vector_store %arg8[%c24_78, %c0_79], %81 {strides = array<i32>} : memref<72x384xf32, #tpu.memory_space<vmem>>, vector<8x384xf32>,
    %83 = vector.extract_strided_slice %74 {offsets = [0, 48], sizes = [8, 384], strides = [1, 1]} : vector<8x480xf32> to vector<8x384xf32>
    %c32_80 = arith.constant 32 : index
    %c0_81 = arith.constant 0 : index
    %84 = vector.load %arg8[%c32_80, %c0_81] : memref<72x384xf32, #tpu.memory_space<vmem>>, vector<8x384xf32>
    tpu.vector_store %arg8[%c32_80, %c0_81], %83 {strides = array<i32>} : memref<72x384xf32, #tpu.memory_space<vmem>>, vector<8x384xf32>,
    %85 = vector.extract_strided_slice %74 {offsets = [0, 49], sizes = [8, 384], strides = [1, 1]} : vector<8x480xf32> to vector<8x384xf32>
    %c40 = arith.constant 40 : index
    %c0_82 = arith.constant 0 : index
    %86 = vector.load %arg8[%c40, %c0_82] : memref<72x384xf32, #tpu.memory_space<vmem>>, vector<8x384xf32>
    tpu.vector_store %arg8[%c40, %c0_82], %85 {strides = array<i32>} : memref<72x384xf32, #tpu.memory_space<vmem>>, vector<8x384xf32>,
    %87 = vector.extract_strided_slice %74 {offsets = [0, 71], sizes = [8, 384], strides = [1, 1]} : vector<8x480xf32> to vector<8x384xf32>
    %c48_83 = arith.constant 48 : index
    %c0_84 = arith.constant 0 : index
    %88 = vector.load %arg8[%c48_83, %c0_84] : memref<72x384xf32, #tpu.memory_space<vmem>>, vector<8x384xf32>
    tpu.vector_store %arg8[%c48_83, %c0_84], %87 {strides = array<i32>} : memref<72x384xf32, #tpu.memory_space<vmem>>, vector<8x384xf32>,
    %89 = vector.extract_strided_slice %74 {offsets = [0, 72], sizes = [8, 384], strides = [1, 1]} : vector<8x480xf32> to vector<8x384xf32>
    %c56 = arith.constant 56 : index
    %c0_85 = arith.constant 0 : index
    %90 = vector.load %arg8[%c56, %c0_85] : memref<72x384xf32, #tpu.memory_space<vmem>>, vector<8x384xf32>
    tpu.vector_store %arg8[%c56, %c0_85], %89 {strides = array<i32>} : memref<72x384xf32, #tpu.memory_space<vmem>>, vector<8x384xf32>,
    %91 = vector.extract_strided_slice %74 {offsets = [0, 73], sizes = [8, 384], strides = [1, 1]} : vector<8x480xf32> to vector<8x384xf32>
    %c64_86 = arith.constant 64 : index
    %c0_87 = arith.constant 0 : index
    %92 = vector.load %arg8[%c64_86, %c0_87] : memref<72x384xf32, #tpu.memory_space<vmem>>, vector<8x384xf32>
    tpu.vector_store %arg8[%c64_86, %c0_87], %91 {strides = array<i32>} : memref<72x384xf32, #tpu.memory_space<vmem>>, vector<8x384xf32>,
    %c0_88 = arith.constant 0 : index
    %c0_89 = arith.constant 0 : index
    %93 = vector.load %arg3[%c0_88, %c0_89] : memref<4x72xf32, #tpu.memory_space<vmem>>, vector<4x72xf32>
    %c0_90 = arith.constant 0 : index
    %c0_91 = arith.constant 0 : index
    %94 = vector.load %arg8[%c0_90, %c0_91] : memref<72x384xf32, #tpu.memory_space<vmem>>, vector<72x384xf32>
    %cst_92 = arith.constant dense<0.000000e+00> : vector<4x384xf32>
    %95 = tpu.matmul %93, %94, %cst_92 {dimension_numbers = #tpu.dot_dimension_numbers<[1], [0], [0], [1], [0, 0, 1, 1], [], []>} : vector<4x72xf32>, vector<72x384xf32>, vector<4x384xf32> -> vector<4x384xf32>
    %cst_93 = arith.constant dense<0xFF800000> : vector<384xf32>
    %96 = vector.multi_reduction <maximumf>, %95, %cst_93 [0] : vector<4x384xf32> to vector<384xf32>
    %97 = vector.shape_cast %96 : vector<384xf32> to vector<1x384xf32>
    %98 = vector.broadcast %97 : vector<1x384xf32> to vector<4x384xf32>
    %99 = arith.subf %95, %98 : vector<4x384xf32>
    %100 = math.exp %99 : vector<4x384xf32>
    %cst_94 = arith.constant dense<0.000000e+00> : vector<384xf32>
    %101 = vector.multi_reduction <add>, %100, %cst_94 [0] : vector<4x384xf32> to vector<384xf32>
    %102 = vector.shape_cast %101 : vector<384xf32> to vector<1x384xf32>
    %103 = tpu.reciprocal %102 {approx = true} : vector<1x384xf32> -> vector<1x384xf32>
    %104 = vector.broadcast %103 : vector<1x384xf32> to vector<4x384xf32>
    %105 = arith.mulf %100, %104 : vector<4x384xf32>
    %c32_95 = arith.constant 32 : index
    %c96_96 = arith.constant 96 : index
    %106 = vector.load %arg7[%c32_95, %c96_96] : memref<96x576xbf16, #tpu.memory_space<vmem>>, vector<32x384xbf16>
    %107 = arith.extf %106 : vector<32x384xbf16> to vector<32x384xf32>
    %108 = vector.extract_strided_slice %105 {offsets = [0, 0], sizes = [1, 384], strides = [1, 1]} : vector<4x384xf32> to vector<1x384xf32>
    %109 = vector.broadcast %108 : vector<1x384xf32> to vector<32x384xf32>
    %110 = arith.mulf %107, %109 : vector<32x384xf32>
    %c32_97 = arith.constant 32 : index
    %c71 = arith.constant 71 : index
    %111 = vector.load %arg7[%c32_97, %c71] : memref<96x576xbf16, #tpu.memory_space<vmem>>, vector<32x434xbf16>
    %112 = arith.extf %111 : vector<32x434xbf16> to vector<32x434xf32>
    %113 = vector.extract_strided_slice %112 {offsets = [0, 0], sizes = [32, 432], strides = [1, 1]} : vector<32x434xf32> to vector<32x432xf32>
    %114 = vector.extract_strided_slice %112 {offsets = [0, 1], sizes = [32, 432], strides = [1, 1]} : vector<32x434xf32> to vector<32x432xf32>
    %115 = arith.addf %113, %114 : vector<32x432xf32>
    %116 = vector.extract_strided_slice %112 {offsets = [0, 2], sizes = [32, 432], strides = [1, 1]} : vector<32x434xf32> to vector<32x432xf32>
    %117 = arith.addf %115, %116 : vector<32x432xf32>
    %118 = vector.extract_strided_slice %117 {offsets = [0, 0], sizes = [32, 384], strides = [1, 1]} : vector<32x432xf32> to vector<32x384xf32>
    %119 = vector.extract_strided_slice %117 {offsets = [0, 24], sizes = [32, 384], strides = [1, 1]} : vector<32x432xf32> to vector<32x384xf32>
    %120 = arith.addf %118, %119 : vector<32x384xf32>
    %121 = vector.extract_strided_slice %117 {offsets = [0, 48], sizes = [32, 384], strides = [1, 1]} : vector<32x432xf32> to vector<32x384xf32>
    %122 = arith.addf %120, %121 : vector<32x384xf32>
    %cst_98 = arith.constant 0.111111112 : f32
    %123 = vector.broadcast %cst_98 : f32 to vector<32x384xf32>
    %124 = arith.mulf %122, %123 : vector<32x384xf32>
    %125 = vector.extract_strided_slice %105 {offsets = [1, 0], sizes = [1, 384], strides = [1, 1]} : vector<4x384xf32> to vector<1x384xf32>
    %126 = vector.broadcast %125 : vector<1x384xf32> to vector<32x384xf32>
    %127 = arith.mulf %124, %126 : vector<32x384xf32>
    %128 = arith.addf %110, %127 : vector<32x384xf32>
    %c32_99 = arith.constant 32 : index
    %c46 = arith.constant 46 : index
    %129 = vector.load %arg7[%c32_99, %c46] : memref<96x576xbf16, #tpu.memory_space<vmem>>, vector<32x484xbf16>
    %130 = arith.extf %129 : vector<32x484xbf16> to vector<32x484xf32>
    %131 = vector.extract_strided_slice %130 {offsets = [0, 0], sizes = [32, 480], strides = [1, 1]} : vector<32x484xf32> to vector<32x480xf32>
    %132 = vector.extract_strided_slice %130 {offsets = [0, 2], sizes = [32, 480], strides = [1, 1]} : vector<32x484xf32> to vector<32x480xf32>
    %133 = arith.addf %131, %132 : vector<32x480xf32>
    %134 = vector.extract_strided_slice %130 {offsets = [0, 4], sizes = [32, 480], strides = [1, 1]} : vector<32x484xf32> to vector<32x480xf32>
    %135 = arith.addf %133, %134 : vector<32x480xf32>
    %136 = vector.extract_strided_slice %135 {offsets = [0, 0], sizes = [32, 384], strides = [1, 1]} : vector<32x480xf32> to vector<32x384xf32>
    %137 = vector.extract_strided_slice %135 {offsets = [0, 48], sizes = [32, 384], strides = [1, 1]} : vector<32x480xf32> to vector<32x384xf32>
    %138 = arith.addf %136, %137 : vector<32x384xf32>
    %139 = vector.extract_strided_slice %135 {offsets = [0, 96], sizes = [32, 384], strides = [1, 1]} : vector<32x480xf32> to vector<32x384xf32>
    %140 = arith.addf %138, %139 : vector<32x384xf32>
    %cst_100 = arith.constant 0.111111112 : f32
    %141 = vector.broadcast %cst_100 : f32 to vector<32x384xf32>
    %142 = arith.mulf %140, %141 : vector<32x384xf32>
    %143 = vector.extract_strided_slice %105 {offsets = [2, 0], sizes = [1, 384], strides = [1, 1]} : vector<4x384xf32> to vector<1x384xf32>
    %144 = vector.broadcast %143 : vector<1x384xf32> to vector<32x384xf32>
    %145 = arith.mulf %142, %144 : vector<32x384xf32>
    %146 = arith.addf %128, %145 : vector<32x384xf32>
    %c32_101 = arith.constant 32 : index
    %c21 = arith.constant 21 : index
    %147 = vector.load %arg7[%c32_101, %c21] : memref<96x576xbf16, #tpu.memory_space<vmem>>, vector<32x534xbf16>
    %148 = arith.extf %147 : vector<32x534xbf16> to vector<32x534xf32>
    %149 = vector.extract_strided_slice %148 {offsets = [0, 0], sizes = [32, 528], strides = [1, 1]} : vector<32x534xf32> to vector<32x528xf32>
    %150 = vector.extract_strided_slice %148 {offsets = [0, 3], sizes = [32, 528], strides = [1, 1]} : vector<32x534xf32> to vector<32x528xf32>
    %151 = arith.addf %149, %150 : vector<32x528xf32>
    %152 = vector.extract_strided_slice %148 {offsets = [0, 6], sizes = [32, 528], strides = [1, 1]} : vector<32x534xf32> to vector<32x528xf32>
    %153 = arith.addf %151, %152 : vector<32x528xf32>
    %154 = vector.extract_strided_slice %153 {offsets = [0, 0], sizes = [32, 384], strides = [1, 1]} : vector<32x528xf32> to vector<32x384xf32>
    %155 = vector.extract_strided_slice %153 {offsets = [0, 72], sizes = [32, 384], strides = [1, 1]} : vector<32x528xf32> to vector<32x384xf32>
    %156 = arith.addf %154, %155 : vector<32x384xf32>
    %157 = vector.extract_strided_slice %153 {offsets = [0, 144], sizes = [32, 384], strides = [1, 1]} : vector<32x528xf32> to vector<32x384xf32>
    %158 = arith.addf %156, %157 : vector<32x384xf32>
    %cst_102 = arith.constant 0.111111112 : f32
    %159 = vector.broadcast %cst_102 : f32 to vector<32x384xf32>
    %160 = arith.mulf %158, %159 : vector<32x384xf32>
    %161 = vector.extract_strided_slice %105 {offsets = [3, 0], sizes = [1, 384], strides = [1, 1]} : vector<4x384xf32> to vector<1x384xf32>
    %162 = vector.broadcast %161 : vector<1x384xf32> to vector<32x384xf32>
    %163 = arith.mulf %160, %162 : vector<32x384xf32>
    %164 = arith.addf %146, %163 : vector<32x384xf32>
    %c0_103 = arith.constant 0 : index
    %c0_104 = arith.constant 0 : index
    %c0_105 = arith.constant 0 : index
    %165 = vector.load %arg6[%c0_103, %c0_104, %c0_105] : memref<1x32x384xf32, #tpu.memory_space<vmem>>, vector<1x32x384xf32>
    %166 = vector.shape_cast %165 : vector<1x32x384xf32> to vector<32x384xf32>
    %167 = vector.shape_cast %164 : vector<32x384xf32> to vector<1x32x384xf32>
    tpu.vector_store %arg6[%c0_103, %c0_104, %c0_105], %167 {strides = array<i32>} : memref<1x32x384xf32, #tpu.memory_space<vmem>>, vector<1x32x384xf32>,
    return
  }
  func.func @transform_0(%arg0: i32) -> (i32, i32, i32) {
    %c0_i32 = arith.constant 0 : i32
    %c0_i32_0 = arith.constant 0 : i32
    %c0_i32_1 = arith.constant 0 : i32
    return %arg0, %c0_i32, %c0_i32_0 : i32, i32, i32
  }
  func.func @transform_1(%arg0: i32) -> (i32, i32, i32) {
    %c0_i32 = arith.constant 0 : i32
    %c0_i32_0 = arith.constant 0 : i32
    %c0_i32_1 = arith.constant 0 : i32
    %c0_i32_2 = arith.constant 0 : i32
    return %c0_i32, %c0_i32_0, %c0_i32_1 : i32, i32, i32
  }
  func.func @transform_2(%arg0: i32) -> (i32, i32) {
    %c0_i32 = arith.constant 0 : i32
    %c0_i32_0 = arith.constant 0 : i32
    %c0_i32_1 = arith.constant 0 : i32
    return %c0_i32, %c0_i32_0 : i32, i32
  }
  func.func @transform_3(%arg0: i32) -> (i32, i32) {
    %c0_i32 = arith.constant 0 : i32
    %c0_i32_0 = arith.constant 0 : i32
    %c0_i32_1 = arith.constant 0 : i32
    return %c0_i32, %c0_i32_0 : i32, i32
  }
  func.func @transform_4(%arg0: i32) -> (i32, i32) {
    %c0_i32 = arith.constant 0 : i32
    %c0_i32_0 = arith.constant 0 : i32
    %c0_i32_1 = arith.constant 0 : i32
    return %c0_i32, %c0_i32_0 : i32, i32
  }
  func.func @transform_5(%arg0: i32) -> (i32, i32, i32) {
    %c0_i32 = arith.constant 0 : i32
    %c0_i32_0 = arith.constant 0 : i32
    %c0_i32_1 = arith.constant 0 : i32
    return %arg0, %c0_i32, %c0_i32_0 : i32, i32, i32
  }
}

</mosaic_0001>

<bundles_post_ra>
// kernel: tpu_custom_call.1
= control target key start
LH: loop header
LB: loop body
LE: loop exit
PB: predicated region body
PF: predicated region fallthrough
CT: control target
= control target key end

     0   :  { %10 = vsyncpa [#allocation5], 0  ;;  %s6814_s0 = inlined_call_operand.hbm [shape: bf16[2,32,256], index: 0, kind: input, shape index: {}]   ;;  %s6815_s1 = inlined_call_operand.vmem [shape: bf16[3,8,96], index: 1, kind: input, shape index: {}]   ;;  %s6816_s2 = inlined_call_operand.vmem [shape: f32[4,72], index: 2, kind: input, shape index: {}]   ;;  %s6817_s3 = inlined_call_operand.vmem [shape: f32[8,1], index: 3, kind: input, shape index: {}]   ;;  %s6818_s4 = inlined_call_operand.vmem [shape: f32[1,480], index: 4, kind: input, shape index: {}]   ;;  %s6819_s5 = inlined_call_operand.hbm [shape: f32[2,32,384], index: 5, kind: output, shape index: {}]  }
   0x1   :  { %12 = vsyncpa [#allocation5 + $0x1], 0 }
   0x2   :  { %13 = vsyncpa [#allocation6], 0 }
   0x3   :  { %15 = vsyncpa [#allocation6 + $0x1], 0  ;;  %s4328_s18 = smov 0   ;;  %s4330_s19 = smov 0  }
   0x4   :  { %s4332_s20 = smov 0   ;;  %s4334_s21 = smov 0  }
   0x5 LB: > { %s4349_s22 = sadd.s32 4294967295, %s4248_s21   ;;  %s3576_s23 = sadd.s32 4294967294, %s4248_s21   ;;  %s4248_s21 = sphi %s4334_s21, %s7304_s21   ;;  %s4244_s20 = sphi %s4332_s20, %s7303_s20   ;;  %s4240_s19 = sphi %s4330_s19, %s7302_s19   ;;  %s4236_s18 = sphi %s4328_s18, %s7301_s18  }
   0x6   : > { %s4353_s24 = sadd.s32 1, %s4248_s21   ;;  %s28_s25 = sadd.s32 1, %s4244_s20 }
   0x7   : > { %s25_s26 = ssub.s32 %s4248_s21, %s4353_s24  ;;  %p35_p0 = scmp.ne.s32.totalorder %s4244_s20, %s4240_s19 }
   0x8   : > { %p26_p1 = scmp.eq.s32.totalorder %s25_s26, 0  ;;  %p36_p2 = scmp.eq.s32.totalorder %s4248_s21, 0 }
   0x9   : > { %p41_p3 = scmp.ne.s32.totalorder %s4240_s19, %s4236_s18  ;;  %p42_p4 = scmp.eq.s32.totalorder %s4349_s22, 0 }
   0xa   : > { %s4365_s27 = scalar_select %p26_p1, %s4244_s20, %s28_s25  }
   0xb   : > { %p4367_p5 = por %p36_p2, %p35_p0  ;;  %p4371_p6 = por %p42_p4, %p41_p3 }
   0xc   : > { %p149_p7 = scmp.eq.s32.totalorder %s4349_s22, 1  ;;  %p155_p8 = scmp.eq.s32.totalorder %s3576_s23, 1 }
   0xd   : > { %p3703_p10 = scmp.lt.s32.totalorder %s4248_s21, 2  ;;  %s187_s7 = sand.u32 1, %s4244_s20  }
   0xe   : > { %p4378_p11 = por %p149_p7, %p35_p0  ;;  %p4382_p12 = por %p155_p8, %p41_p3 }
   0xf   : > { %s3629_s8 = sshll.u32 %s4248_s21, 9  ;;  %s3579_s9 = sshll.u32 %s187_s7, 5 }
  0x10   : > { %s6975_s30 = scalar_select %p4378_p11, 1, 0 }
  0x11   : > { %s6976_s6 = scalar_select %p4382_p12, 1, 0 }
  0x12   : > { %s4391_s12 = scalar_lea.hbm %s6814_s0, %s3629_s8  ;;  %s191_s13 = scalar_lea.vmem [#allocation4], %s3579_s9 }
  0x13   : > { %s198_s14 = sshll.u32 %s191_s13, 4  ;;  %p4395_p13 = pnand %p3703_p10, %p4367_p5  ;;  %s4399_s14 = int_to_ptr.vmem [resolvable:$true] %s198_s14 }
  0x14   : > { %s4401_s16 = scalar_lea.sflag [#allocation5], %s187_s7  ;;  %s4152_s17 = scalar_lea.hbm %s4391_s12, 512 }
  0x15   : > { %p4153_p0 = scmp.ne.s32.totalorder %s4391_s12, %s4152_s17  ;;  %p4154_p1 = pneg %p4395_p13 }
  0x16   : > { %s4157_s26 = scalar_lea.hbm %s6814_s0, 1024  ;;  %p4158_p4 = scmp.lt.u32.totalorder %s4391_s12, %s6814_s0 }
  0x17   : > { %p4155_p2 = pnand %p4154_p1, %p4153_p0  ;;  %p4159_p5 = scmp.lt.u32.totalorder %s4157_s26, %s4152_s17 }
  0x18   : > { %p4161_p8 = scmp.lt.u32.totalorder %s4152_s17, %s4391_s12 }
  0x19   : > { %p4156_p3 = pneg %p4155_p2  ;;  %p4160_p7 = por %p4159_p5, %p4158_p4 }
  0x1b   : > { %p4162_p10 = por %p4161_p8, %p4160_p7 }
  0x1d   : > { %p4163_p9 = pnand %p4162_p10, %p4156_p3 }
  0x1f   : > { %4166 = shalt.err (!%p4163_p9)
}
  0x20   : > { %s4167_s7 = scalar_lea.vmem %s4399_s14, 512  ;;  %s4250_s9 = smov [#allocation4]  }
  0x21   : > { %p4168_p0 = scmp.ne.s32.totalorder %s4399_s14, %s4167_s7  ;;  %s4172_s10 = sshll.u32 %s4250_s9, 4  ;;  %s4173_s10 = int_to_ptr.vmem [resolvable:$false] %s4172_s10 }
  0x22   : > { %s4174_s11 = scalar_lea.vmem %s4173_s10, 1024  ;;  %p4175_p11 = scmp.lt.s32.totalorder %s4399_s14, %s4173_s10 }
  0x23   : > { %p4170_p2 = pnand %p4168_p0, %p4154_p1  ;;  %p4176_p4 = scmp.lt.s32.totalorder %s4174_s11, %s4167_s7 }
  0x25   : > { %p4171_p12 = pneg %p4170_p2  ;;  %p4177_p5 = por %p4176_p4, %p4175_p11 }
  0x27   : > { %p4178_p7 = pnand %p4177_p5, %p4171_p12 }
  0x29   : > { %4181 = shalt.err (!%p4178_p7)
}
  0x2a   : > { %s4251_s13 = smov 128   ;;  %s4252_s17 = smov 8  }
  0x2b   : > { %3698 = dma.hbm_to_vmem [thread:$0]  (!%p4395_p13), %s4391_s12, 512, %s4399_s14, %s4401_s16, %s4251_s13, %s4251_s13, %s4252_s17  }
  0x2c   : > { %p3582_p9 = scmp.ge.s32.totalorder %s4248_s21, 1  ;;  %p206_p1 = scmp.lt.s32.totalorder %s4248_s21, 3 }
  0x2e   : > { %p207_p3 = pnand %p3582_p9, %p206_p1 }
  0x30   : > { %210 = sbr.rel (%p207_p3) target bundleno = 1933 (0x78d), region = 40 }
  0x37   : > { %s4432_s23 = sand.u32 1, %s4240_s19  }
  0x38   : > { %s3583_s25 = sshll.u32 %s4432_s23, 5  ;;  %s213_s26 = scalar_lea.sflag [#allocation5], %s4432_s23 }
  0x39   : > { %s4436_s28 = scalar_lea.vmem [#allocation4], %s3583_s25 }
  0x3a   : > { %4227 = dma.done.wait (%p4371_p6), %s213_s26, 512  }
  0x3b   : > { %4229 = vsyncadd (%p4371_p6), %s213_s26, 4294966784  ;;  %vm6821_vm0 = vcmask 523264   ;;  %v6822_v0 = vmov 0   ;;  %v4104_v1 = vld [vmem:[%s4436_s28] ss:$8 sps:$4 sm:$0xff]   ;;  %s4254_s29 = smov 116  }
  0x3c   : > { %264 = vst.msk [vmem:[#allocation2 + $0x98] sm:$0xff] %vm6821_vm0, %v6822_v0  ;;  %244 = vst [vmem:[#allocation2] sm:$0xff] %v6822_v0  ;;  %3783 = vset.pattern.permute.xlu0 %v6822_v0  ;;  %977 = vmatprep.mubr.bf16.mxu0 %v6822_v0  ;;  %v4105_v2 = vld [vmem:[%s4436_s28] ss:$8 sps:$4 sm:$0xff]   ;;  %s4255_s12 = smov 108   ;;  %s4256_s14 = smov 28  }
  0x3d   : > { %249 = vst.msk [vmem:[#allocation2 + $0x20] sm:$0xff] %vm6821_vm0, %v6822_v0  ;;  %250 = vst [vmem:[#allocation2 + $0x28] sm:$0xff] %v6822_v0  ;;  %1018 = vmatprep.mubr.bf16.mxu1 %v6822_v0  ;;  %338 = vrot.lane.b32.xlu1 %v4104_v1, %s4254_s29  ;;  %v4106_v3 = vld [vmem:[%s4436_s28] ss:$8 sps:$4 sm:$0xff]   ;;  %v4108_v5 = vld [vmem:[%s4436_s28 + $0x4] ss:$8 sps:$4 sm:$0xff]  }
  0x3e   : > { %254 = vst.msk [vmem:[#allocation2 + $0x48] sm:$0xff] %vm6821_vm0, %v6822_v0  ;;  %255 = vst [vmem:[#allocation2 + $0x50] sm:$0xff] %v6822_v0  ;;  %312 = vrot.lane.b32.xlu0 %v4105_v2, %s4255_s12  ;;  %v4107_v4 = vld [vmem:[%s4436_s28] ss:$8 sps:$4 sm:$0xff]   ;;  %s4257_s15 = smov 20   ;;  %s4258_s16 = smov 36  }
  0x3f   : > { %256 = vst [vmem:[#allocation2 + $0x58] sm:$0xff] %v6822_v0  ;;  %257 = vst [vmem:[#allocation2 + $0x60] sm:$0xff] %v6822_v0  ;;  %v4109_v6 = vld [vmem:[%s4436_s28] ss:$8 sps:$4 sm:$0xff]   ;;  %v4110_v7 = vld [vmem:[%s4436_s28 + $0x4] ss:$8 sps:$4 sm:$0xff]  }
  0x40   : > { %258 = vst [vmem:[#allocation2 + $0x68] sm:$0xff] %v6822_v0  ;;  %259 = vst.msk [vmem:[#allocation2 + $0x70] sm:$0xff] %vm6821_vm0, %v6822_v0  ;;  %s4259_s8 = smov 124   ;;  %v4111_v8 = vld [vmem:[%s4436_s28] ss:$8 sps:$4 sm:$0xff]   ;;  %s4260_s7 = smov 44  }
  0x41   : > { %260 = vst [vmem:[#allocation2 + $0x78] sm:$0xff] %v6822_v0  ;;  %261 = vst [vmem:[#allocation2 + $0x80] sm:$0xff] %v6822_v0  ;;  %456 = vrot.lane.b32.xlu1 %v4106_v3, %s4256_s14  ;;  %v4113_v9 = vld [vmem:[%s4436_s28] ss:$8 sps:$4 sm:$0xff]   ;;  %s4261_s9 = smov 4   ;;  %s4262_s10 = smov 100  }
  0x42   : > { %262 = vst [vmem:[#allocation2 + $0x88] sm:$0xff] %v6822_v0  ;;  %263 = vst [vmem:[#allocation2 + $0x90] sm:$0xff] %v6822_v0  ;;  %430 = vrot.lane.b32.xlu0 %v4107_v4, %s4257_s15  ;;  %v4112_v10 = vld [vmem:[%s4436_s28 + $0x4] ss:$8 sps:$4 sm:$0xff]   ;;  %v4115_v11 = vld [vmem:[%s4436_s28] ss:$8 sps:$4 sm:$0xff]  }
  0x43   : > { %269 = vst.msk [vmem:[#allocation2 + $0xc0] sm:$0xff] %vm6821_vm0, %v6822_v0  ;;  %274 = vst.msk [vmem:[#allocation2 + $0xe8] sm:$0xff] %vm6821_vm0, %v6822_v0  ;;  %s4263_s11 = smov 68   ;;  %v4114_v12 = vld [vmem:[%s4436_s28 + $0x10] ss:$8 sps:$4 sm:$0xff]   ;;  %s4264_s13 = smov 12  }
  0x44   : > { %v4117_v13 = vld [vmem:[%s4436_s28 + $0x4] ss:$8 sps:$4 sm:$0xff]   ;;  %v4116_v14 = vld [vmem:[%s4436_s28 + $0x10] ss:$8 sps:$4 sm:$0xff]   ;;  %s4265_s17 = smov 52   ;;  %s4266_s25 = smov 76  }
  0x45   : > { %479 = vrot.lane.b32.xlu1 %v4108_v5, %s4258_s16  ;;  %v4119_v15 = vld [vmem:[%s4436_s28 + $0x10] ss:$8 sps:$4 sm:$0xff]   ;;  %v4118_v16 = vld [vmem:[%s4436_s28 + $0x4] ss:$8 sps:$4 sm:$0xff]   ;;  %s4267_s26 = smov 60   ;;  %vm320_vm1 = vcmask 97280  }
  0x46   : > { %361 = vrot.lane.b32.xlu0 %v4109_v6, %s4259_s8  ;;  %v4121_v17 = vld [vmem:[%s4436_s28 + $0x4] ss:$8 sps:$4 sm:$0xff]   ;;  %v4120_v18 = vld [vmem:[%s4436_s28 + $0x10] ss:$8 sps:$4 sm:$0xff]   ;;  %v4124_v22 = vld [vmem:[%s4436_s28 + $0x14] ss:$8 sps:$4 sm:$0xff]  }
  0x47   : > { %v4123_v19 = vld [vmem:[%s4436_s28 + $0x10] ss:$8 sps:$4 sm:$0xff]   ;;  %v4122_v20 = vld [vmem:[%s4436_s28 + $0x4] ss:$8 sps:$4 sm:$0xff]   ;;  %v4127_v23 = vld [vmem:[%s4436_s28 + $0x14] ss:$8 sps:$4 sm:$0xff]  }
  0x48   : > { %v4125_v21 = vld [vmem:[%s4436_s28 + $0x4] ss:$8 sps:$4 sm:$0xff]   ;;  %v4126_v24 = vld [vmem:[%s4436_s28 + $0x10] ss:$8 sps:$4 sm:$0xff]   ;;  %v4128_v26 = vld [vmem:[%s4436_s28 + $0x14] ss:$8 sps:$4 sm:$0xff]  }
  0x49   : > { %502 = vrot.lane.b32.xlu1 %v4110_v7, %s4260_s7  ;;  %v4129_v25 = vld [vmem:[%s4436_s28 + $0x10] ss:$8 sps:$4 sm:$0xff]   ;;  %v4131_v27 = vld [vmem:[%s4436_s28 + $0x14] ss:$8 sps:$4 sm:$0xff]   ;;  %v4523_v33 = vld [vmem:[#allocation2 + $0x98] sm:$0xff]  ;;  %vm344_vm2 = vcmask 294048  }
  0x4a   : > { %384 = vrot.lane.b32.xlu0 %v4111_v8, %s4261_s9  ;;  %v4130_v28 = vld [vmem:[%s4436_s28 + $0x10] ss:$8 sps:$4 sm:$0xff]   ;;  %v4133_v29 = vld [vmem:[%s4436_s28 + $0x14] ss:$8 sps:$4 sm:$0xff]   ;;  %v4525_v34 = vld [vmem:[#allocation2 + $0x70] sm:$0xff]  ;;  %vm438_vm3 = vcmask 31744  }
  0x4b   : > { %v4132_v30 = vld [vmem:[%s4436_s28 + $0x14] ss:$8 sps:$4 sm:$0xff]   ;;  %vm462_vm4 = vcmask 228448   ;;  %vm485_vm5 = vcmask 425248   ;;  %vm367_vm6 = vcmask 490848   ;;  %vm508_vm7 = vcmask 622048  }
  0x4c   : > { %v4135_v31 = vld [vmem:[%s4436_s28 + $0x14] ss:$8 sps:$4 sm:$0xff]   ;;  %vm390_vm8 = vcmask 687648   ;;  %vm295_vm9 = vcmask 950048   ;;  %vm577_vm10 = vcmask 162848   ;;  %vm318_vm11 = vcmask 1048544  }
  0x4d   : > { %289 = vrot.lane.b32.xlu1 %v4113_v9, %s4262_s10  ;;  %v4134_v32 = vld [vmem:[%s4436_s28 + $0x14] ss:$8 sps:$4 sm:$0xff]   ;;  %s4272_s28 = smov 80   ;;  %vm413_vm12 = vcmask 884448   ;;  %vm436_vm13 = vcmask 1048480   ;;  %vm531_vm14 = vcmask 818848  }
  0x4e   : > { %571 = vrot.lane.b32.xlu0 %v4112_v10, %s4263_s11  ;;  %vm600_vm15 = vcmask 359648   ;;  %vm554_vm0 = vcmask 1015648   ;;  %p7298_p11 = scmp.ne.s32.totalorder %s6975_s30, 0 }
  0x51   : > { %407 = vrot.lane.b32.xlu1 %v4115_v11, %s4264_s13 }
  0x52   : > { %314 = vrot.lane.b32.xlu0 %v4114_v12, %s4255_s12  ;;  %s4269_s12 = smov 92  }
  0x55   : > { %525 = vrot.lane.b32.xlu1 %v4117_v13, %s4265_s17 }
  0x56   : > { %432 = vrot.lane.b32.xlu0 %v4116_v14, %s4257_s15  ;;  %s4271_s15 = smov 104  }
  0x59   : > { %340 = vrot.lane.b32.xlu1 %v4119_v15, %s4254_s29  ;;  %s4268_s29 = smov 84  }
  0x5a   : > { %594 = vrot.lane.b32.xlu0 %v4118_v16, %s4266_s25 }
  0x5d   : > { %548 = vrot.lane.b32.xlu1 %v4121_v17, %s4267_s26 }
  0x5e   : > { %458 = vrot.lane.b32.xlu0 %v4120_v18, %s4256_s14  ;;  %s4270_s14 = smov 24  }
  0x61   : > { %363 = vrot.lane.b32.xlu1 %v4123_v19, %s4259_s8 }
  0x62   : > { %617 = vrot.lane.b32.xlu0 %v4122_v20, %s4268_s29 }
  0x65   : > { %640 = vrot.lane.b32.xlu1 %v4125_v21, %s4269_s12 }
  0x66   : > { %481 = vrot.lane.b32.xlu0 %v4124_v22, %s4258_s16  ;;  %s4273_s16 = smov 81  }
  0x69   : > { %504 = vrot.lane.b32.xlu1 %v4127_v23, %s4260_s7  ;;  %s4274_s7 = smov 79  }
  0x6a   : > { %386 = vrot.lane.b32.xlu0 %v4126_v24, %s4261_s9  ;;  %s4289_s9 = smov 96  }
  0x6d   : > { %291 = vrot.lane.b32.xlu1 %v4129_v25, %s4262_s10  ;;  %s4290_s10 = smov 71  }
  0x6e   : > { %573 = vrot.lane.b32.xlu0 %v4128_v26, %s4263_s11  ;;  %s4275_s11 = smov 127  }
  0x71   : > { %527 = vrot.lane.b32.xlu1 %v4131_v27, %s4265_s17  ;;  %s4277_s17 = smov 105  }
  0x72   : > { %409 = vrot.lane.b32.xlu0 %v4130_v28, %s4264_s13  ;;  %s4276_s13 = smov 55  }
  0x75   : > { %550 = vrot.lane.b32.xlu1 %v4133_v29, %s4267_s26  ;;  %s4280_s26 = smov 57  }
  0x76   : > { %596 = vrot.lane.b32.xlu0 %v4132_v30, %s4266_s25  ;;  %s4279_s25 = smov 103  }
  0x79   : > { %642 = vrot.lane.b32.xlu1 %v4135_v31, %s4269_s12  ;;  %s4288_s12 = smov 112  }
  0x7a   : > { %619 = vrot.lane.b32.xlu0 %v4134_v32, %s4268_s29  ;;  %s3690_s29 = smul.u32 1536, %s4349_s22  ;;  %s3490_s22 = scalar_lea.sflag [#allocation6], %s4432_s23 }
  0x7d   : > { %687 = vrot.lane.b32.xlu1 %v4523_v33, %s4270_s14 }
  0x7e   : > { %677 = vrot.lane.b32.xlu0 %v4525_v34, %s4270_s14 }
  0x81   : > { %737 = vrot.lane.b32.xlu1 %v4523_v33, %s4271_s15 }
  0x82   : > { %727 = vrot.lane.b32.xlu0 %v4525_v34, %s4271_s15 }
  0x85   : > { %870 = vrot.lane.b32.xlu1 %v4523_v33, %s4272_s28 }
  0x86   : > { %860 = vrot.lane.b32.xlu0 %v4525_v34, %s4272_s28 }
  0x8a   : > { %1055 = vrot.lane.b32.xlu0 %v4525_v34, %s4273_s16 }
  0xaf   : > { %v339_v35 = vpop.permute.xlu1 %338 }
  0xb0   : > { %v313_v36 = vpop.permute.xlu0 %312 }
  0xb1   : > { %321 = vst.msk [vmem:[#allocation2 + $0x58] sm:$0xff] %vm320_vm1, %v313_v36 }
  0xb2   : > { %345 = vst.msk [vmem:[#allocation2 + $0x58] sm:$0xff] %vm344_vm2, %v339_v35 }
  0xb3   : > { %v457_v37 = vpop.permute.xlu1 %456 }
  0xb4   : > { %v431_v38 = vpop.permute.xlu0 %430 }
  0xb5   : > { %439 = vst.msk [vmem:[#allocation2 + $0x60] sm:$0xff] %vm438_vm3, %v431_v38 }
  0xb6   : > { %463 = vst.msk [vmem:[#allocation2 + $0x60] sm:$0xff] %vm462_vm4, %v457_v37 }
  0xb7   : > { %v480_v39 = vpop.permute.xlu1 %479 }
  0xb8   : > { %486 = vst.msk [vmem:[#allocation2 + $0x60] sm:$0xff] %vm485_vm5, %v480_v39  ;;  %v362_v40 = vpop.permute.xlu0 %361 }
  0xb9   : > { %368 = vst.msk [vmem:[#allocation2 + $0x58] sm:$0xff] %vm367_vm6, %v362_v40 }
  0xbb   : > { %v503_v41 = vpop.permute.xlu1 %502 }
  0xbc   : > { %509 = vst.msk [vmem:[#allocation2 + $0x60] sm:$0xff] %vm508_vm7, %v503_v41  ;;  %v385_v42 = vpop.permute.xlu0 %384 }
  0xbd   : > { %391 = vst.msk [vmem:[#allocation2 + $0x58] sm:$0xff] %vm390_vm8, %v385_v42 }
  0xbf   : > { %v290_v43 = vpop.permute.xlu1 %289 }
  0xc0   : > { %v572_v44 = vpop.permute.xlu0 %571  ;;  %296 = vst.msk [vmem:[#allocation2 + $0x50] sm:$0xff] %vm295_vm9, %v290_v43 }
  0xc1   : > { %578 = vst.msk [vmem:[#allocation2 + $0x68] sm:$0xff] %vm577_vm10, %v572_v44 }
  0xc2   : > { %319 = vst.msk [vmem:[#allocation2 + $0x50] sm:$0xff] %vm318_vm11, %v313_v36 }
  0xc3   : > { %v408_v45 = vpop.permute.xlu1 %407 }
  0xc4   : > { %v315_v46 = vpop.permute.xlu0 %314  ;;  %414 = vst.msk [vmem:[#allocation2 + $0x58] sm:$0xff] %vm413_vm12, %v408_v45 }
  0xc5   : > { %323 = vst.msk [vmem:[#allocation2 + $0x80] sm:$0xff] %vm320_vm1, %v315_v46  ;;  %vm623_vm1 = vcmask 556448  }
  0xc6   : > { %437 = vst.msk [vmem:[#allocation2 + $0x58] sm:$0xff] %vm436_vm13, %v431_v38 }
  0xc7   : > { %v526_v47 = vpop.permute.xlu1 %525 }
  0xc8   : > { %v433_v48 = vpop.permute.xlu0 %432  ;;  %532 = vst.msk [vmem:[#allocation2 + $0x60] sm:$0xff] %vm531_vm14, %v526_v47 }
  0xc9   : > { %441 = vst.msk [vmem:[#allocation2 + $0x88] sm:$0xff] %vm438_vm3, %v433_v48  ;;  %vm646_vm3 = vcmask 753248   ;;  %v4597_v11 = vld [vmem:[#allocation2 + $0x50] sm:$0xff] }
  0xcb   : > { %v341_v49 = vpop.permute.xlu1 %340 }
  0xcc   : > { %v595_v50 = vpop.permute.xlu0 %594  ;;  %346 = vst.msk [vmem:[#allocation2 + $0x80] sm:$0xff] %vm344_vm2, %v341_v49  ;;  %vm762_vm2 = vcmask 326656  }
  0xcd   : > { %601 = vst.msk [vmem:[#allocation2 + $0x68] sm:$0xff] %vm600_vm15, %v595_v50  ;;  %v4626_v14 = vld [vmem:[#allocation2 + $0x58] sm:$0xff] }
  0xcf   : > { %v549_v51 = vpop.permute.xlu1 %548 }
  0xd0   : > { %v459_v52 = vpop.permute.xlu0 %458  ;;  %555 = vst.msk [vmem:[#allocation2 + $0x60] sm:$0xff] %vm554_vm0, %v549_v51 }
  0xd1   : > { %464 = vst.msk [vmem:[#allocation2 + $0x88] sm:$0xff] %vm462_vm4, %v459_v52  ;;  %vm689_vm4 = vcmask 195584  }
  0xd3   : > { %v364_v53 = vpop.permute.xlu1 %363 }
  0xd4   : > { %v618_v54 = vpop.permute.xlu0 %617  ;;  %369 = vst.msk [vmem:[#allocation2 + $0x80] sm:$0xff] %vm367_vm6, %v364_v53  ;;  %vm739_vm6 = vcmask 850944  }
  0xd5   : > { %624 = vst.msk [vmem:[#allocation2 + $0x68] sm:$0xff] %vm623_vm1, %v618_v54 }
  0xd7   : > { %v641_v55 = vpop.permute.xlu1 %640  ;;  %v4628_v15 = vld [vmem:[#allocation2 + $0x60] sm:$0xff] }
  0xd8   : > { %v482_v56 = vpop.permute.xlu0 %481  ;;  %647 = vst.msk [vmem:[#allocation2 + $0x68] sm:$0xff] %vm646_vm3, %v641_v55 }
  0xd9   : > { %487 = vst.msk [vmem:[#allocation2 + $0x88] sm:$0xff] %vm485_vm5, %v482_v56  ;;  %vm6978_vm5 = vcmask 523264  }
  0xdb   : > { %v505_v57 = vpop.permute.xlu1 %504 }
  0xdc   : > { %v387_v58 = vpop.permute.xlu0 %386  ;;  %510 = vst.msk [vmem:[#allocation2 + $0x88] sm:$0xff] %vm508_vm7, %v505_v57  ;;  %vm6979_vm7 = vmmov %vm6978_vm5 }
  0xdd   : > { %392 = vst.msk [vmem:[#allocation2 + $0x80] sm:$0xff] %vm390_vm8, %v387_v58  ;;  %vm892_vm8 = vcmask 654336  }
  0xdf   : > { %v292_v59 = vpop.permute.xlu1 %291  ;;  %v4611_v12 = vld [vmem:[#allocation2 + $0x68] sm:$0xff] }
  0xe0   : > { %v574_v60 = vpop.permute.xlu0 %573  ;;  %297 = vst.msk [vmem:[#allocation2 + $0x78] sm:$0xff] %vm295_vm9, %v292_v59  ;;  %vm1087_vm9 = vcmask 662528  }
  0xe1   : > { %579 = vst.msk [vmem:[#allocation2 + $0x90] sm:$0xff] %vm577_vm10, %v574_v60  ;;  %vm941_vm10 = vcmask 785408  }
  0xe2   : > { %322 = vst.msk [vmem:[#allocation2 + $0x78] sm:$0xff] %vm318_vm11, %v315_v46  ;;  %vm1283_vm11 = vcmask 646144  }
  0xe3   : > { %v528_v61 = vpop.permute.xlu1 %527 }
  0xe4   : > { %v410_v62 = vpop.permute.xlu0 %409  ;;  %533 = vst.msk [vmem:[#allocation2 + $0x88] sm:$0xff] %vm531_vm14, %v528_v61  ;;  %vm1595_vm14 = vcmask 457728  }
  0xe5   : > { %415 = vst.msk [vmem:[#allocation2 + $0x80] sm:$0xff] %vm413_vm12, %v410_v62  ;;  %vm1469_vm12 = vcmask 859136  }
  0xe6   : > { %440 = vst.msk [vmem:[#allocation2 + $0x80] sm:$0xff] %vm436_vm13, %v433_v48  ;;  %vm1505_vm13 = vcmask 842752  }
  0xe7   : > { %v551_v63 = vpop.permute.xlu1 %550 }
  0xe8   : > { %v597_v1 = vpop.permute.xlu0 %596  ;;  %556 = vst.msk [vmem:[#allocation2 + $0x88] sm:$0xff] %vm554_vm0, %v551_v63  ;;  %vm708_vm0 = vcmask 1047744  }
  0xe9   : > { %602 = vst.msk [vmem:[#allocation2 + $0x90] sm:$0xff] %vm600_vm15, %v597_v1  ;;  %v4595_v10 = vld [vmem:[#allocation2 + $0x78] sm:$0xff]  ;;  %vm1577_vm15 = vcmask 465920  }
  0xeb   : > { %v643_v2 = vpop.permute.xlu1 %642 }
  0xec   : > { %v620_v3 = vpop.permute.xlu0 %619 }
  0xed   : > { %625 = vst.msk [vmem:[#allocation2 + $0x90] sm:$0xff] %vm623_vm1, %v620_v3  ;;  %v4636_v17 = vld [vmem:[#allocation2 + $0x80] sm:$0xff]  ;;  %vm1613_vm1 = vcmask 449536  }
  0xee   : > { %648 = vst.msk [vmem:[#allocation2 + $0x90] sm:$0xff] %vm646_vm3, %v643_v2  ;;  %vm1969_vm3 = vcmask 1039360  }
  0xef   : > { %v4577_v4 = vpop.permute.xlu1 %687  ;;  %v4634_v16 = vld [vmem:[#allocation2 + $0x88] sm:$0xff] }
  0xf0   : > { %v4579_v5 = vpop.permute.xlu0 %677 }
  0xf3   : > { %v4581_v6 = vpop.permute.xlu1 %737 }
  0xf4   : > { %768 = vst.msk [vmem:[#allocation2 + $0xe8] sm:$0xff] %vm762_vm2, %v4581_v6  ;;  %v4584_v7 = vpop.permute.xlu0 %727 }
  0xf5   : > { %763 = vst.msk [vmem:[#allocation2 + $0xc0] sm:$0xff] %vm762_vm2, %v4584_v7  ;;  %v1861_v13 = vld [vmem:[#allocation2 + $0x90] sm:$0xff]  ;;  %vm2046_vm2 = vcmask 1031168  }
  0xf7   : > { %v4696_v19 = vpop.permute.xlu1 %870 }
  0xf8   : > { %v4694_v18 = vpop.permute.xlu0 %860 }
  0xfb   : > { %v4587_v8 = vld [vmem:[#allocation2 + $0xe8] sm:$0xff] }
  0xfc   : > { %890 = vrot.lane.b32.xlu1 %v4587_v8, %s4272_s28  ;;  %v4591_v9 = vld [vmem:[#allocation2 + $0xc0] sm:$0xff]  ;;  %v4698_v20 = vpop.permute.xlu0 %1055 }
  0xfd   : > { %880 = vrot.lane.b32.xlu0 %v4591_v9, %s4272_s28 }
 0x100   : > { %679 = vrot.lane.b32.xlu1 %v4595_v10, %s4270_s14 }
 0x101   : > { %669 = vrot.lane.b32.xlu0 %v4597_v11, %s4270_s14 }
 0x104   : > { %719 = vrot.lane.b32.xlu1 %v4597_v11, %s4271_s15 }
 0x105   : > { %729 = vrot.lane.b32.xlu0 %v4595_v10, %s4271_s15 }
 0x108   : > { %862 = vrot.lane.b32.xlu1 %v4595_v10, %s4272_s28 }
 0x109   : > { %852 = vrot.lane.b32.xlu0 %v4597_v11, %s4272_s28 }
 0x10c   : > { %675 = vrot.lane.b32.xlu1 %v4611_v12, %s4270_s14 }
 0x10d   : > { %1047 = vrot.lane.b32.xlu0 %v4597_v11, %s4273_s16 }
 0x110   : > { %735 = vrot.lane.b32.xlu1 %v1861_v13, %s4271_s15 }
 0x111   : > { %685 = vrot.lane.b32.xlu0 %v1861_v13, %s4270_s14 }
 0x114   : > { %858 = vrot.lane.b32.xlu1 %v4611_v12, %s4272_s28 }
 0x115   : > { %725 = vrot.lane.b32.xlu0 %v4611_v12, %s4271_s15 }
 0x118   : > { %1053 = vrot.lane.b32.xlu1 %v4611_v12, %s4273_s16 }
 0x119   : > { %868 = vrot.lane.b32.xlu0 %v1861_v13, %s4272_s28 }
 0x11c   : > { %671 = vrot.lane.b32.xlu1 %v4626_v14, %s4270_s14 }
 0x11d   : > { %673 = vrot.lane.b32.xlu0 %v4628_v15, %s4270_s14 }
 0x120   : > { %683 = vrot.lane.b32.xlu1 %v4634_v16, %s4270_s14 }
 0x121   : > { %681 = vrot.lane.b32.xlu0 %v4636_v17, %s4270_s14 }
 0x124   : > { %723 = vrot.lane.b32.xlu1 %v4628_v15, %s4271_s15 }
 0x125   : > { %721 = vrot.lane.b32.xlu0 %v4626_v14, %s4271_s15 }
 0x128   : > { %731 = vrot.lane.b32.xlu1 %v4636_v17, %s4271_s15 }
 0x129   : > { %733 = vrot.lane.b32.xlu0 %v4634_v16, %s4271_s15 }
 0x12c   : > { %856 = vrot.lane.b32.xlu1 %v4628_v15, %s4272_s28 }
 0x12d   : > { %854 = vrot.lane.b32.xlu0 %v4626_v14, %s4272_s28 }
 0x130   : > { %864 = vrot.lane.b32.xlu1 %v4636_v17, %s4272_s28 }
 0x131   : > { %866 = vrot.lane.b32.xlu0 %v4634_v16, %s4272_s28 }
 0x134   : > { %1051 = vrot.lane.b32.xlu1 %v4628_v15, %s4273_s16 }
 0x135   : > { %1049 = vrot.lane.b32.xlu0 %v4626_v14, %s4273_s16 }
 0x138   : > { %1059 = vrot.lane.b32.xlu1 %v4636_v17, %s4273_s16 }
 0x139   : > { %1061 = vrot.lane.b32.xlu0 %v4634_v16, %s4273_s16 }
 0x13c   : > { %1057 = vrot.lane.b32.xlu1 %v4595_v10, %s4273_s16 }
 0x13d   : > { %1063 = vrot.lane.b32.xlu0 %v1861_v13, %s4273_s16 }
 0x140   : > { %1065 = vrot.lane.b32.xlu1 %v4523_v33, %s4273_s16 }
 0x141   : > { %1075 = vrot.lane.b32.xlu0 %v4591_v9, %s4273_s16 }
 0x144   : > { %1085 = vrot.lane.b32.xlu1 %v4587_v8, %s4273_s16 }
 0x145   : > { %1245 = vrot.lane.b32.xlu0 %v4626_v14, %s4274_s7 }
 0x148   : > { %1247 = vrot.lane.b32.xlu1 %v4628_v15, %s4274_s7 }
 0x149   : > { %1243 = vrot.lane.b32.xlu0 %v4597_v11, %s4274_s7 }
 0x14c   : > { %1249 = vrot.lane.b32.xlu1 %v4611_v12, %s4274_s7 }
 0x14d   : > { %1251 = vrot.lane.b32.xlu0 %v4525_v34, %s4274_s7 }
 0x150   : > { %1255 = vrot.lane.b32.xlu1 %v4636_v17, %s4274_s7 }
 0x151   : > { %1257 = vrot.lane.b32.xlu0 %v4634_v16, %s4274_s7 }
 0x154   : > { %1253 = vrot.lane.b32.xlu1 %v4595_v10, %s4274_s7 }
 0x155   : > { %1259 = vrot.lane.b32.xlu0 %v1861_v13, %s4274_s7 }
 0x158   : > { %1261 = vrot.lane.b32.xlu1 %v4523_v33, %s4274_s7 }
 0x16e   : > { %v4700_v21 = vpop.permute.xlu1 %890 }
 0x16f   : > { %v4702_v22 = vpop.permute.xlu0 %880 }
 0x172   : > { %v680_v23 = vpop.permute.xlu1 %679 }
 0x173   : > { %714 = vst.msk [vmem:[#allocation2 + $0x28] sm:$0xff] %vm708_vm0, %v680_v23  ;;  %v670_v24 = vpop.permute.xlu0 %669 }
 0x174   : > { %709 = vst.msk [vmem:[#allocation2] sm:$0xff] %vm708_vm0, %v670_v24  ;;  %vm4284_vm0 = vmmov 0  }
 0x176   : > { %v720_v25 = vpop.permute.xlu1 %719 }
 0x177   : > { %v730_v26 = vpop.permute.xlu0 %729 }
 0x17a   : > { %v4704_v27 = vpop.permute.xlu1 %862  ;;  %v775_v28 = vld [vmem:[#allocation2 + $0x28] sm:$0xff] }
 0x17b   : > { %v4706_v29 = vpop.permute.xlu0 %852  ;;  %842 = vrot.lane.b32.xlu1 %v775_v28, %s4272_s28  ;;  %v770_v30 = vld [vmem:[#allocation2] sm:$0xff] }
 0x17c   : > { %832 = vrot.lane.b32.xlu0 %v770_v30, %s4272_s28 }
 0x17e   : > { %v676_v31 = vpop.permute.xlu1 %675 }
 0x17f   : > { %v693_v32 = vsel %vm689_vm4, %v676_v31, %v4579_v5  ;;  %v4712_v33 = vpop.permute.xlu0 %1047  ;;  %1037 = vrot.lane.b32.xlu1 %v775_v28, %s4273_s16 }
 0x180   : > { %713 = vst.msk [vmem:[#allocation2 + $0x20] sm:$0xff] %vm6978_vm5, %v693_v32  ;;  %1027 = vrot.lane.b32.xlu0 %v770_v30, %s4273_s16  ;;  %vm2502_vm5 = vcmask 1014784  }
 0x182   : > { %v736_v34 = vpop.permute.xlu1 %735 }
 0x183   : > { %v4719_v35 = vsel %vm739_vm6, %v736_v34, %v4581_v6  ;;  %v686_v36 = vpop.permute.xlu0 %685  ;;  %1233 = vrot.lane.b32.xlu1 %v775_v28, %s4274_s7 }
 0x184   : > { %v697_v37 = vsel %vm689_vm4, %v686_v36, %v4577_v4  ;;  %1223 = vrot.lane.b32.xlu0 %v770_v30, %s4274_s7 }
 0x185   : > { %718 = vst.msk [vmem:[#allocation2 + $0x48] sm:$0xff] %vm6979_vm7, %v697_v37  ;;  %vm1796_vm7 = vcmask 1043456  }
 0x186   : > { %v4726_v38 = vpop.permute.xlu1 %858 }
 0x187   : > { %v726_v39 = vpop.permute.xlu0 %725  ;;  %v774_v40 = vld [vmem:[#allocation2 + $0x20] sm:$0xff] }
 0x188   : > { %v4730_v41 = vsel %vm739_vm6, %v726_v39, %v4584_v7  ;;  %840 = vrot.lane.b32.xlu0 %v774_v40, %s4272_s28 }
 0x18a   : > { %v4733_v42 = vpop.permute.xlu1 %1053 }
 0x18b   : > { %v4735_v43 = vpop.permute.xlu0 %868 }
 0x18c   : > { %v779_v44 = vld [vmem:[#allocation2 + $0x48] sm:$0xff]  ;;  %888 = vrot.lane.b32.xlu0 %v4719_v35, %s4272_s28 }
 0x18d   : > { %850 = vrot.lane.b32.xlu1 %v779_v44, %s4272_s28 }
 0x18e   : > { %v672_v45 = vpop.permute.xlu1 %671 }
 0x18f   : > { %v690_v46 = vsel %vm689_vm4, %v670_v24, %v672_v45  ;;  %v674_v47 = vpop.permute.xlu0 %673 }
 0x190   : > { %v691_v48 = vsel %vm689_vm4, %v672_v45, %v674_v47  ;;  %v4743_v49 = vsel %vm689_vm4, %v674_v47, %v676_v31  ;;  %1035 = vrot.lane.b32.xlu0 %v774_v40, %s4273_s16 }
 0x191   : > { %878 = vrot.lane.b32.xlu1 %v4730_v41, %s4272_s28 }
 0x192   : > { %v684_v50 = vpop.permute.xlu1 %683 }
 0x193   : > { %v696_v51 = vsel %vm689_vm4, %v684_v50, %v686_v36  ;;  %v682_v52 = vpop.permute.xlu0 %681 }
 0x194   : > { %v4750_v53 = vsel %vm689_vm4, %v680_v23, %v682_v52  ;;  %v695_v54 = vsel %vm689_vm4, %v682_v52, %v684_v50  ;;  %1083 = vrot.lane.b32.xlu0 %v4719_v35, %s4273_s16  ;;  %v4890_v52 = vunpack.c.h.bf16 %v4626_v14  ;;  %vm1651_vm4 = vcmask 588800  }
 0x195   : > { %1045 = vrot.lane.b32.xlu1 %v779_v44, %s4273_s16 }
 0x196   : > { %v724_v55 = vpop.permute.xlu1 %723  ;;  %6986 = vst [vmem:[#allocation16_spill] sm:$0xff] %v4890_v52 }
 0x197   : > { %v742_v56 = vsel %vm739_vm6, %v724_v55, %v726_v39  ;;  %v722_v57 = vpop.permute.xlu0 %721 }
 0x198   : > { %v740_v58 = vsel %vm739_vm6, %v720_v25, %v722_v57  ;;  %v741_v59 = vsel %vm739_vm6, %v722_v57, %v724_v55  ;;  %1231 = vrot.lane.b32.xlu0 %v774_v40, %s4274_s7  ;;  %v4897_v55 = vunpack.c.h.bf16 %v4628_v15 }
 0x199   : > { %1073 = vrot.lane.b32.xlu1 %v4730_v41, %s4273_s16 }
 0x19a   : > { %v732_v60 = vpop.permute.xlu1 %731  ;;  %6988 = vst [vmem:[#allocation18_spill] sm:$0xff] %v4897_v55 }
 0x19b   : > { %v4763_v61 = vsel %vm739_vm6, %v730_v26, %v732_v60  ;;  %v734_v62 = vpop.permute.xlu0 %733 }
 0x19c   : > { %v745_v63 = vsel %vm739_vm6, %v732_v60, %v734_v62  ;;  %v746_v1 = vsel %vm739_vm6, %v734_v62, %v736_v34  ;;  %834 = vrot.lane.b32.xlu0 %v690_v46, %s4272_s28 }
 0x19d   : > { %1241 = vrot.lane.b32.xlu1 %v779_v44, %s4274_s7 }
 0x19e   : > { %v4775_v2 = vpop.permute.xlu1 %856 }
 0x19f   : > { %v4781_v3 = vpop.permute.xlu0 %854 }
 0x1a0   : > { %846 = vrot.lane.b32.xlu0 %v695_v54, %s4272_s28 }
 0x1a1   : > { %836 = vrot.lane.b32.xlu1 %v691_v48, %s4272_s28 }
 0x1a2   : > { %v4783_v4 = vpop.permute.xlu1 %864 }
 0x1a3   : > { %v4787_v5 = vpop.permute.xlu0 %866 }
 0x1a4   : > { %848 = vrot.lane.b32.xlu0 %v696_v51, %s4272_s28 }
 0x1a5   : > { %838 = vrot.lane.b32.xlu1 %v4743_v49, %s4272_s28 }
 0x1a6   : > { %v4790_v6 = vpop.permute.xlu1 %1051 }
 0x1a7   : > { %v4796_v7 = vpop.permute.xlu0 %1049 }
 0x1a8   : > { %874 = vrot.lane.b32.xlu0 %v741_v59, %s4272_s28 }
 0x1a9   : > { %844 = vrot.lane.b32.xlu1 %v4750_v53, %s4272_s28 }
 0x1aa   : > { %v4798_v13 = vpop.permute.xlu1 %1059 }
 0x1ab   : > { %v4803_v23 = vpop.permute.xlu0 %1061 }
 0x1ac   : > { %872 = vrot.lane.b32.xlu0 %v740_v58, %s4272_s28 }
 0x1ad   : > { %876 = vrot.lane.b32.xlu1 %v742_v56, %s4272_s28 }
 0x1ae   : > { %v4806_v24 = vpop.permute.xlu1 %1057 }
 0x1af   : > { %v4812_v25 = vpop.permute.xlu0 %1063 }
 0x1b0   : > { %886 = vrot.lane.b32.xlu0 %v746_v1, %s4272_s28 }
 0x1b1   : > { %884 = vrot.lane.b32.xlu1 %v745_v63, %s4272_s28 }
 0x1b2   : > { %v4814_v26 = vpop.permute.xlu1 %1065 }
 0x1b3   : > { %v4818_v28 = vpop.permute.xlu0 %1075 }
 0x1b4   : > { %1029 = vrot.lane.b32.xlu0 %v690_v46, %s4273_s16 }
 0x1b5   : > { %882 = vrot.lane.b32.xlu1 %v4763_v61, %s4272_s28 }
 0x1b6   : > { %v4821_v30 = vpop.permute.xlu1 %1085 }
 0x1b7   : > { %v4827_v31 = vpop.permute.xlu0 %1245 }
 0x1b8   : > { %1041 = vrot.lane.b32.xlu0 %v695_v54, %s4273_s16 }
 0x1b9   : > { %1031 = vrot.lane.b32.xlu1 %v691_v48, %s4273_s16 }
 0x1ba   : > { %v4829_v32 = vpop.permute.xlu1 %1247 }
 0x1bb   : > { %v4834_v34 = vpop.permute.xlu0 %1243 }
 0x1bc   : > { %1043 = vrot.lane.b32.xlu0 %v696_v51, %s4273_s16 }
 0x1bd   : > { %1033 = vrot.lane.b32.xlu1 %v4743_v49, %s4273_s16 }
 0x1be   : > { %v4837_v36 = vpop.permute.xlu1 %1249 }
 0x1bf   : > { %v4843_v37 = vpop.permute.xlu0 %1251 }
 0x1c0   : > { %1069 = vrot.lane.b32.xlu0 %v741_v59, %s4273_s16 }
 0x1c1   : > { %1039 = vrot.lane.b32.xlu1 %v4750_v53, %s4273_s16 }
 0x1c2   : > { %v4845_v39 = vpop.permute.xlu1 %1255 }
 0x1c3   : > { %v4851_v40 = vpop.permute.xlu0 %1257 }
 0x1c4   : > { %1067 = vrot.lane.b32.xlu0 %v740_v58, %s4273_s16 }
 0x1c5   : > { %1071 = vrot.lane.b32.xlu1 %v742_v56, %s4273_s16 }
 0x1c6   : > { %v4854_v44 = vpop.permute.xlu1 %1253 }
 0x1c7   : > { %v4867_v45 = vpop.permute.xlu0 %1259 }
 0x1c8   : > { %1081 = vrot.lane.b32.xlu0 %v746_v1, %s4273_s16 }
 0x1c9   : > { %1079 = vrot.lane.b32.xlu1 %v745_v63, %s4273_s16 }
 0x1ca   : > { %v4872_v47 = vpop.permute.xlu1 %1261 }
 0x1cc   : > { %1225 = vrot.lane.b32.xlu0 %v690_v46, %s4274_s7  ;;  %v4870_v46 = vunpack.c.l.bf16 %v4626_v14 }
 0x1cd   : > { %1077 = vrot.lane.b32.xlu1 %v4763_v61, %s4273_s16 }
 0x1ce   : > { %6981 = vst [vmem:[#allocation11_spill] sm:$0xff] %v4870_v46 }
 0x1d0   : > { %1237 = vrot.lane.b32.xlu0 %v695_v54, %s4274_s7 }
 0x1d1   : > { %1227 = vrot.lane.b32.xlu1 %v691_v48, %s4274_s7  ;;  %v4875_v48 = vunpack.c.l.bf16 %v4628_v15 }
 0x1d3   : > { %6982 = vst [vmem:[#allocation12_spill] sm:$0xff] %v4875_v48 }
 0x1d4   : > { %1239 = vrot.lane.b32.xlu0 %v696_v51, %s4274_s7 }
 0x1d5   : > { %1229 = vrot.lane.b32.xlu1 %v4743_v49, %s4274_s7  ;;  %v4883_v49 = vunpack.c.h.bf16 %v4611_v12 }
 0x1d7   : > { %6984 = vst [vmem:[#allocation14_spill] sm:$0xff] %v4883_v49  ;;  %v4910_v14 = vpack.i.bf16 %v4883_v49, %v4897_v55 }
 0x1d8   : > { %1265 = vrot.lane.b32.xlu0 %v741_v59, %s4274_s7 }
 0x1d9   : > { %1235 = vrot.lane.b32.xlu1 %v4750_v53, %s4274_s7  ;;  %6990 = vst [vmem:[#allocation20_spill] sm:$0xff] %v4910_v14 }
 0x1dc   : > { %1263 = vrot.lane.b32.xlu0 %v740_v58, %s4274_s7 }
 0x1dd   : > { %1267 = vrot.lane.b32.xlu1 %v742_v56, %s4274_s7  ;;  %v4913_v56 = vunpack.c.l.bf16 %v4636_v17 }
 0x1df   : > { %6991 = vst [vmem:[#allocation21_spill] sm:$0xff] %v4913_v56 }
 0x1e0   : > { %1271 = vrot.lane.b32.xlu0 %v4591_v9, %s4274_s7  ;;  %v1421_v9 = vld [vmem:[%s6817_s3] sm:$0xff] }
 0x1e1   : > { %1269 = vrot.lane.b32.xlu1 %v4730_v41, %s4274_s7  ;;  %v4865_v41 = vunpack.c.l.bf16 %v4611_v12 }
 0x1e3   : > { %6980 = vst [vmem:[#allocation10_spill] sm:$0xff] %v4865_v41  ;;  %v4887_v51 = vpack.i.bf16 %v4865_v41, %v4875_v48 }
 0x1e4   : > { %1277 = vrot.lane.b32.xlu0 %v746_v1, %s4274_s7 }
 0x1e5   : > { %1275 = vrot.lane.b32.xlu1 %v745_v63, %s4274_s7  ;;  %6985 = vst [vmem:[#allocation15_spill] sm:$0xff] %v4887_v51 }
 0x1e8   : > { %1279 = vrot.lane.b32.xlu0 %v4719_v35, %s4274_s7  ;;  %v4878_v35 = vunpack.c.l.bf16 %v4597_v11 }
 0x1e9   : > { %1273 = vrot.lane.b32.xlu1 %v4763_v61, %s4274_s7 }
 0x1ea   : > { %6983 = vst [vmem:[#allocation13_spill] sm:$0xff] %v4878_v35  ;;  %v4894_v54 = vpack.i.bf16 %v4870_v46, %v4878_v35 }
 0x1ec   : > { %1424 = vperm.xlu0 %3783, %v1421_v9   ;;  %6987 = vst [vmem:[#allocation17_spill] sm:$0xff] %v4894_v54 }
 0x1ed   : > { %1281 = vrot.lane.b32.xlu1 %v4587_v8, %s4274_s7  ;;  %v843_v53 = vpop.permute.xlu1 %842  ;;  %v4902_v8 = vunpack.c.h.bf16 %v4597_v11  ;;  %v4922_v11 = vunpack.c.l.bf16 %v4595_v10 }
 0x1ee   : > { %v833_v50 = vpop.permute.xlu0 %832 }
 0x1ef   : > { %6989 = vst [vmem:[#allocation19_spill] sm:$0xff] %v4902_v8  ;;  %v4917_v15 = vpack.i.bf16 %v4890_v52, %v4902_v8  ;;  %6993 = vst [vmem:[#allocation23_spill] sm:$0xff] %v4922_v11  ;;  %v4932_v17 = vpack.i.bf16 %v4913_v56, %v4922_v11 }
 0x1f0   : > { %3790 = vrot.lane.b32.xlu0 %v4887_v51, %s4275_s11 }
 0x1f1   : > { %3785 = vrot.lane.b32.xlu1 %v4894_v54, %s4275_s11  ;;  %6992 = vst [vmem:[#allocation22_spill] sm:$0xff] %v4917_v15  ;;  %v4924_v57 = vpop.permute.xlu1 %1037  ;;  %6994 = vst [vmem:[#allocation24_spill] sm:$0xff] %v4932_v17 }
 0x1f2   : > { %v4906_v12 = vpop.permute.xlu0 %1027 }
 0x1f4   : > { %3800 = vrot.lane.b32.xlu0 %v4910_v14, %s4275_s11 }
 0x1f5   : > { %3795 = vrot.lane.b32.xlu1 %v4917_v15, %s4275_s11  ;;  %v4936_v60 = vpop.permute.xlu1 %1233 }
 0x1f6   : > { %v4928_v58 = vpop.permute.xlu0 %1223 }
 0x1f9   : > { %3805 = vrot.lane.b32.xlu1 %v4932_v17, %s4275_s11 }
 0x1fa   : > { %v841_v59 = vpop.permute.xlu0 %840 }
 0x1fe   : > { %v4938_v61 = vpop.permute.xlu0 %888 }
 0x1ff   : > { %v851_v10 = vpop.permute.xlu1 %850 }
 0x202   : > { %v4940_v62 = vpop.permute.xlu0 %1035 }
 0x203   : > { %v879_v63 = vpop.permute.xlu1 %878 }
 0x206   : > { %v4942_v1 = vpop.permute.xlu0 %1083 }
 0x207   : > { %v4944_v9 = vpop.permute.xlu1 %1045 }
 0x20a   : > { %v4946_v0 = vpop.permute.xlu0 %1231 }
 0x20b   : > { %v4948_v56 = vpop.permute.xlu1 %1073 }
 0x20e   : > { %v835_v11 = vpop.permute.xlu0 %834 }
 0x20f   : > { %v4950_v49 = vpop.permute.xlu1 %1241  ;;  %v893_v41 = vsel %vm892_vm8, %v833_v50, %v835_v11 }
 0x212   : > { %v847_v55 = vpop.permute.xlu0 %846 }
 0x213   : > { %v837_v52 = vpop.permute.xlu1 %836 }
 0x214   : > { %v894_v8 = vsel %vm892_vm8, %v835_v11, %v837_v52 }
 0x215   : > { %945 = vmatprep.subr.bf16.mxu0 %v894_v8 }
 0x216   : > { %946 = vmatpush1.bf16.msra.mxu0 %v893_v41  ;;  %v849_v48 = vpop.permute.xlu0 %848 }
 0x217   : > { %v839_v46 = vpop.permute.xlu1 %838  ;;  %v900_v15 = vsel %vm892_vm8, %v849_v48, %v851_v10  ;;  %v899_v41 = vsel %vm892_vm8, %v847_v55, %v849_v48  ;;  %v903_v48 = vsel %vm892_vm8, %v4775_v2, %v4726_v38 }
 0x218   : > { %v896_v35 = vsel %vm892_vm8, %v839_v46, %v841_v59  ;;  %v895_v17 = vsel %vm892_vm8, %v837_v52, %v839_v46  ;;  %v902_v46 = vsel %vm892_vm8, %v4781_v3, %v4775_v2 }
 0x219   : > { %986 = vmatprep.subr.bf16.mxu1 %v896_v35  ;;  %v904_v35 = vsel %vm892_vm8, %v4726_v38, %v4694_v18  ;;  %v908_v18 = vsel %vm892_vm8, %v4735_v43, %v4696_v19  ;;  %v907_v38 = vsel %vm892_vm8, %v4787_v5, %v4735_v43  ;;  %v916_v43 = vsel %vm892_vm8, %v4938_v61, %v4700_v21 }
 0x21a   : > { %987 = vmatpush1.bf16.msra.mxu1 %v895_v17  ;;  %v875_v54 = vpop.permute.xlu0 %874 }
 0x21b   : > { %v845_v14 = vpop.permute.xlu1 %844  ;;  %988 = vmatprep.subr.bf16.mxu1 %v900_v15 }
 0x21c   : > { %v898_v51 = vsel %vm892_vm8, %v845_v14, %v847_v55  ;;  %v897_v8 = vsel %vm892_vm8, %v843_v53, %v845_v14  ;;  %v906_v53 = vsel %vm892_vm8, %v4783_v4, %v4787_v5 }
 0x21d   : > { %947 = vmatprep.subr.bf16.mxu0 %v898_v51  ;;  %v901_v51 = vsel %vm892_vm8, %v4706_v29, %v4781_v3  ;;  %v905_v29 = vsel %vm892_vm8, %v4704_v27, %v4783_v4  ;;  %v912_v3 = vsel %vm892_vm8, %v879_v63, %v4702_v22 }
 0x21e   : > { %948 = vmatpush1.bf16.msra.mxu0 %v897_v8  ;;  %989 = vmatpush1.bf16.msra.mxu1 %v899_v41  ;;  %v873_v50 = vpop.permute.xlu0 %872 }
 0x21f   : > { %v877_v52 = vpop.permute.xlu1 %876  ;;  %949 = vmatprep.subr.bf16.mxu0 %v902_v46  ;;  %990 = vmatprep.subr.bf16.mxu1 %v904_v35  ;;  %v909_v11 = vsel %vm892_vm8, %v873_v50, %v875_v54 }
 0x220   : > { %v910_v2 = vsel %vm892_vm8, %v875_v54, %v877_v52  ;;  %v911_v17 = vsel %vm892_vm8, %v877_v52, %v879_v63  ;;  %v3616_v63 = vld [vmem:[%s6815_s1 + $0x4] sm:$0xf]  ;;  %v6995_v52 = vmov 0  }
 0x222   : > { %950 = vmatpush1.bf16.msra.mxu0 %v901_v51  ;;  %991 = vmatpush1.bf16.msra.mxu1 %v903_v48  ;;  %v887_v55 = vpop.permute.xlu0 %886  ;;  %v1097_v48 = vsel %vm1087_vm9, %v4796_v7, %v4790_v6 }
 0x223   : > { %v885_v14 = vpop.permute.xlu1 %884  ;;  %951 = vmatprep.subr.bf16.mxu0 %v906_v53  ;;  %992 = vmatprep.subr.bf16.mxu1 %v908_v18  ;;  %v915_v54 = vsel %vm892_vm8, %v887_v55, %v4938_v61  ;;  %v1099_v18 = vsel %vm1087_vm9, %v4733_v42, %v4698_v20  ;;  %v1103_v20 = vsel %vm1087_vm9, %v4812_v25, %v4814_v26 }
 0x224   : > { %v914_v27 = vsel %vm892_vm8, %v885_v14, %v887_v55  ;;  %v1098_v55 = vsel %vm1087_vm9, %v4790_v6, %v4733_v42  ;;  %v1102_v42 = vsel %vm1087_vm9, %v4803_v23, %v4812_v25  ;;  %v1107_v26 = vsel %vm1087_vm9, %v4948_v56, %v4818_v28 }
 0x226   : > { %952 = vmatpush1.bf16.msra.mxu0 %v905_v29  ;;  %993 = vmatpush1.bf16.msra.mxu1 %v907_v38  ;;  %v1030_v19 = vpop.permute.xlu0 %1029 }
 0x227   : > { %v883_v15 = vpop.permute.xlu1 %882  ;;  %953 = vmatprep.subr.bf16.mxu0 %v910_v2  ;;  %994 = vmatprep.subr.bf16.mxu1 %v912_v3  ;;  %v1088_v61 = vsel %vm1087_vm9, %v4906_v12, %v1030_v19 }
 0x228   : > { %v913_v22 = vsel %vm892_vm8, %v883_v15, %v885_v14  ;;  %v1101_v14 = vsel %vm1087_vm9, %v4798_v13, %v4803_v23 }
 0x22a   : > { %954 = vmatpush1.bf16.msra.mxu0 %v909_v11  ;;  %995 = vmatpush1.bf16.msra.mxu1 %v911_v17  ;;  %v1042_v4 = vpop.permute.xlu0 %1041  ;;  %v769_v17 = vld [vmem:[%s6815_s1] sm:$0xf] }
 0x22b   : > { %v1032_v5 = vpop.permute.xlu1 %1031  ;;  %955 = vmatprep.subr.bf16.mxu0 %v914_v27  ;;  %996 = vmatprep.subr.bf16.mxu1 %v916_v43 }
 0x22c   : > { %v1089_v59 = vsel %vm1087_vm9, %v1030_v19, %v1032_v5  ;;  %v1111_v19 = vsel %vm1087_vm9, %v4942_v1, %v4821_v30 }
 0x22e   : > { %956 = vmatpush1.bf16.msra.mxu0 %v913_v22  ;;  %997 = vmatpush1.bf16.msra.mxu1 %v915_v54  ;;  %v1044_v10 = vpop.permute.xlu0 %1043 }
 0x22f   : > { %v1034_v21 = vpop.permute.xlu1 %1033  ;;  %1139 = vmatprep.subr.bf16.mxu0 %v1089_v59  ;;  %v1095_v50 = vsel %vm1087_vm9, %v1044_v10, %v4944_v9  ;;  %v1094_v12 = vsel %vm1087_vm9, %v1042_v4, %v1044_v10  ;;  %v1293_v59 = vsel %vm1283_vm11, %v4827_v31, %v4829_v32 }
 0x230   : > { %v1091_v8 = vsel %vm1087_vm9, %v1034_v21, %v4940_v62  ;;  %v1090_v41 = vsel %vm1087_vm9, %v1032_v5, %v1034_v21  ;;  %v1294_v21 = vsel %vm1283_vm11, %v4829_v32, %v4837_v36  ;;  %v1298_v32 = vsel %vm1283_vm11, %v4851_v40, %v4867_v45 }
 0x231   : > { %3617 = vmatmul.mubr.msk.bf16.vlgmr.msra.gmra.mrb[0].mxu0 %vm941_vm10, %v3616_v63  ;;  %1180 = vmatprep.subr.bf16.mxu1 %v1091_v8  ;;  %v1297_v8 = vsel %vm1283_vm11, %v4845_v39, %v4851_v40 }
 0x232   : > { %3618 = vmatmul.mubr.msk.bf16.vlgmr.msra.gmra.mrb[0].mxu1 %vm941_vm10, %v3616_v63  ;;  %1140 = vmatpush1.bf16.msra.mxu0 %v1088_v61  ;;  %v1070_v46 = vpop.permute.xlu0 %1069  ;;  %v1295_v63 = vsel %vm1283_vm11, %v4837_v36, %v4843_v37  ;;  %v1299_v37 = vsel %vm1283_vm11, %v4867_v45, %v4872_v47 }
 0x233   : > { %1181 = vmatpush1.bf16.msra.mxu1 %v1090_v41  ;;  %v1040_v35 = vpop.permute.xlu1 %1039  ;;  %1171 = vmatprep.mubr.bf16.mxu0 %v6995_v52 }
 0x234   : > { %1182 = vmatprep.subr.bf16.mxu1 %v1095_v50  ;;  %v1093_v62 = vsel %vm1087_vm9, %v1040_v35, %v1042_v4  ;;  %v1092_v51 = vsel %vm1087_vm9, %v4924_v57, %v1040_v35  ;;  %1212 = vmatprep.mubr.bf16.mxu1 %v6995_v52  ;;  %v1096_v57 = vsel %vm1087_vm9, %v4712_v33, %v4796_v7 }
 0x235   : > { %1141 = vmatprep.subr.bf16.mxu0 %v1093_v62  ;;  %v1100_v33 = vsel %vm1087_vm9, %v4806_v24, %v4798_v13 }
 0x236   : > { %1142 = vmatpush1.bf16.msra.mxu0 %v1092_v51  ;;  %v1068_v53 = vpop.permute.xlu0 %1067 }
 0x237   : > { %1183 = vmatpush1.bf16.msra.mxu1 %v1094_v12  ;;  %v1072_v9 = vpop.permute.xlu1 %1071  ;;  %1143 = vmatprep.subr.bf16.mxu0 %v1097_v48  ;;  %v1104_v3 = vsel %vm1087_vm9, %v1068_v53, %v1070_v46 }
 0x238   : > { %1184 = vmatprep.subr.bf16.mxu1 %v1099_v18  ;;  %v1105_v6 = vsel %vm1087_vm9, %v1070_v46, %v1072_v9  ;;  %v1106_v13 = vsel %vm1087_vm9, %v1072_v9, %v4948_v56 }
 0x23a   : > { %1144 = vmatpush1.bf16.msra.mxu0 %v1096_v57  ;;  %v1082_v29 = vpop.permute.xlu0 %1081 }
 0x23b   : > { %1185 = vmatpush1.bf16.msra.mxu1 %v1098_v55  ;;  %v1080_v38 = vpop.permute.xlu1 %1079  ;;  %1145 = vmatprep.subr.bf16.mxu0 %v1101_v14  ;;  %v1110_v15 = vsel %vm1087_vm9, %v1082_v29, %v4942_v1 }
 0x23c   : > { %1186 = vmatprep.subr.bf16.mxu1 %v1103_v20  ;;  %v1109_v24 = vsel %vm1087_vm9, %v1080_v38, %v1082_v29 }
 0x23e   : > { %1146 = vmatpush1.bf16.msra.mxu0 %v1100_v33  ;;  %v1226_v7 = vpop.permute.xlu0 %1225 }
 0x23f   : > { %1187 = vmatpush1.bf16.msra.mxu1 %v1102_v42  ;;  %v1078_v2 = vpop.permute.xlu1 %1077  ;;  %1147 = vmatprep.subr.bf16.mxu0 %v1105_v6  ;;  %v1284_v1 = vsel %vm1283_vm11, %v4928_v58, %v1226_v7 }
 0x240   : > { %1188 = vmatprep.subr.bf16.mxu1 %v1107_v26  ;;  %v1108_v28 = vsel %vm1087_vm9, %v1078_v2, %v1080_v38 }
 0x242   : > { %1148 = vmatpush1.bf16.msra.mxu0 %v1104_v3  ;;  %v1238_v23 = vpop.permute.xlu0 %1237 }
 0x243   : > { %1189 = vmatpush1.bf16.msra.mxu1 %v1106_v13  ;;  %v1228_v25 = vpop.permute.xlu1 %1227  ;;  %1149 = vmatprep.subr.bf16.mxu0 %v1109_v24 }
 0x244   : > { %1190 = vmatprep.subr.bf16.mxu1 %v1111_v19  ;;  %v1285_v56 = vsel %vm1283_vm11, %v1226_v7, %v1228_v25 }
 0x246   : > { %1150 = vmatpush1.bf16.msra.mxu0 %v1108_v28  ;;  %v1240_v11 = vpop.permute.xlu0 %1239 }
 0x247   : > { %1191 = vmatpush1.bf16.msra.mxu1 %v1110_v15  ;;  %v1230_v27 = vpop.permute.xlu1 %1229  ;;  %1335 = vmatprep.subr.bf16.mxu0 %v1285_v56  ;;  %v1291_v22 = vsel %vm1283_vm11, %v1240_v11, %v4950_v49  ;;  %v1290_v58 = vsel %vm1283_vm11, %v1238_v23, %v1240_v11  ;;  %v1431_v15 = vld [vmem:[%s6818_s4] sm:$0xf] }
 0x248   : > { %v1287_v30 = vsel %vm1283_vm11, %v1230_v27, %v4946_v0  ;;  %v1286_v43 = vsel %vm1283_vm11, %v1228_v25, %v1230_v27  ;;  %v1433_v25 = vlaneseq }
 0x249   : > { %3619 = vmatmul.mubr.msk.bf16.vlgmr.msra.gmra.mrb[4].mxu0 %vm941_vm10, %v769_v17  ;;  %1376 = vmatprep.subr.bf16.mxu1 %v1287_v30 }
 0x24a   : > { %3620 = vmatmul.mubr.msk.bf16.vlgmr.msra.gmra.mrb[4].mxu1 %vm941_vm10, %v769_v17  ;;  %1336 = vmatpush1.bf16.msra.mxu0 %v1284_v1  ;;  %v1266_v4 = vpop.permute.xlu0 %1265  ;;  %v1434_v19 = vshrl.u32 %v1433_v25, 7 }
 0x24b   : > { %1377 = vmatpush1.bf16.msra.mxu1 %v1286_v43  ;;  %v1236_v5 = vpop.permute.xlu1 %1235  ;;  %1367 = vmatprep.mubr.bf16.mxu0 %v6995_v52 }
 0x24c   : > { %1378 = vmatprep.subr.bf16.mxu1 %v1291_v22  ;;  %v1289_v0 = vsel %vm1283_vm11, %v1236_v5, %v1238_v23  ;;  %v1288_v54 = vsel %vm1283_vm11, %v4936_v60, %v1236_v5  ;;  %1408 = vmatprep.mubr.bf16.mxu1 %v6995_v52  ;;  %v1292_v60 = vsel %vm1283_vm11, %v4834_v34, %v4827_v31  ;;  %v3621_v52 = vld [vmem:[%s6815_s1 + $0x8] sm:$0xf]  ;;  %v5109_v28 = vsub.s32 0, %v1434_v19 }
 0x24d   : > { %1337 = vmatprep.subr.bf16.mxu0 %v1289_v0  ;;  %v1296_v31 = vsel %vm1283_vm11, %v4854_v44, %v4845_v39  ;;  %v5114_v56 = vsub.s32 1, %v1434_v19  ;;  %v5117_v43 = vsub.s32 2, %v1434_v19  ;;  %v5120_v0 = vsub.s32 3, %v1434_v19 }
 0x24e   : > { %1338 = vmatpush1.bf16.msra.mxu0 %v1288_v54  ;;  %v1264_v10 = vpop.permute.xlu0 %1263  ;;  %6996 = vst [vmem:[#allocation25_spill] sm:$0xff] %v5109_v28  ;;  %v1436_v27 = vrot.slane %v1431_v15, %v5109_v28 }
 0x24f   : > { %1379 = vmatpush1.bf16.msra.mxu1 %v1290_v58  ;;  %v1268_v49 = vpop.permute.xlu1 %1267  ;;  %1339 = vmatprep.subr.bf16.mxu0 %v1293_v59  ;;  %v1300_v47 = vsel %vm1283_vm11, %v1264_v10, %v1266_v4  ;;  %6997 = vst [vmem:[#allocation26_spill] sm:$0xff] %v5114_v56  ;;  %6998 = vst [vmem:[#allocation27_spill] sm:$0xff] %v5117_v43  ;;  %v1440_v5 = vrot.slane %v1431_v15, %v5114_v56 }
 0x250   : > { %1380 = vmatprep.subr.bf16.mxu1 %v1295_v63  ;;  %v1301_v34 = vsel %vm1283_vm11, %v1266_v4, %v1268_v49  ;;  %6999 = vst [vmem:[#allocation28_spill] sm:$0xff] %v5120_v0 }
 0x252   : > { %1340 = vmatpush1.bf16.msra.mxu0 %v1292_v60  ;;  %v1272_v41 = vpop.permute.xlu0 %1271  ;;  %v1444_v60 = vrot.slane %v1431_v15, %v5117_v43 }
 0x253   : > { %1381 = vmatpush1.bf16.msra.mxu1 %v1294_v21  ;;  %v1270_v61 = vpop.permute.xlu1 %1269  ;;  %1341 = vmatprep.subr.bf16.mxu0 %v1297_v8 }
 0x254   : > { %1382 = vmatprep.subr.bf16.mxu1 %v1299_v37  ;;  %v1303_v46 = vsel %vm1283_vm11, %v1270_v61, %v1272_v41  ;;  %v1302_v50 = vsel %vm1283_vm11, %v1268_v49, %v1270_v61  ;;  %v1448_v61 = vrot.slane %v1431_v15, %v5120_v0 }
 0x256   : > { %1342 = vmatpush1.bf16.msra.mxu0 %v1296_v31  ;;  %v1278_v35 = vpop.permute.xlu0 %1277 }
 0x257   : > { %1383 = vmatpush1.bf16.msra.mxu1 %v1298_v32  ;;  %v1276_v36 = vpop.permute.xlu1 %1275  ;;  %1343 = vmatprep.subr.bf16.mxu0 %v1301_v34 }
 0x258   : > { %1384 = vmatprep.subr.bf16.mxu1 %v1303_v46  ;;  %v1305_v39 = vsel %vm1283_vm11, %v1276_v36, %v1278_v35 }
 0x25a   : > { %1344 = vmatpush1.bf16.msra.mxu0 %v1300_v47  ;;  %v1280_v45 = vpop.permute.xlu0 %1279  ;;  %v4278_v47 = vmov 0.0|0.0  }
 0x25b   : > { %1385 = vmatpush1.bf16.msra.mxu1 %v1302_v50  ;;  %v1274_v44 = vpop.permute.xlu1 %1273  ;;  %1345 = vmatprep.subr.bf16.mxu0 %v1305_v39  ;;  %v1306_v12 = vsel %vm1283_vm11, %v1278_v35, %v1280_v45  ;;  %v5136_v39 = vunpack.c.l.bf16 %v4634_v16  ;;  %v4149_v16 = vld [vmem:[#allocation2 + $0x88] sm:$0xff] }
 0x25c   : > { %v1304_v40 = vsel %vm1283_vm11, %v1274_v44, %v1276_v36  ;;  %v4148_v44 = vld [vmem:[#allocation2 + $0x90] sm:$0xff] }
 0x25d   : > { %7000 = vst [vmem:[#allocation29_spill] sm:$0xff] %v5136_v39 }
 0x25e   : > { %1346 = vmatpush1.bf16.msra.mxu0 %v1304_v40  ;;  %v5138_v40 = vunpack.c.l.bf16 %v4148_v44 }
 0x25f   : > { %v1282_v62 = vpop.permute.xlu1 %1281 }
 0x260   : > { %v1307_v51 = vsel %vm1283_vm11, %v1280_v45, %v1282_v62  ;;  %7001 = vst [vmem:[#allocation30_spill] sm:$0xff] %v5138_v40  ;;  %v4281_v45 = vmov 0.0   ;;  %v5146_v62 = vpack.i.bf16 %v5138_v40, %v5136_v39 }
 0x261   : > { %3622 = vmatmul.mubr.msk.bf16.vlgmr.msra.gmra.mrb[8].mxu0 %vm941_vm10, %v3621_v52  ;;  %1386 = vmatprep.subr.bf16.mxu1 %v1307_v51  ;;  %v5149_v51 = vunpack.c.h.bf16 %v4149_v16 }
 0x262   : > { %1387 = vmatpush1.bf16.msra.mxu1 %v1306_v12  ;;  %1719 = vmatprep.mubr.f32.mxu0 %v4281_v45 }
 0x263   : > { %3677 = vmatprep.subr.bf16.mxu1 %v4278_v47  ;;  %7003 = vst [vmem:[#allocation32_spill] sm:$0xff] %v5149_v51 }
 0x265   : > { %3623 = vmatmul.mubr.msk.bf16.vlgmr.msra.gmra.mrb[8].mxu1 %vm941_vm10, %v3621_v52  ;;  %v5142_v52 = vunpack.c.h.bf16 %v4148_v44 }
 0x266   : > { %3658 = vmatprep.mubr.msk.f32.mxu1 %vm4284_vm0, %v4281_v45 }
 0x267   : > { %7002 = vst [vmem:[#allocation31_spill] sm:$0xff] %v5142_v52  ;;  %v3899_v12 = vpack.i.bf16 %v5142_v52, %v5149_v51 }
 0x26b   : > { %v1425_v1 = vpop.permute.xlu0 %1424 }
 0x304   : > { %v979_v48 = vpop.f32.mrb[0].mxu0 }
 0x305   : > { %v981_v53 = vpop.f32.mrb[1].mxu0  ;;  %v1020_v9 = vpop.f32.mrb[0].mxu1 }
 0x306   : > { %v983_v18 = vpop.f32.mrb[2].mxu0  ;;  %v1022_v57 = vpop.f32.mrb[1].mxu1 }
 0x307   : > { %v984_v55 = vpop.f32.mrb[3].mxu0  ;;  %v1024_v14 = vpop.f32.mrb[2].mxu1 }
 0x308   : > { %v1025_v29 = vpop.f32.mrb[3].mxu1  ;;  %v7007_v14 = vld [vmem:[#allocation20_spill] sm:$0xff] }
 0x309   : > { %v7008_v29 = vld [vmem:[#allocation17_spill] sm:$0xff] }
 0x31c   : > { %v1173_v38 = vpop.f32.mrb[4].mxu0 }
 0x31d   : > { %v1174_v20 = vadd.f32 %v1173_v38, %v979_v48  ;;  %v1214_v33 = vpop.f32.mrb[4].mxu1  ;;  %v1175_v42 = vpop.f32.mrb[5].mxu0  ;;  %v4150_v48 = vld [vmem:[#allocation2 + $0x80] sm:$0xff]  ;;  %v7009_v38 = vld [vmem:[#allocation22_spill] sm:$0xff] }
 0x31e   : > { %v1215_v6 = vadd.f32 %v1214_v33, %v1020_v9  ;;  %v1176_v7 = vadd.f32 %v1175_v42, %v981_v53  ;;  %v1216_v2 = vpop.f32.mrb[5].mxu1  ;;  %v1177_v26 = vpop.f32.mrb[6].mxu0  ;;  %v5157_v53 = vunpack.c.h.bf16 %v4150_v48  ;;  %v4151_v9 = vld [vmem:[#allocation2 + $0x78] sm:$0xff] }
 0x31f   : > { %v1217_v3 = vadd.f32 %v1216_v2, %v1022_v57  ;;  %v1178_v13 = vpop.f32.mrb[7].mxu0  ;;  %v1218_v24 = vpop.f32.mrb[6].mxu1  ;;  %v5159_v18 = vunpack.c.h.bf16 %v4151_v9  ;;  %v7006_v57 = vld [vmem:[#allocation15_spill] sm:$0xff] }
 0x320   : > { %v1219_v23 = vpop.f32.mrb[7].mxu1  ;;  %7004 = vst [vmem:[#allocation33_spill] sm:$0xff] %v5157_v53  ;;  %v5179_v33 = vpop.permute.xlu1 %3785 }
 0x321   : > { %7005 = vst [vmem:[#allocation34_spill] sm:$0xff] %v5159_v18  ;;  %v3894_v55 = vpack.i.bf16 %v5157_v53, %v5159_v18  ;;  %v5181_v42 = vpop.permute.xlu0 %3790 }
 0x334   : > { %v1369_v11 = vpop.f32.mrb[8].mxu0 }
 0x335   : > { %v1417_v17 = vadd.f32 %v1369_v11, %v1174_v20  ;;  %v1371_v30 = vpop.f32.mrb[9].mxu0  ;;  %v7010_v20 = vld [vmem:[#allocation24_spill] sm:$0xff] }
 0x336   : > { %v1418_v4 = vadd.f32 %v1371_v30, %v1176_v7  ;;  %v1373_v22 = vpop.f32.mrb[10].mxu0  ;;  %v5185_v7 = vpop.permute.xlu0 %3800 }
 0x337   : > { %v1427_v54 = vadd.f32 %v1425_v1, %v1417_v17  ;;  %v1374_v58 = vpop.f32.mrb[11].mxu0 }
 0x338   : > { %v1428_v59 = vadd.f32 %v1425_v1, %v1418_v4  ;;  %v1410_v10 = vpop.f32.mrb[8].mxu1 }
 0x339   : > { %v1453_v49 = vmul.f32 %v1436_v27, %v1427_v54  ;;  %v1419_v63 = vadd.f32 %v1410_v10, %v1215_v6  ;;  %v1412_v21 = vpop.f32.mrb[9].mxu1  ;;  %v5183_v6 = vpop.permute.xlu1 %3795 }
 0x33a   : > { %v1454_v8 = vmul.f32 %v1440_v5, %v1428_v59  ;;  %v1420_v41 = vadd.f32 %v1412_v21, %v1217_v3  ;;  %v1414_v37 = vpop.f32.mrb[10].mxu1 }
 0x33b   : > { %v1429_v31 = vadd.f32 %v1425_v1, %v1419_v63  ;;  %v1415_v32 = vpop.f32.mrb[11].mxu1  ;;  %1605 = vrot.lane.b32.xlu0 %v1453_v49, %s4276_s13 }
 0x33c   : > { %v1430_v34 = vadd.f32 %v1425_v1, %v1420_v41  ;;  %v3809_v36 = vpack.i.bf16 %v1454_v8, %v1453_v49 }
 0x33d   : > { %v1455_v46 = vmul.f32 %v1444_v60, %v1429_v31  ;;  %v5187_v2 = vpop.permute.xlu1 %3805 }
 0x33e   : > { %v1456_v35 = vmul.f32 %v1448_v61, %v1430_v34  ;;  %3810 = vrot.lane.b32.xlu1 %v3809_v36, %s4277_s17 }
 0x33f   : > { %1609 = vrot.lane.b32.xlu0 %v1455_v46, %s4276_s13 }
 0x340   : > { %v3814_v50 = vpack.i.bf16 %v1456_v35, %v1455_v46 }
 0x342   : > { %3815 = vrot.lane.b32.xlu1 %v3814_v50, %s4277_s17  ;;  %s4292_s17 = smov 21  }
 0x343   : > { %3820 = vrot.lane.b32.xlu0 %v3809_v36, %s4271_s15 }
 0x346   : > { %3825 = vrot.lane.b32.xlu1 %v3814_v50, %s4271_s15 }
 0x347   : > { %3830 = vrot.lane.b32.xlu0 %v3809_v36, %s4279_s25 }
 0x34a   : > { %3835 = vrot.lane.b32.xlu1 %v3814_v50, %s4279_s25  ;;  %s4293_s25 = smov 25  }
 0x34b   : > { %3840 = vrot.lane.b32.xlu0 %v3809_v36, %s4273_s16 }
 0x34e   : > { %3845 = vrot.lane.b32.xlu1 %v3814_v50, %s4273_s16  ;;  %s4282_s16 = smov 56  }
 0x34f   : > { %3850 = vrot.lane.b32.xlu0 %v3809_v36, %s4272_s28 }
 0x352   : > { %3855 = vrot.lane.b32.xlu1 %v3814_v50, %s4272_s28 }
 0x353   : > { %3860 = vrot.lane.b32.xlu0 %v3809_v36, %s4274_s7 }
 0x356   : > { %3865 = vrot.lane.b32.xlu1 %v3814_v50, %s4274_s7  ;;  %s4283_s7 = smov 126  }
 0x357   : > { %3870 = vrot.lane.b32.xlu0 %v3809_v36, %s4280_s26 }
 0x35a   : > { %3875 = vrot.lane.b32.xlu1 %v3814_v50, %s4280_s26  ;;  %s4294_s26 = smov 50  }
 0x35b   : > { %3880 = vrot.lane.b32.xlu0 %v3809_v36, %s4282_s16 }
 0x35e   : > { %3890 = vrot.lane.b32.xlu1 %v3814_v50, %s4282_s16 }
 0x35f   : > { %3885 = vrot.lane.b32.xlu0 %v5146_v62, %s4275_s11 }
 0x362   : > { %1607 = vrot.lane.b32.xlu1 %v1454_v8, %s4276_s13 }
 0x363   : > { %3900 = vrot.lane.b32.xlu0 %v3899_v12, %s4275_s11 }
 0x366   : > { %1611 = vrot.lane.b32.xlu1 %v1456_v35, %s4276_s13  ;;  %s4291_s13 = smov 46  }
 0x367   : > { %3910 = vrot.lane.b32.xlu0 %v7006_v57, %s4283_s7 }
 0x36a   : > { %3895 = vrot.lane.b32.xlu1 %v3894_v55, %s4275_s11 }
 0x36b   : > { %3920 = vrot.lane.b32.xlu0 %v7007_v14, %s4283_s7 }
 0x36e   : > { %3905 = vrot.lane.b32.xlu1 %v7008_v29, %s4283_s7 }
 0x36f   : > { %3930 = vrot.lane.b32.xlu0 %v5146_v62, %s4283_s7 }
 0x372   : > { %3915 = vrot.lane.b32.xlu1 %v7009_v38, %s4283_s7 }
 0x373   : > { %3940 = vrot.lane.b32.xlu0 %v3899_v12, %s4283_s7 }
 0x376   : > { %3925 = vrot.lane.b32.xlu1 %v7010_v20, %s4283_s7 }
 0x37a   : > { %3935 = vrot.lane.b32.xlu1 %v3894_v55, %s4283_s7 }
 0x3ad   : > { %v5189_v26 = vpop.permute.xlu0 %1605 }
 0x3b0   : > { %v3811_v3 = vpop.permute.xlu1 %3810 }
 0x3b1   : > { %v5191_v13 = vpop.permute.xlu0 %1609  ;;  %v3813_v17 = vunpack.i.h.bf16 %v3811_v3  ;;  %v3812_v27 = vunpack.i.l.bf16 %v3811_v3 }
 0x3b3   : > { %v1470_v21 = vsel %vm1469_vm12, %v3812_v27, %v3813_v17 }
 0x3b4   : > { %v3816_v24 = vpop.permute.xlu1 %3815 }
 0x3b5   : > { %v3821_v23 = vpop.permute.xlu0 %3820  ;;  %v3818_v15 = vunpack.i.h.bf16 %v3816_v24  ;;  %v3817_v11 = vunpack.i.l.bf16 %v3816_v24 }
 0x3b6   : > { %v3823_v25 = vunpack.i.h.bf16 %v3821_v23  ;;  %v3822_v19 = vunpack.i.l.bf16 %v3821_v23 }
 0x3b7   : > { %v1471_v58 = vsel %vm1469_vm12, %v3813_v17, %v3817_v11  ;;  %v1472_v10 = vsel %vm1469_vm12, %v3817_v11, %v3818_v15  ;;  %vm3207_vm12 = vcmask 916480  }
 0x3b8   : > { %v3826_v30 = vpop.permute.xlu1 %3825  ;;  %v1488_v22 = vsel %vm739_vm6, %v3822_v19, %v3823_v25 }
 0x3b9   : > { %v3828_v1 = vunpack.i.h.bf16 %v3826_v30  ;;  %v3827_v4 = vunpack.i.l.bf16 %v3826_v30  ;;  %v3831_v5 = vpop.permute.xlu0 %3830  ;;  %v3663_v41 = vpack.c.bf16 %v1488_v22, %v1470_v21 }
 0x3ba   : > { %v3833_v34 = vunpack.i.h.bf16 %v3831_v5  ;;  %v3832_v36 = vunpack.i.l.bf16 %v3831_v5 }
 0x3bb   : > { %v1490_v54 = vsel %vm739_vm6, %v3827_v4, %v3828_v1  ;;  %v1489_v59 = vsel %vm739_vm6, %v3823_v25, %v3827_v4 }
 0x3bc   : > { %v3836_v49 = vpop.permute.xlu1 %3835  ;;  %v3661_v63 = vpack.c.bf16 %v1489_v59, %v1471_v58  ;;  %v3678_v60 = vpack.c.bf16 %v1490_v54, %v1472_v10  ;;  %v1506_v24 = vsel %vm1505_vm13, %v3832_v36, %v3833_v34 }
 0x3bd   : > { %v3841_v8 = vpop.permute.xlu0 %3840  ;;  %v3838_v31 = vunpack.i.h.bf16 %v3836_v49  ;;  %v3837_v32 = vunpack.i.l.bf16 %v3836_v49 }
 0x3be   : > { %v3843_v61 = vunpack.i.h.bf16 %v3841_v8  ;;  %v3842_v37 = vunpack.i.l.bf16 %v3841_v8  ;;  %3662 = vmatprep.subr.bf16.mxu0 %v3661_v63  ;;  %3679 = vmatpush3.bf16.msra.mxu1 %v3678_v60 }
 0x3bf   : > { %3664 = vmatpush1.bf16.msra.mxu0 %v3663_v41  ;;  %3680 = vmatprep.subr.bf16.mxu1 %v4278_v47  ;;  %v1507_v48 = vsel %vm1505_vm13, %v3833_v34, %v3837_v32  ;;  %v1508_v55 = vsel %vm1505_vm13, %v3837_v32, %v3838_v31  ;;  %vm2687_vm13 = vcmask 261120  }
 0x3c0   : > { %v3846_v46 = vpop.permute.xlu1 %3845  ;;  %v1524_v16 = vsel %vm1087_vm9, %v3842_v37, %v3843_v61 }
 0x3c1   : > { %v3848_v35 = vunpack.i.h.bf16 %v3846_v46  ;;  %v3847_v50 = vunpack.i.l.bf16 %v3846_v46  ;;  %v3851_v44 = vpop.permute.xlu0 %3850  ;;  %v3667_v25 = vpack.c.bf16 %v1524_v16, %v1506_v24 }
 0x3c2   : > { %v3853_v27 = vunpack.i.h.bf16 %v3851_v44  ;;  %v3852_v30 = vunpack.i.l.bf16 %v3851_v44 }
 0x3c3   : > { %v1526_v12 = vsel %vm1087_vm9, %v3847_v50, %v3848_v35  ;;  %v1525_v9 = vsel %vm1087_vm9, %v3843_v61, %v3847_v50  ;;  %vm2925_vm9 = vcmask 1022976  }
 0x3c4   : > { %v3856_v14 = vpop.permute.xlu1 %3855  ;;  %v3665_v38 = vpack.c.bf16 %v1525_v9, %v1507_v48  ;;  %v3681_v3 = vpack.c.bf16 %v1526_v12, %v1508_v55  ;;  %v1542_v63 = vsel %vm892_vm8, %v3852_v30, %v3853_v27  ;;  %v3787_v30 = vunpack.i.l.bf16 %v5179_v33 }
 0x3c5   : > { %v3861_v23 = vpop.permute.xlu0 %3860  ;;  %v3858_v11 = vunpack.i.h.bf16 %v3856_v14  ;;  %v3857_v17 = vunpack.i.l.bf16 %v3856_v14 }
 0x3c6   : > { %v3863_v19 = vunpack.i.h.bf16 %v3861_v23  ;;  %v3862_v15 = vunpack.i.l.bf16 %v3861_v23  ;;  %3666 = vmatprep.subr.bf16.mxu0 %v3665_v38  ;;  %3682 = vmatpush3.bf16.msra.mxu1 %v3681_v3 }
 0x3c7   : > { %3668 = vmatpush1.bf16.msra.mxu0 %v3667_v25  ;;  %3683 = vmatprep.subr.bf16.mxu1 %v4278_v47  ;;  %v1544_v58 = vsel %vm892_vm8, %v3857_v17, %v3858_v11  ;;  %v1543_v10 = vsel %vm892_vm8, %v3853_v27, %v3857_v17  ;;  %v3788_v27 = vunpack.i.h.bf16 %v5179_v33 }
 0x3c8   : > { %v3866_v1 = vpop.permute.xlu1 %3865  ;;  %v1560_v54 = vsel %vm1283_vm11, %v3862_v15, %v3863_v19 }
 0x3c9   : > { %v3868_v4 = vunpack.i.h.bf16 %v3866_v1  ;;  %v3867_v5 = vunpack.i.l.bf16 %v3866_v1  ;;  %v3871_v22 = vpop.permute.xlu0 %3870  ;;  %v3671_v61 = vpack.c.bf16 %v1560_v54, %v1542_v63  ;;  %v3792_v1 = vunpack.i.l.bf16 %v5181_v42 }
 0x3ca   : > { %v3873_v34 = vunpack.i.h.bf16 %v3871_v22  ;;  %v3872_v36 = vunpack.i.l.bf16 %v3871_v22  ;;  %v1970_v22 = vsel %vm1969_vm3, %v3787_v30, %v3788_v27  ;;  %v3793_v54 = vunpack.i.h.bf16 %v5181_v42 }
 0x3cb   : > { %v1562_v59 = vsel %vm1283_vm11, %v3867_v5, %v3868_v4  ;;  %v1561_v49 = vsel %vm1283_vm11, %v3863_v19, %v3867_v5  ;;  %v3807_v30 = vunpack.i.l.bf16 %v5187_v2  ;;  %vm3022_vm11 = vcmask 998400  }
 0x3cc   : > { %v3876_v60 = vpop.permute.xlu1 %3875  ;;  %v3669_v21 = vpack.c.bf16 %v1561_v49, %v1543_v10  ;;  %v3684_v8 = vpack.c.bf16 %v1562_v59, %v1544_v58  ;;  %v7011_v49 = vld [vmem:[#allocation13_spill] sm:$0xff] }
 0x3cd   : > { %v3881_v41 = vpop.permute.xlu0 %3880  ;;  %v3877_v32 = vunpack.i.l.bf16 %v3876_v60  ;;  %v3878_v46 = vunpack.i.h.bf16 %v3876_v60  ;;  %v1998_v63 = vadd.f32 %v1970_v22, %v7011_v49  ;;  %v3798_v60 = vunpack.i.h.bf16 %v5183_v6 }
 0x3ce   : > { %v3883_v37 = vunpack.i.h.bf16 %v3881_v41  ;;  %v3882_v31 = vunpack.i.l.bf16 %v3881_v41  ;;  %3670 = vmatprep.subr.bf16.mxu0 %v3669_v21  ;;  %3685 = vmatpush3.bf16.msra.mxu1 %v3684_v8  ;;  %v3797_v21 = vunpack.i.l.bf16 %v5183_v6  ;;  %v1972_v8 = vsel %vm1969_vm3, %v3792_v1, %v3793_v54  ;;  %v7012_v41 = vld [vmem:[#allocation11_spill] sm:$0xff] }
 0x3cf   : > { %3672 = vmatpush1.bf16.msra.mxu0 %v3671_v61  ;;  %3686 = vmatprep.subr.bf16.mxu1 %v4278_v47  ;;  %v1579_v9 = vsel %vm1577_vm15, %v3873_v34, %v3877_v32  ;;  %v1580_v3 = vsel %vm1577_vm15, %v3877_v32, %v3878_v46  ;;  %v1578_v47 = vsel %vm1577_vm15, %v3872_v36, %v3873_v34  ;;  %vm3289_vm15 = vcmask 171008  }
 0x3d0   : > { %v3891_v35 = vpop.permute.xlu1 %3890  ;;  %v1596_v16 = vsel %vm1595_vm14, %v3882_v31, %v3883_v37  ;;  %v3802_v31 = vunpack.i.l.bf16 %v5185_v7 }
 0x3d1   : > { %v3893_v50 = vunpack.i.h.bf16 %v3891_v35  ;;  %v3892_v44 = vunpack.i.l.bf16 %v3891_v35  ;;  %v5209_v12 = vpop.permute.xlu0 %3885  ;;  %v3675_v23 = vpack.c.bf16 %v1596_v16, %v1578_v47 }
 0x3d3   : > { %v1598_v48 = vsel %vm1595_vm14, %v3892_v44, %v3893_v50  ;;  %v1597_v55 = vsel %vm1595_vm14, %v3883_v37, %v3892_v44  ;;  %v7015_v44 = vld [vmem:[#allocation12_spill] sm:$0xff] }
 0x3d4   : > { %v1608_v14 = vpop.permute.xlu1 %1607  ;;  %v3673_v38 = vpack.c.bf16 %v1597_v55, %v1579_v9  ;;  %v3687_v24 = vpack.c.bf16 %v1598_v48, %v1580_v3  ;;  %v2000_v16 = vadd.f32 %v1972_v8, %v7015_v44  ;;  %v1973_v48 = vsel %vm1969_vm3, %v3797_v21, %v3798_v60  ;;  %v7016_v9 = vld [vmem:[#allocation10_spill] sm:$0xff] }
 0x3d5   : > { %v1615_v25 = vsel %vm1613_vm1, %v1608_v14, %v5191_v13  ;;  %v5214_v19 = vpop.permute.xlu0 %3900  ;;  %v1614_v17 = vsel %vm1613_vm1, %v5189_v26, %v1608_v14  ;;  %v2001_v55 = vadd.f32 %v3793_v54, %v7016_v9  ;;  %v3803_v14 = vunpack.i.h.bf16 %v5185_v7  ;;  %v7024_v8 = vld [vmem:[#allocation14_spill] sm:$0xff] }
 0x3d6   : > { %3674 = vmatprep.subr.bf16.mxu0 %v3673_v38  ;;  %3688 = vmatpush3.bf16.msra.mxu1 %v3687_v24  ;;  %v1974_v38 = vsel %vm1969_vm3, %v3798_v60, %v3802_v31  ;;  %v3887_v54 = vunpack.i.l.bf16 %v5209_v12 }
 0x3d7   : > { %3676 = vmatpush1.bf16.msra.mxu0 %v3675_v23  ;;  %3656 = vmatprep.subr.mxu1 %v4281_v45  ;;  %v2413_v45 = vld [vmem:[#allocation2 + $0x98] sm:$0xff] }
 0x3d8   : > { %v1612_v15 = vpop.permute.xlu1 %1611  ;;  %1671 = vmatprep.subr.mxu0 %v1615_v25 }
 0x3d9   : > { %v1616_v11 = vsel %vm1613_vm1, %v5191_v13, %v1612_v15  ;;  %v3911_v5 = vpop.permute.xlu0 %3910  ;;  %v1971_v13 = vsel %vm1969_vm3, %v3788_v27, %v3792_v1  ;;  %v7019_v15 = vld [vmem:[#allocation19_spill] sm:$0xff]  ;;  %v3808_v27 = vunpack.i.h.bf16 %v5187_v2  ;;  %v1975_v1 = vsel %vm1969_vm3, %v3802_v31, %v3803_v14 }
 0x3da   : > { %3657 = vmatpush3.msra.mxu1 %v1616_v11  ;;  %v5227_v26 = vunpack.i.h.bf16 %v3911_v5  ;;  %v3912_v59 = vunpack.i.l.bf16 %v3911_v5  ;;  %v1999_v61 = vadd.f32 %v1971_v13, %v7012_v41  ;;  %v2002_v11 = vadd.f32 %v1973_v48, %v7019_v15  ;;  %v7020_v5 = vld [vmem:[#allocation16_spill] sm:$0xff] }
 0x3db   : > { %1672 = vmatpush1.msra.mxu0 %v1614_v17  ;;  %v2003_v22 = vadd.f32 %v1974_v38, %v7020_v5  ;;  %v1976_v21 = vsel %vm1969_vm3, %v3807_v30, %v3808_v27  ;;  %v3888_v31 = vunpack.i.h.bf16 %v5209_v12  ;;  %vm2769_vm1 = vcmask 375808  }
 0x3dc   : > { %v5222_v4 = vpop.permute.xlu1 %3895  ;;  %v5246_v6 = vsel %vm2046_vm2, %v3912_v59, %v5227_v26  ;;  %v5269_v25 = vadd.f32 %v5227_v26, %v2001_v55  ;;  %v7027_v55 = vld [vmem:[#allocation23_spill] sm:$0xff] }
 0x3dd   : > { %v3921_v36 = vpop.permute.xlu0 %3920  ;;  %v5261_v47 = vadd.f32 %v5246_v6, %v2000_v16  ;;  %v3897_v30 = vunpack.i.l.bf16 %v5222_v4 }
 0x3de   : > { %v3922_v3 = vunpack.i.l.bf16 %v3921_v36  ;;  %v5263_v24 = vunpack.i.h.bf16 %v3921_v36  ;;  %7018 = vst [vmem:[#allocation22_spill] sm:$0xff] %v5269_v25 }
 0x3df   : > { %7017 = vst [vmem:[#allocation17_spill] sm:$0xff] %v5261_v47 }
 0x3e0   : > { %v3906_v58 = vpop.permute.xlu1 %3905 }
 0x3e1   : > { %v3908_v10 = vunpack.i.h.bf16 %v3906_v58  ;;  %v3907_v33 = vunpack.i.l.bf16 %v3906_v58  ;;  %v5289_v58 = vsel %vm2046_vm2, %v3922_v3, %v5263_v24 }
 0x3e3   : > { %v5235_v42 = vsel %vm2046_vm2, %v3907_v33, %v3908_v10  ;;  %v5238_v37 = vsel %vm2046_vm2, %v3908_v10, %v3912_v59  ;;  %v3931_v59 = vpop.permute.xlu0 %3930 }
 0x3e4   : > { %v3916_v32 = vpop.permute.xlu1 %3915  ;;  %v5242_v34 = vadd.f32 %v5235_v42, %v1998_v63  ;;  %v5249_v50 = vadd.f32 %v5238_v37, %v1999_v61  ;;  %v7023_v63 = vld [vmem:[#allocation18_spill] sm:$0xff]  ;;  %v2005_v61 = vadd.f32 %v3803_v14, %v7024_v8  ;;  %v3932_v36 = vunpack.i.l.bf16 %v3931_v59 }
 0x3e5   : > { %v3918_v46 = vunpack.i.h.bf16 %v3916_v32  ;;  %v3917_v35 = vunpack.i.l.bf16 %v3916_v32  ;;  %v2004_v60 = vadd.f32 %v1975_v1, %v7023_v63  ;;  %v1977_v32 = vsel %vm1969_vm3, %v3808_v27, %v3887_v54 }
 0x3e6   : > { %7013 = vst [vmem:[#allocation15_spill] sm:$0xff] %v5242_v34  ;;  %7014 = vst [vmem:[#allocation20_spill] sm:$0xff] %v5249_v50  ;;  %2107 = vrot.lane.b32.xlu1 %v5242_v34, %s4271_s15  ;;  %2109 = vrot.lane.b32.xlu0 %v5249_v50, %s4271_s15  ;;  %v5312_v48 = vadd.f32 %v5263_v24, %v2005_v61  ;;  %v2006_v14 = vadd.f32 %v1976_v21, %v7027_v55  ;;  %v3898_v27 = vunpack.i.h.bf16 %v5222_v4 }
 0x3e7   : > { %v5266_v23 = vsel %vm2046_vm2, %v3917_v35, %v3918_v46  ;;  %v5273_v7 = vsel %vm2046_vm2, %v3918_v46, %v3922_v3  ;;  %v5304_v46 = vadd.f32 %v5289_v58, %v2004_v60  ;;  %v5306_v35 = vunpack.i.h.bf16 %v3931_v59  ;;  %v3941_v59 = vpop.permute.xlu0 %3940 }
 0x3e8   : > { %v3926_v17 = vpop.permute.xlu1 %3925  ;;  %v5285_v13 = vadd.f32 %v5266_v23, %v2002_v11  ;;  %v5292_v2 = vadd.f32 %v5273_v7, %v2003_v22  ;;  %7026 = vst [vmem:[#allocation37_spill] sm:$0xff] %v5312_v48  ;;  %v1978_v3 = vsel %vm1969_vm3, %v3887_v54, %v3888_v31  ;;  %v7028_v11 = vld [vmem:[#allocation21_spill] sm:$0xff]  ;;  %v3902_v4 = vunpack.i.l.bf16 %v5214_v19 }
 0x3e9   : > { %v3928_v10 = vunpack.i.h.bf16 %v3926_v17  ;;  %v3927_v33 = vunpack.i.l.bf16 %v3926_v17  ;;  %7025 = vst [vmem:[#allocation36_spill] sm:$0xff] %v5304_v46  ;;  %v2007_v17 = vadd.f32 %v1977_v32, %v7028_v11  ;;  %v5331_v22 = vsel %vm2046_vm2, %v3932_v36, %v5306_v35 }
 0x3ea   : > { %2111 = vrot.lane.b32.xlu1 %v5261_v47, %s4271_s15  ;;  %2113 = vrot.lane.b32.xlu0 %v5269_v25, %s4271_s15  ;;  %7021 = vst [vmem:[#allocation24_spill] sm:$0xff] %v5285_v13  ;;  %7022 = vst [vmem:[#allocation35_spill] sm:$0xff] %v5292_v2  ;;  %v2008_v60 = vadd.f32 %v1978_v3, %v5136_v39  ;;  %v2009_v21 = vadd.f32 %v3888_v31, %v5138_v40  ;;  %v3903_v61 = vunpack.i.h.bf16 %v5214_v19 }
 0x3eb   : > { %v5309_v16 = vsel %vm2046_vm2, %v3927_v33, %v3928_v10  ;;  %v5316_v12 = vsel %vm2046_vm2, %v3928_v10, %v3932_v36  ;;  %v1979_v32 = vsel %vm1969_vm3, %v3897_v30, %v3898_v27  ;;  %v1980_v36 = vsel %vm1969_vm3, %v3898_v27, %v3902_v4 }
 0x3ec   : > { %v3936_v38 = vpop.permute.xlu1 %3935  ;;  %v5327_v1 = vadd.f32 %v5309_v16, %v2006_v14  ;;  %v5334_v54 = vadd.f32 %v5316_v12, %v2007_v17  ;;  %v3942_v14 = vunpack.i.l.bf16 %v3941_v59  ;;  %v5349_v3 = vunpack.i.h.bf16 %v3941_v59 }
 0x3ed   : > { %v3938_v10 = vunpack.i.h.bf16 %v3936_v38  ;;  %v3937_v33 = vunpack.i.l.bf16 %v3936_v38  ;;  %v5347_v38 = vadd.f32 %v5331_v22, %v2008_v60  ;;  %v5355_v31 = vadd.f32 %v5306_v35, %v2009_v21 }
 0x3ee   : > { %2115 = vrot.lane.b32.xlu1 %v5285_v13, %s4271_s15  ;;  %2117 = vrot.lane.b32.xlu0 %v5292_v2, %s4271_s15  ;;  %7029 = vst [vmem:[#allocation38_spill] sm:$0xff] %v5327_v1  ;;  %7030 = vst [vmem:[#allocation39_spill] sm:$0xff] %v5334_v54  ;;  %v2010_v19 = vadd.f32 %v1979_v32, %v5159_v18  ;;  %v1981_v27 = vsel %vm1969_vm3, %v3902_v4, %v3903_v61  ;;  %v1623_v4 = vld [vmem:[%s6816_s2] sm:$0xf] }
 0x3ef   : > { %7031 = vst [vmem:[#allocation40_spill] sm:$0xff] %v5347_v38  ;;  %v5352_v17 = vsel %vm2046_vm2, %v3937_v33, %v3938_v10  ;;  %7032 = vst [vmem:[#allocation41_spill] sm:$0xff] %v5355_v31  ;;  %v5359_v30 = vsel %vm2046_vm2, %v3938_v10, %v3942_v14  ;;  %v2011_v60 = vadd.f32 %v1980_v36, %v5157_v53  ;;  %3659 = vmatmul.mubr.msk.f32.vlgmr.msra.gmra.mrb[12].mxu1 %vm1651_vm4, %v1623_v4 }
 0x3f0   : > { %v5368_v59 = vadd.f32 %v5352_v17, %v2010_v19  ;;  %v5372_v33 = vsel %vm2046_vm2, %v3942_v14, %v5349_v3  ;;  %v2012_v21 = vadd.f32 %v1981_v27, %v5149_v51  ;;  %v2013_v32 = vadd.f32 %v3903_v61, %v5142_v52  ;;  %3624 = vmatmul.mubr.msk.f32.vlgmr.msra.gmra.mrb[12].mxu0 %vm1651_vm4, %v1623_v4  ;;  %v2412_v61 = vld [vmem:[#allocation2 + $0x70] sm:$0xff] }
 0x3f1   : > { %v5375_v10 = vadd.f32 %v5359_v30, %v2011_v60  ;;  %v5425_v19 = vunpack.c.l.bf16 %v2413_v45  ;;  %v5427_v27 = vunpack.c.h.bf16 %v2413_v45  ;;  %v5429_v60 = vunpack.c.l.bf16 %v2412_v61 }
 0x3f2   : > { %2119 = vrot.lane.b32.xlu1 %v5304_v46, %s4271_s15  ;;  %2121 = vrot.lane.b32.xlu0 %v5312_v48, %s4271_s15  ;;  %7033 = vst [vmem:[#allocation42_spill] sm:$0xff] %v5368_v59  ;;  %v5388_v36 = vadd.f32 %v5372_v33, %v2012_v21  ;;  %v5391_v14 = vadd.f32 %v5349_v3, %v2013_v32  ;;  %v5431_v21 = vunpack.c.h.bf16 %v2412_v61 }
 0x3f3   : > { %7034 = vst [vmem:[#allocation43_spill] sm:$0xff] %v5375_v10  ;;  %v3949_v4 = vpack.i.bf16 %v5427_v27, %v5425_v19  ;;  %v5449_v45 = vpack.i.bf16 %v7023_v63, %v7020_v5  ;;  %v5453_v61 = vpack.i.bf16 %v7019_v15, %v5429_v60 }
 0x3f4   : > { %7035 = vst [vmem:[#allocation44_spill] sm:$0xff] %v5388_v36  ;;  %7036 = vst [vmem:[#allocation45_spill] sm:$0xff] %v5391_v14  ;;  %v3944_v32 = vpack.i.bf16 %v5431_v21, %v5429_v60 }
 0x3f6   : > { %2123 = vrot.lane.b32.xlu1 %v5327_v1, %s4271_s15  ;;  %2125 = vrot.lane.b32.xlu0 %v5334_v54, %s4271_s15 }
 0x3fa   : > { %2127 = vrot.lane.b32.xlu1 %v5347_v38, %s4271_s15  ;;  %2129 = vrot.lane.b32.xlu0 %v5355_v31, %s4271_s15 }
 0x3fe   : > { %2131 = vrot.lane.b32.xlu1 %v5368_v59, %s4271_s15  ;;  %2133 = vrot.lane.b32.xlu0 %v5375_v10, %s4271_s15 }
 0x402   : > { %2135 = vrot.lane.b32.xlu1 %v5388_v36, %s4271_s15  ;;  %2137 = vrot.lane.b32.xlu0 %v5391_v14, %s4271_s15  ;;  %s4286_s15 = smov 125  }
 0x406   : > { %2183 = vrot.lane.b32.xlu1 %v5242_v34, %s4272_s28  ;;  %2185 = vrot.lane.b32.xlu0 %v5249_v50, %s4272_s28 }
 0x40a   : > { %2187 = vrot.lane.b32.xlu1 %v5261_v47, %s4272_s28  ;;  %2189 = vrot.lane.b32.xlu0 %v5269_v25, %s4272_s28 }
 0x40e   : > { %2191 = vrot.lane.b32.xlu1 %v5285_v13, %s4272_s28  ;;  %2193 = vrot.lane.b32.xlu0 %v5292_v2, %s4272_s28 }
 0x412   : > { %2195 = vrot.lane.b32.xlu1 %v5304_v46, %s4272_s28  ;;  %2197 = vrot.lane.b32.xlu0 %v5312_v48, %s4272_s28 }
 0x416   : > { %2199 = vrot.lane.b32.xlu1 %v5327_v1, %s4272_s28  ;;  %2201 = vrot.lane.b32.xlu0 %v5334_v54, %s4272_s28 }
 0x41a   : > { %2203 = vrot.lane.b32.xlu1 %v5347_v38, %s4272_s28  ;;  %2205 = vrot.lane.b32.xlu0 %v5355_v31, %s4272_s28  ;;  %v5481_v38 = vpack.i.bf16 %v5149_v51, %v5157_v53 }
 0x41e   : > { %2207 = vrot.lane.b32.xlu1 %v5368_v59, %s4272_s28  ;;  %2209 = vrot.lane.b32.xlu0 %v5375_v10, %s4272_s28 }
 0x422   : > { %2211 = vrot.lane.b32.xlu1 %v5388_v36, %s4272_s28  ;;  %2213 = vrot.lane.b32.xlu0 %v5391_v14, %s4272_s28  ;;  %v5477_v36 = vpack.i.bf16 %v5427_v27, %v5142_v52 }
 0x426   : > { %3950 = vrot.lane.b32.xlu1 %v3949_v4, %s4283_s7  ;;  %3945 = vrot.lane.b32.xlu0 %v3944_v32, %s4283_s7  ;;  %v5461_v4 = vpack.i.bf16 %v5431_v21, %v7024_v8  ;;  %v5469_v32 = vpack.i.bf16 %v5159_v18, %v5425_v19  ;;  %s3689_s7 = smul.u32 96, %s4432_s23 }
 0x428   : > { %s6737_s11 = scalar_lea.vmem [#allocation7], %s3689_s7 }
 0x42a   : > { %3960 = vrot.lane.b32.xlu1 %v7006_v57, %s4259_s8  ;;  %3955 = vrot.lane.b32.xlu0 %v7008_v29, %s4259_s8 }
 0x42e   : > { %3970 = vrot.lane.b32.xlu1 %v5449_v45, %s4259_s8  ;;  %3965 = vrot.lane.b32.xlu0 %v5453_v61, %s4259_s8 }
 0x432   : > { %3980 = vrot.lane.b32.xlu1 %v7010_v20, %s4259_s8  ;;  %3975 = vrot.lane.b32.xlu0 %v5461_v4, %s4259_s8 }
 0x436   : > { %3990 = vrot.lane.b32.xlu1 %v5469_v32, %s4259_s8  ;;  %3985 = vrot.lane.b32.xlu0 %v5146_v62, %s4259_s8 }
 0x43a   : > { %4000 = vrot.lane.b32.xlu1 %v5477_v36, %s4259_s8  ;;  %3995 = vrot.lane.b32.xlu0 %v5481_v38, %s4259_s8  ;;  %s4285_s8 = smov 32  }
 0x458   : > { %v5487_v46 = vpop.permute.xlu1 %2107  ;;  %v5489_v47 = vpop.permute.xlu0 %2109 }
 0x459   : > { %7037 = vst [vmem:[#allocation46_spill] sm:$0xff] %v5487_v46  ;;  %7038 = vst [vmem:[#allocation47_spill] sm:$0xff] %v5489_v47 }
 0x45c   : > { %v5491_v10 = vpop.permute.xlu1 %2111  ;;  %v5493_v54 = vpop.permute.xlu0 %2113 }
 0x45d   : > { %7039 = vst [vmem:[#allocation48_spill] sm:$0xff] %v5491_v10  ;;  %7040 = vst [vmem:[#allocation49_spill] sm:$0xff] %v5493_v54 }
 0x460   : > { %v5495_v2 = vpop.permute.xlu1 %2115  ;;  %v5497_v50 = vpop.permute.xlu0 %2117 }
 0x461   : > { %7041 = vst [vmem:[#allocation50_spill] sm:$0xff] %v5495_v2  ;;  %7042 = vst [vmem:[#allocation51_spill] sm:$0xff] %v5497_v50 }
 0x464   : > { %v5499_v59 = vpop.permute.xlu1 %2119  ;;  %v5501_v1 = vpop.permute.xlu0 %2121 }
 0x465   : > { %7043 = vst [vmem:[#allocation52_spill] sm:$0xff] %v5499_v59  ;;  %7044 = vst [vmem:[#allocation53_spill] sm:$0xff] %v5501_v1 }
 0x468   : > { %v5503_v14 = vpop.permute.xlu1 %2123  ;;  %v5505_v13 = vpop.permute.xlu0 %2125 }
 0x469   : > { %7045 = vst [vmem:[#allocation54_spill] sm:$0xff] %v5503_v14  ;;  %7046 = vst [vmem:[#allocation55_spill] sm:$0xff] %v5505_v13 }
 0x46c   : > { %v5507_v31 = vpop.permute.xlu1 %2127  ;;  %v5509_v34 = vpop.permute.xlu0 %2129 }
 0x46d   : > { %7047 = vst [vmem:[#allocation56_spill] sm:$0xff] %v5507_v31  ;;  %7048 = vst [vmem:[#allocation57_spill] sm:$0xff] %v5509_v34 }
 0x470   : > { %v5511_v48 = vpop.permute.xlu1 %2131  ;;  %v5513_v10 = vpop.permute.xlu0 %2133 }
 0x471   : > { %7049 = vst [vmem:[#allocation58_spill] sm:$0xff] %v5511_v48  ;;  %7050 = vst [vmem:[#allocation59_spill] sm:$0xff] %v5513_v10 }
 0x474   : > { %v5515_v46 = vpop.permute.xlu1 %2135  ;;  %v5517_v2 = vpop.permute.xlu0 %2137 }
 0x475   : > { %7051 = vst [vmem:[#allocation60_spill] sm:$0xff] %v5515_v46  ;;  %7052 = vst [vmem:[#allocation61_spill] sm:$0xff] %v5517_v2 }
 0x478   : > { %v5519_v50 = vpop.permute.xlu1 %2183  ;;  %v5521_v59 = vpop.permute.xlu0 %2185 }
 0x479   : > { %7053 = vst [vmem:[#allocation62_spill] sm:$0xff] %v5519_v50  ;;  %7054 = vst [vmem:[#allocation63_spill] sm:$0xff] %v5521_v59 }
 0x47c   : > { %v5523_v1 = vpop.permute.xlu1 %2187  ;;  %v5525_v14 = vpop.permute.xlu0 %2189 }
 0x47d   : > { %7055 = vst [vmem:[#allocation64_spill] sm:$0xff] %v5523_v1  ;;  %7056 = vst [vmem:[#allocation65_spill] sm:$0xff] %v5525_v14 }
 0x480   : > { %v5527_v13 = vpop.permute.xlu1 %2191  ;;  %v5529_v31 = vpop.permute.xlu0 %2193 }
 0x481   : > { %7057 = vst [vmem:[#allocation66_spill] sm:$0xff] %v5527_v13  ;;  %7058 = vst [vmem:[#allocation67_spill] sm:$0xff] %v5529_v31 }
 0x484   : > { %v5531_v34 = vpop.permute.xlu1 %2195  ;;  %v5533_v48 = vpop.permute.xlu0 %2197 }
 0x485   : > { %7059 = vst [vmem:[#allocation68_spill] sm:$0xff] %v5531_v34  ;;  %7060 = vst [vmem:[#allocation69_spill] sm:$0xff] %v5533_v48 }
 0x488   : > { %v5535_v10 = vpop.permute.xlu1 %2199  ;;  %v5537_v46 = vpop.permute.xlu0 %2201 }
 0x489   : > { %7061 = vst [vmem:[#allocation70_spill] sm:$0xff] %v5535_v10  ;;  %7062 = vst [vmem:[#allocation71_spill] sm:$0xff] %v5537_v46 }
 0x48c   : > { %v5539_v2 = vpop.permute.xlu1 %2203  ;;  %v5541_v50 = vpop.permute.xlu0 %2205 }
 0x48d   : > { %7063 = vst [vmem:[#allocation72_spill] sm:$0xff] %v5539_v2  ;;  %7064 = vst [vmem:[#allocation73_spill] sm:$0xff] %v5541_v50 }
 0x490   : > { %v5543_v59 = vpop.permute.xlu1 %2207  ;;  %v5545_v1 = vpop.permute.xlu0 %2209 }
 0x491   : > { %7065 = vst [vmem:[#allocation74_spill] sm:$0xff] %v5543_v59  ;;  %7066 = vst [vmem:[#allocation75_spill] sm:$0xff] %v5545_v1  ;;  %v2442_v59 = vadd.f32 %v5235_v42, %v7011_v49 }
 0x494   : > { %v5547_v47 = vpop.permute.xlu1 %2211  ;;  %v5549_v13 = vpop.permute.xlu0 %2213 }
 0x495   : > { %7067 = vst [vmem:[#allocation76_spill] sm:$0xff] %v5547_v47  ;;  %7068 = vst [vmem:[#allocation77_spill] sm:$0xff] %v5549_v13  ;;  %v2443_v47 = vadd.f32 %v5238_v37, %v7012_v41 }
 0x498   : > { %v5551_v31 = vpop.permute.xlu1 %3950  ;;  %v5553_v34 = vpop.permute.xlu0 %3945 }
 0x499   : > { %v6901_v10 = vunpack.i.l.bf16 %v5553_v34 }
 0x49b   : > { %v2430_v1 = vsel %vm2046_vm2, %v5227_v26, %v6901_v10  ;;  %v2444_v26 = vadd.f32 %v5246_v6, %v7015_v44 }
 0x49c   : > { %v3961_v48 = vpop.permute.xlu1 %3960  ;;  %v3956_v2 = vpop.permute.xlu0 %3955 }
 0x49d   : > { %v3963_v46 = vunpack.i.h.bf16 %v3961_v48  ;;  %v3962_v14 = vunpack.i.l.bf16 %v3961_v48  ;;  %v3958_v50 = vunpack.i.h.bf16 %v3956_v2  ;;  %v3957_v54 = vunpack.i.l.bf16 %v3956_v2 }
 0x49f   : > { %v2504_v13 = vsel %vm2502_vm5, %v3958_v50, %v3962_v14  ;;  %v2503_v25 = vsel %vm2502_vm5, %v3957_v54, %v3958_v50  ;;  %v2505_v48 = vsel %vm2502_vm5, %v3962_v14, %v3963_v46  ;;  %v2445_v50 = vadd.f32 %v2430_v1, %v7016_v9 }
 0x4a0   : > { %v3971_v0 = vpop.permute.xlu1 %3970  ;;  %v5567_v43 = vpop.permute.xlu0 %3965  ;;  %v5569_v2 = vadd.f32 %v2504_v13, %v2443_v47  ;;  %v5571_v42 = vadd.f32 %v2503_v25, %v2442_v59  ;;  %v5588_v54 = vadd.f32 %v2505_v48, %v2444_v26  ;;  %v2447_v47 = vadd.f32 %v5266_v23, %v7019_v15 }
 0x4a1   : > { %v3973_v56 = vunpack.i.h.bf16 %v3971_v0  ;;  %v3972_v37 = vunpack.i.l.bf16 %v3971_v0  ;;  %v3968_v28 = vunpack.i.h.bf16 %v5567_v43  ;;  %v6902_v49 = vunpack.i.l.bf16 %v5567_v43 }
 0x4a2   : > { %7069 = vst [vmem:[#allocation78_spill] sm:$0xff] %v5569_v2  ;;  %7070 = vst [vmem:[#allocation79_spill] sm:$0xff] %v5571_v42  ;;  %2577 = vrot.lane.b32.xlu1 %v5569_v2, %s4272_s28  ;;  %2575 = vrot.lane.b32.xlu0 %v5571_v42, %s4272_s28  ;;  %v7072_v48 = vunpack.i.h.bf16 %v5553_v34  ;;  %v2449_v15 = vadd.f32 %v5289_v58, %v7023_v63 }
 0x4a3   : > { %v2506_v0 = vsel %vm2502_vm5, %v3963_v46, %v6902_v49  ;;  %7071 = vst [vmem:[#allocation80_spill] sm:$0xff] %v5588_v54  ;;  %v2508_v1 = vsel %vm2502_vm5, %v3972_v37, %v3973_v56  ;;  %v2507_v59 = vsel %vm2502_vm5, %v3968_v28, %v3972_v37  ;;  %v2448_v46 = vadd.f32 %v5273_v7, %v7020_v5 }
 0x4a4   : > { %v3981_v25 = vpop.permute.xlu1 %3980  ;;  %v5586_v13 = vpop.permute.xlu0 %3975  ;;  %v5590_v6 = vadd.f32 %v2506_v0, %v2445_v50  ;;  %v2431_v28 = vsel %vm2046_vm2, %v5263_v24, %v7072_v48  ;;  %v5608_v50 = vadd.f32 %v2507_v59, %v2447_v47  ;;  %v2453_v48 = vadd.f32 %v5316_v12, %v7028_v11 }
 0x4a5   : > { %v6906_v14 = vunpack.i.h.bf16 %v5586_v13  ;;  %v3977_v10 = vunpack.i.l.bf16 %v5586_v13  ;;  %v3983_v37 = vunpack.i.h.bf16 %v3981_v25  ;;  %v5610_v0 = vadd.f32 %v2508_v1, %v2448_v46 }
 0x4a6   : > { %2579 = vrot.lane.b32.xlu0 %v5588_v54, %s4272_s28  ;;  %2581 = vrot.lane.b32.xlu1 %v5590_v6, %s4272_s28  ;;  %7073 = vst [vmem:[#allocation81_spill] sm:$0xff] %v5608_v50  ;;  %v3982_v23 = vunpack.i.l.bf16 %v3981_v25  ;;  %v2450_v5 = vadd.f32 %v2431_v28, %v7024_v8  ;;  %v2452_v46 = vadd.f32 %v5309_v16, %v7027_v55 }
 0x4a7   : > { %7074 = vst [vmem:[#allocation82_spill] sm:$0xff] %v5610_v0  ;;  %v2509_v7 = vsel %vm2502_vm5, %v3973_v56, %v3977_v10  ;;  %v2510_v49 = vsel %vm2502_vm5, %v3977_v10, %v6906_v14  ;;  %v3952_v56 = vunpack.i.l.bf16 %v5551_v31 }
 0x4a8   : > { %v3986_v26 = vpop.permute.xlu0 %3985  ;;  %v5619_v24 = vpop.permute.xlu1 %3990  ;;  %v5626_v47 = vadd.f32 %v2509_v7, %v2449_v15  ;;  %v5628_v25 = vadd.f32 %v2510_v49, %v2450_v5  ;;  %v2511_v10 = vsel %vm2502_vm5, %v3982_v23, %v3983_v37  ;;  %v2454_v23 = vadd.f32 %v5331_v22, %v5136_v39 }
 0x4a9   : > { %v3987_v42 = vunpack.i.l.bf16 %v3986_v26  ;;  %v3992_v58 = vunpack.i.l.bf16 %v5619_v24  ;;  %v3988_v1 = vunpack.i.h.bf16 %v3986_v26  ;;  %v2432_v49 = vsel %vm2046_vm2, %v5306_v35, %v3952_v56 }
 0x4aa   : > { %2583 = vrot.lane.b32.xlu0 %v5608_v50, %s4272_s28  ;;  %2585 = vrot.lane.b32.xlu1 %v5610_v0, %s4272_s28  ;;  %7075 = vst [vmem:[#allocation83_spill] sm:$0xff] %v5626_v47  ;;  %v5645_v15 = vadd.f32 %v2511_v10, %v2452_v46  ;;  %v2455_v7 = vadd.f32 %v2432_v49, %v5138_v40  ;;  %v3953_v35 = vunpack.i.h.bf16 %v5551_v31  ;;  %v3993_v10 = vunpack.i.h.bf16 %v5619_v24 }
 0x4ab   : > { %v2512_v59 = vsel %vm2502_vm5, %v3983_v37, %v3987_v42  ;;  %v2514_v16 = vsel %vm2502_vm5, %v3988_v1, %v3992_v58  ;;  %v2513_v12 = vsel %vm2502_vm5, %v3987_v42, %v3988_v1  ;;  %v2458_v49 = vadd.f32 %v5359_v30, %v5157_v53 }
 0x4ac   : > { %v3996_v28 = vpop.permute.xlu0 %3995  ;;  %7076 = vst [vmem:[#allocation84_spill] sm:$0xff] %v5645_v15  ;;  %v5647_v5 = vadd.f32 %v2512_v59, %v2453_v48  ;;  %v4001_v14 = vpop.permute.xlu1 %4000  ;;  %v5662_v59 = vadd.f32 %v2513_v12, %v2454_v23  ;;  %v5664_v42 = vadd.f32 %v2514_v16, %v2455_v7  ;;  %v2433_v16 = vsel %vm2046_vm2, %v5349_v3, %v3953_v35 }
 0x4ad   : > { %v3998_v37 = vunpack.i.h.bf16 %v3996_v28  ;;  %v3997_v26 = vunpack.i.l.bf16 %v3996_v28  ;;  %v4003_v1 = vunpack.i.h.bf16 %v4001_v14  ;;  %v4002_v46 = vunpack.i.l.bf16 %v4001_v14 }
 0x4ae   : > { %2587 = vrot.lane.b32.xlu0 %v5626_v47, %s4272_s28  ;;  %2589 = vrot.lane.b32.xlu1 %v5628_v25, %s4272_s28  ;;  %7077 = vst [vmem:[#allocation85_spill] sm:$0xff] %v5647_v5  ;;  %7078 = vst [vmem:[#allocation86_spill] sm:$0xff] %v5662_v59  ;;  %v2457_v28 = vadd.f32 %v5352_v17, %v5159_v18  ;;  %v2459_v30 = vadd.f32 %v5372_v33, %v5149_v51  ;;  %v7084_v33 = vunpack.i.l.bf16 %v5553_v34 }
 0x4af   : > { %7079 = vst [vmem:[#allocation87_spill] sm:$0xff] %v5664_v42  ;;  %v2515_v22 = vsel %vm2502_vm5, %v3993_v10, %v3997_v26  ;;  %v2516_v48 = vsel %vm2502_vm5, %v3997_v26, %v3998_v37  ;;  %v2518_v26 = vsel %vm2502_vm5, %v4002_v46, %v4003_v1  ;;  %v2517_v17 = vsel %vm2502_vm5, %v3998_v37, %v4002_v46 }
 0x4b0   : > { %v5678_v14 = vadd.f32 %v2515_v22, %v2457_v28  ;;  %v5680_v12 = vadd.f32 %v2516_v48, %v2458_v49  ;;  %v2460_v23 = vadd.f32 %v2433_v16, %v5142_v52  ;;  %v5691_v3 = vadd.f32 %v2517_v17, %v2459_v30 }
 0x4b1   : > { %v2446_v37 = vadd.f32 %v7084_v33, %v5429_v60  ;;  %v7085_v10 = vunpack.i.l.bf16 %v5567_v43  ;;  %v7086_v22 = vunpack.i.h.bf16 %v5553_v34  ;;  %v7087_v28 = vunpack.i.h.bf16 %v5586_v13 }
 0x4b2   : > { %2591 = vrot.lane.b32.xlu0 %v5645_v15, %s4272_s28  ;;  %2593 = vrot.lane.b32.xlu1 %v5647_v5, %s4272_s28  ;;  %7080 = vst [vmem:[#allocation88_spill] sm:$0xff] %v5678_v14  ;;  %7081 = vst [vmem:[#allocation89_spill] sm:$0xff] %v5680_v12  ;;  %v5693_v7 = vadd.f32 %v2518_v26, %v2460_v23  ;;  %v2456_v34 = vadd.f32 %v3952_v56, %v5425_v19 }
 0x4b3   : > { %7082 = vst [vmem:[#allocation90_spill] sm:$0xff] %v5691_v3  ;;  %v2543_v46 = vadd.f32 %v7085_v10, %v2446_v37  ;;  %v2451_v48 = vadd.f32 %v7086_v22, %v5431_v21  ;;  %v2461_v31 = vadd.f32 %v3953_v35, %v5427_v27 }
 0x4b4   : > { %7083 = vst [vmem:[#allocation91_spill] sm:$0xff] %v5693_v7  ;;  %v2553_v13 = vadd.f32 %v3992_v58, %v2456_v34 }
 0x4b5   : > { %v2548_v49 = vadd.f32 %v7087_v28, %v2451_v48  ;;  %v2558_v56 = vadd.f32 %v4003_v1, %v2461_v31 }
 0x4b6   : > { %2595 = vrot.lane.b32.xlu0 %v5662_v59, %s4272_s28  ;;  %2597 = vrot.lane.b32.xlu1 %v5664_v42, %s4272_s28 }
 0x4ba   : > { %2599 = vrot.lane.b32.xlu0 %v5678_v14, %s4272_s28  ;;  %2601 = vrot.lane.b32.xlu1 %v5680_v12, %s4272_s28 }
 0x4be   : > { %2603 = vrot.lane.b32.xlu0 %v5691_v3, %s4272_s28  ;;  %2605 = vrot.lane.b32.xlu1 %v5693_v7, %s4272_s28  ;;  %s4287_s28 = smov 122  }
 0x4c2   : > { %2655 = vrot.lane.b32.xlu0 %v5569_v2, %s4285_s8  ;;  %2657 = vrot.lane.b32.xlu1 %v5588_v54, %s4285_s8  ;;  %v5723_v43 = vpop.f32.mrb[12].mxu1 }
 0x4c3   : > { %v3660_v16 = vpop.f32.mrb[13].mxu1  ;;  %v5737_v26 = vpop.f32.mrb[12].mxu0 }
 0x4c4   : > { %v5739_v17 = vpop.f32.mrb[13].mxu0 }
 0x4c6   : > { %2659 = vrot.lane.b32.xlu0 %v5590_v6, %s4285_s8  ;;  %2661 = vrot.lane.b32.xlu1 %v2543_v46, %s4285_s8 }
 0x4ca   : > { %2663 = vrot.lane.b32.xlu0 %v5610_v0, %s4285_s8  ;;  %2665 = vrot.lane.b32.xlu1 %v5626_v47, %s4285_s8  ;;  %v1797_v0 = vsel %vm1796_vm7, %v5737_v26, -inf }
 0x4ce   : > { %2667 = vrot.lane.b32.xlu0 %v5628_v25, %s4285_s8  ;;  %2669 = vrot.lane.b32.xlu1 %v2548_v49, %s4285_s8 }
 0x4d2   : > { %2671 = vrot.lane.b32.xlu0 %v5647_v5, %s4285_s8  ;;  %2673 = vrot.lane.b32.xlu1 %v5662_v59, %s4285_s8 }
 0x4d6   : > { %2675 = vrot.lane.b32.xlu0 %v5664_v42, %s4285_s8  ;;  %2677 = vrot.lane.b32.xlu1 %v2553_v13, %s4285_s8 }
 0x4da   : > { %2679 = vrot.lane.b32.xlu0 %v5680_v12, %s4285_s8  ;;  %2681 = vrot.lane.b32.xlu1 %v5691_v3, %s4285_s8 }
 0x4de   : > { %2683 = vrot.lane.b32.xlu0 %v5693_v7, %s4285_s8  ;;  %2685 = vrot.lane.b32.xlu1 %v2558_v56, %s4285_s8  ;;  %v1811_v56 = vsel %vm1796_vm7, %v5723_v43, -inf }
 0x4df   : > { %v1812_v47 = vrot.slane %v1811_v56, 4 }
 0x4e1   : > { %v1813_v54 = vmax.f32 %v1811_v56, %v1812_v47 }
 0x4e2   : > { %4010 = vrot.lane.b32.xlu0 %v7006_v57, %s4286_s15  ;;  %4005 = vrot.lane.b32.xlu1 %v7008_v29, %s4286_s15 }
 0x4e3   : > { %v1814_v5 = vrot.slane %v1813_v54, 2 }
 0x4e5   : > { %v1815_v2 = vmax.f32 %v1813_v54, %v1814_v5 }
 0x4e6   : > { %4020 = vrot.lane.b32.xlu0 %v5449_v45, %s4286_s15  ;;  %4015 = vrot.lane.b32.xlu1 %v5453_v61, %s4286_s15 }
 0x4ea   : > { %4030 = vrot.lane.b32.xlu0 %v7010_v20, %s4286_s15  ;;  %4025 = vrot.lane.b32.xlu1 %v5461_v4, %s4286_s15 }
 0x4ee   : > { %4040 = vrot.lane.b32.xlu0 %v5469_v32, %s4286_s15  ;;  %4035 = vrot.lane.b32.xlu1 %v5146_v62, %s4286_s15 }
 0x4f2   : > { %4050 = vrot.lane.b32.xlu0 %v5477_v36, %s4286_s15  ;;  %4045 = vrot.lane.b32.xlu1 %v5481_v38, %s4286_s15 }
 0x4f6   : > { %4060 = vrot.lane.b32.xlu0 %v7006_v57, %s4287_s28  ;;  %4055 = vrot.lane.b32.xlu1 %v7008_v29, %s4287_s28 }
 0x4fa   : > { %4070 = vrot.lane.b32.xlu0 %v5449_v45, %s4287_s28  ;;  %4065 = vrot.lane.b32.xlu1 %v5453_v61, %s4287_s28 }
 0x4fe   : > { %4080 = vrot.lane.b32.xlu0 %v7010_v20, %s4287_s28  ;;  %4075 = vrot.lane.b32.xlu1 %v5461_v4, %s4287_s28 }
 0x502   : > { %4090 = vrot.lane.b32.xlu0 %v5469_v32, %s4287_s28  ;;  %4085 = vrot.lane.b32.xlu1 %v5146_v62, %s4287_s28 }
 0x506   : > { %4100 = vrot.lane.b32.xlu0 %v5477_v36, %s4287_s28  ;;  %4095 = vrot.lane.b32.xlu1 %v5481_v38, %s4287_s28 }
 0x514   : > { %v5769_v24 = vpop.permute.xlu1 %2577  ;;  %v5771_v57 = vpop.permute.xlu0 %2575 }
 0x518   : > { %v5773_v29 = vpop.permute.xlu0 %2579  ;;  %v5775_v45 = vpop.permute.xlu1 %2581 }
 0x519   : > { %7088 = vst [vmem:[#allocation92_spill] sm:$0xff] %v5773_v29  ;;  %v1816_v29 = vrot.slane %v1815_v2, 1 }
 0x51c   : > { %v5777_v61 = vpop.permute.xlu0 %2583  ;;  %v5779_v20 = vpop.permute.xlu1 %2585 }
 0x51d   : > { %7089 = vst [vmem:[#allocation93_spill] sm:$0xff] %v5777_v61  ;;  %7090 = vst [vmem:[#allocation94_spill] sm:$0xff] %v5779_v20 }
 0x520   : > { %v5781_v4 = vpop.permute.xlu0 %2587  ;;  %v5783_v32 = vpop.permute.xlu1 %2589 }
 0x521   : > { %7091 = vst [vmem:[#allocation95_spill] sm:$0xff] %v5781_v4  ;;  %v1798_v4 = vrot.slane %v1797_v0, 4 }
 0x523   : > { %v1799_v56 = vmax.f32 %v1797_v0, %v1798_v4 }
 0x524   : > { %v5785_v62 = vpop.permute.xlu0 %2591  ;;  %v5787_v36 = vpop.permute.xlu1 %2593 }
 0x525   : > { %7092 = vst [vmem:[#allocation96_spill] sm:$0xff] %v5785_v62  ;;  %7093 = vst [vmem:[#allocation97_spill] sm:$0xff] %v5787_v36 }
 0x528   : > { %v5789_v38 = vpop.permute.xlu0 %2595  ;;  %v5791_v58 = vpop.permute.xlu1 %2597 }
 0x529   : > { %7094 = vst [vmem:[#allocation98_spill] sm:$0xff] %v5789_v38  ;;  %7095 = vst [vmem:[#allocation99_spill] sm:$0xff] %v5791_v58 }
 0x52c   : > { %v5793_v35 = vpop.permute.xlu0 %2599  ;;  %v5795_v1 = vpop.permute.xlu1 %2601 }
 0x52d   : > { %7096 = vst [vmem:[#allocation100_spill] sm:$0xff] %v5793_v35  ;;  %7097 = vst [vmem:[#allocation101_spill] sm:$0xff] %v5795_v1  ;;  %v1800_v35 = vrot.slane %v1799_v56, 2  ;;  %v1817_v1 = vmax.f32 %v1815_v2, %v1816_v29 }
 0x52f   : > { %v1801_v36 = vmax.f32 %v1799_v56, %v1800_v35  ;;  %v1820_v50 = vsub.f32 %v5723_v43, %v1817_v1 }
 0x530   : > { %v5797_v30 = vpop.permute.xlu0 %2603  ;;  %v5799_v23 = vpop.permute.xlu1 %2605 }
 0x531   : > { %7098 = vst [vmem:[#allocation102_spill] sm:$0xff] %v5797_v30  ;;  %7099 = vst [vmem:[#allocation103_spill] sm:$0xff] %v5799_v23  ;;  %v1802_v2 = vrot.slane %v1801_v36, 1 }
 0x533   : > { %v1803_v42 = vmax.f32 %v1801_v36, %v1802_v2 }
 0x534   : > { %v5801_v33 = vpop.permute.xlu0 %2655  ;;  %v5803_v37 = vpop.permute.xlu1 %2657 }
 0x535   : > { %7100 = vst [vmem:[#allocation104_spill] sm:$0xff] %v5801_v33  ;;  %7101 = vst [vmem:[#allocation105_spill] sm:$0xff] %v5803_v37 }
 0x538   : > { %v5805_v10 = vpop.permute.xlu0 %2659  ;;  %v5807_v46 = vpop.permute.xlu1 %2661 }
 0x539   : > { %7102 = vst [vmem:[#allocation106_spill] sm:$0xff] %v5805_v10 }
 0x53c   : > { %v5809_v22 = vpop.permute.xlu0 %2663  ;;  %v5811_v48 = vpop.permute.xlu1 %2665 }
 0x53d   : > { %7103 = vst [vmem:[#allocation107_spill] sm:$0xff] %v5809_v22  ;;  %7104 = vst [vmem:[#allocation108_spill] sm:$0xff] %v5811_v48  ;;  %v1804_v48 = vsel %vm1796_vm7, %v5739_v17, -inf }
 0x53e   : > { %v1805_v47 = vrot.slane %v1804_v48, 4 }
 0x540   : > { %v5813_v28 = vpop.permute.xlu0 %2667  ;;  %v5815_v49 = vpop.permute.xlu1 %2669 }
 0x544   : > { %v5817_v34 = vpop.permute.xlu0 %2671  ;;  %v5819_v16 = vpop.permute.xlu1 %2673 }
 0x545   : > { %7105 = vst [vmem:[#allocation109_spill] sm:$0xff] %v5817_v34  ;;  %7106 = vst [vmem:[#allocation110_spill] sm:$0xff] %v5819_v16  ;;  %v1806_v34 = vmax.f32 %v1804_v48, %v1805_v47  ;;  %v1825_v47 = vmul.f32 1.442695, %v1820_v50 }
 0x547   : > { %v1807_v62 = vrot.slane %v1806_v34, 2  ;;  %4136 = vpow2.f32 %v1825_v47 }
 0x548   : > { %v5821_v13 = vpop.permute.xlu0 %2675  ;;  %v5823_v31 = vpop.permute.xlu1 %2677 }
 0x549   : > { %7107 = vst [vmem:[#allocation111_spill] sm:$0xff] %v5821_v13  ;;  %7108 = vst [vmem:[#allocation112_spill] sm:$0xff] %v5823_v31  ;;  %v1808_v7 = vmax.f32 %v1806_v34, %v1807_v62 }
 0x54b   : > { %v1809_v43 = vrot.slane %v1808_v7, 1 }
 0x54c   : > { %v5827_v3 = vpop.permute.xlu0 %2679  ;;  %v5829_v59 = vpop.permute.xlu1 %2681 }
 0x54d   : > { %7109 = vst [vmem:[#allocation113_spill] sm:$0xff] %v5827_v3  ;;  %7110 = vst [vmem:[#allocation114_spill] sm:$0xff] %v5829_v59 }
 0x550   : > { %v5831_v12 = vpop.permute.xlu0 %2683  ;;  %v5833_v30 = vpop.permute.xlu1 %2685 }
 0x551   : > { %7111 = vst [vmem:[#allocation115_spill] sm:$0xff] %v5831_v12  ;;  %7112 = vst [vmem:[#allocation116_spill] sm:$0xff] %v5833_v30 }
 0x554   : > { %v4011_v16 = vpop.permute.xlu0 %4010  ;;  %v4006_v38 = vpop.permute.xlu1 %4005 }
 0x555   : > { %v4012_v54 = vunpack.i.l.bf16 %v4011_v16  ;;  %v4008_v5 = vunpack.i.h.bf16 %v4006_v38  ;;  %v4007_v23 = vunpack.i.l.bf16 %v4006_v38  ;;  %v4013_v12 = vunpack.i.h.bf16 %v4011_v16 }
 0x557   : > { %v2927_v48 = vsel %vm2925_vm9, %v4008_v5, %v4012_v54  ;;  %v2926_v35 = vsel %vm2925_vm9, %v4007_v23, %v4008_v5  ;;  %v2928_v23 = vsel %vm2925_vm9, %v4012_v54, %v4013_v12  ;;  %v7113_v5 = vld [vmem:[#allocation13_spill] sm:$0xff] }
 0x558   : > { %v5839_v37 = vpop.permute.xlu0 %4020  ;;  %v5841_v59 = vpop.permute.xlu1 %4015  ;;  %v2963_v58 = vadd.f32 %v2927_v48, %v7012_v41  ;;  %v2962_v31 = vadd.f32 %v2926_v35, %v7113_v5 }
 0x559   : > { %v6940_v29 = vunpack.i.l.bf16 %v5841_v59  ;;  %v4023_v38 = vunpack.i.h.bf16 %v5839_v37  ;;  %v4022_v62 = vunpack.i.l.bf16 %v5839_v37  ;;  %v4018_v36 = vunpack.i.h.bf16 %v5841_v59 }
 0x55b   : > { %v2929_v50 = vsel %vm2925_vm9, %v4013_v12, %v6940_v29 }
 0x55c   : > { %v5843_v3 = vpop.permute.xlu0 %4030  ;;  %v5845_v14 = vpop.permute.xlu1 %4025  ;;  %v2965_v29 = vadd.f32 %v2929_v50, %v7016_v9  ;;  %v1818_v50 = vsub.f32 %v5737_v26, %v1803_v42  ;;  %v1810_v26 = vmax.f32 %v1808_v7, %v1809_v43 }
 0x55d   : > { %v4033_v47 = vunpack.i.h.bf16 %v5843_v3  ;;  %v4032_v7 = vunpack.i.l.bf16 %v5843_v3 }
 0x55e   : > { %v1821_v9 = vmul.f32 1.442695, %v1818_v50 }
 0x560   : > { %v5847_v15 = vpop.permute.xlu0 %4040  ;;  %v5849_v22 = vpop.permute.xlu1 %4035  ;;  %4138 = vpow2.f32 %v1821_v9 }
 0x564   : > { %v5852_v0 = vpop.permute.xlu0 %4050  ;;  %v5854_v4 = vpop.permute.xlu1 %4045 }
 0x568   : > { %v4061_v30 = vpop.permute.xlu0 %4060  ;;  %v4056_v33 = vpop.permute.xlu1 %4055 }
 0x569   : > { %v4062_v1 = vunpack.i.l.bf16 %v4061_v30  ;;  %v4058_v56 = vunpack.i.h.bf16 %v4056_v33  ;;  %v4057_v34 = vunpack.i.l.bf16 %v4056_v33  ;;  %v4063_v16 = vunpack.i.h.bf16 %v4061_v30 }
 0x56a   : > { %v2931_v30 = vsel %vm2925_vm9, %v4022_v62, %v4023_v38 }
 0x56b   : > { %v3024_v13 = vsel %vm3022_vm11, %v4058_v56, %v4062_v1  ;;  %v3023_v61 = vsel %vm3022_vm11, %v4057_v34, %v4058_v56  ;;  %v2964_v34 = vadd.f32 %v2928_v23, %v7015_v44  ;;  %v7115_v23 = vld [vmem:[#allocation16_spill] sm:$0xff]  ;;  %v7117_v44 = vld [vmem:[#allocation19_spill] sm:$0xff] }
 0x56c   : > { %v4071_v48 = vpop.permute.xlu0 %4070  ;;  %v5869_v41 = vpop.permute.xlu1 %4065  ;;  %v5871_v20 = vadd.f32 %v3024_v13, %v2963_v58  ;;  %v5880_v54 = vadd.f32 %v3023_v61, %v2962_v31  ;;  %v4027_v58 = vunpack.i.l.bf16 %v5845_v14  ;;  %v3025_v13 = vsel %vm3022_vm11, %v4062_v1, %v4063_v16 }
 0x56d   : > { %v4073_v33 = vunpack.i.h.bf16 %v4071_v48  ;;  %v4072_v37 = vunpack.i.l.bf16 %v4071_v48  ;;  %v6942_v2 = vunpack.i.l.bf16 %v5869_v41  ;;  %v4068_v35 = vunpack.i.h.bf16 %v5869_v41 }
 0x56e   : > { %7114 = vst [vmem:[#allocation117_spill] sm:$0xff] %v5871_v20  ;;  %3097 = vrot.lane.b32.xlu0 %v5871_v20, %s4282_s16  ;;  %3095 = vrot.lane.b32.xlu1 %v5880_v54, %s4282_s16  ;;  %v2930_v1 = vsel %vm2925_vm9, %v4018_v36, %v4022_v62  ;;  %v5903_v42 = vadd.f32 %v3025_v13, %v2964_v34  ;;  %v4037_v62 = vunpack.i.l.bf16 %v5849_v22 }
 0x56f   : > { %v3026_v56 = vsel %vm3022_vm11, %v4063_v16, %v6942_v2  ;;  %v3028_v12 = vsel %vm3022_vm11, %v4072_v37, %v4073_v33  ;;  %v2968_v2 = vadd.f32 %v2931_v30, %v7115_v23  ;;  %v3027_v36 = vsel %vm3022_vm11, %v4068_v35, %v4072_v37 }
 0x570   : > { %v4081_v48 = vpop.permute.xlu0 %4080  ;;  %v5892_v61 = vpop.permute.xlu1 %4075  ;;  %v5894_v31 = vadd.f32 %v3026_v56, %v2965_v29  ;;  %v7116_v29 = vunpack.i.h.bf16 %v5845_v14  ;;  %v2967_v5 = vadd.f32 %v2930_v1, %v7117_v44  ;;  %v2932_v43 = vsel %vm2925_vm9, %v4023_v38, %v4027_v58 }
 0x571   : > { %v4077_v16 = vunpack.i.l.bf16 %v5892_v61  ;;  %v5914_v13 = vadd.f32 %v3028_v12, %v2968_v2  ;;  %v7119_v34 = vunpack.i.h.bf16 %v5892_v61  ;;  %v4038_v1 = vunpack.i.h.bf16 %v5849_v22 }
 0x572   : > { %3101 = vrot.lane.b32.xlu0 %v5894_v31, %s4282_s16  ;;  %v2933_v56 = vsel %vm2925_vm9, %v4027_v58, %v7116_v29  ;;  %3099 = vrot.lane.b32.xlu1 %v5903_v42, %s4282_s16  ;;  %v5928_v2 = vadd.f32 %v3027_v36, %v2967_v5  ;;  %v2935_v3 = vsel %vm2925_vm9, %v4033_v47, %v4037_v62  ;;  %v4083_v38 = vunpack.i.h.bf16 %v4081_v48 }
 0x573   : > { %7118 = vst [vmem:[#allocation118_spill] sm:$0xff] %v5914_v13  ;;  %v3030_v29 = vsel %vm3022_vm11, %v4077_v16, %v7119_v34  ;;  %v2970_v35 = vadd.f32 %v2933_v56, %v7024_v8  ;;  %v4082_v12 = vunpack.i.l.bf16 %v4081_v48  ;;  %v3029_v58 = vsel %vm3022_vm11, %v4073_v33, %v4077_v16 }
 0x574   : > { %v4086_v30 = vpop.permute.xlu1 %4085  ;;  %v5924_v23 = vpop.permute.xlu0 %4090  ;;  %7120 = vst [vmem:[#allocation119_spill] sm:$0xff] %v5928_v2  ;;  %v2969_v34 = vadd.f32 %v2932_v43, %v7023_v63  ;;  %v2934_v22 = vsel %vm2925_vm9, %v4032_v7, %v4033_v47  ;;  %v1819_v36 = vsub.f32 %v5739_v17, %v1810_v26  ;;  %v2973_v48 = vadd.f32 %v2935_v3, %v7028_v11 }
 0x575   : > { %v4087_v37 = vunpack.i.l.bf16 %v4086_v30  ;;  %v5935_v56 = vadd.f32 %v3030_v29, %v2970_v35  ;;  %v6945_v50 = vunpack.i.l.bf16 %v5924_v23  ;;  %v4088_v8 = vunpack.i.h.bf16 %v4086_v30  ;;  %v5952_v29 = vpop.eup %4136 }
 0x576   : > { %3105 = vrot.lane.b32.xlu0 %v5914_v13, %s4282_s16  ;;  %3103 = vrot.lane.b32.xlu1 %v5928_v2, %s4282_s16  ;;  %v5944_v16 = vadd.f32 %v3029_v58, %v2969_v34  ;;  %v7121_v43 = vunpack.i.l.bf16 %v5847_v15  ;;  %v4048_v7 = vunpack.i.h.bf16 %v5854_v4  ;;  %v4047_v30 = vunpack.i.l.bf16 %v5854_v4  ;;  %v7174_v2 = vld [vmem:[#allocation59_spill] sm:$0xff] }
 0x577   : > { %v3032_v5 = vsel %vm3022_vm11, %v4083_v38, %v4087_v37  ;;  %v3031_v9 = vsel %vm3022_vm11, %v4082_v12, %v4083_v38  ;;  %v2972_v17 = vadd.f32 %v2934_v22, %v7027_v55  ;;  %v2936_v35 = vsel %vm2925_vm9, %v4037_v62, %v4038_v1 }
 0x578   : > { %v4096_v33 = vpop.permute.xlu1 %4095  ;;  %v2937_v47 = vsel %vm2925_vm9, %v4038_v1, %v7121_v43  ;;  %v5957_v26 = vadd.f32 %v3032_v5, %v2973_v48  ;;  %v3034_v3 = vsel %vm3022_vm11, %v4088_v8, %v6945_v50  ;;  %v1823_v4 = vmul.f32 1.442695, %v1819_v36  ;;  %v5965_v43 = vpop.permute.xlu0 %4100 }
 0x579   : > { %v4098_v58 = vunpack.i.h.bf16 %v4096_v33  ;;  %v4097_v34 = vunpack.i.l.bf16 %v4096_v33  ;;  %v4043_v38 = vunpack.i.h.bf16 %v5847_v15  ;;  %v2975_v12 = vadd.f32 %v2937_v47, %v5138_v40  ;;  %v5996_v50 = vpop.eup %4138 }
 0x57a   : > { %3109 = vrot.lane.b32.xlu0 %v5935_v56, %s4282_s16  ;;  %3107 = vrot.lane.b32.xlu1 %v5944_v16, %s4282_s16  ;;  %v5969_v22 = vadd.f32 %v3031_v9, %v2972_v17  ;;  %v4052_v1 = vunpack.i.l.bf16 %v5852_v0  ;;  %v2939_v5 = vsel %vm2925_vm9, %v4047_v30, %v4048_v7  ;;  %v3033_v48 = vsel %vm3022_vm11, %v4087_v37, %v4088_v8 }
 0x57b   : > { %v1841_v36 = vsel %vm1796_vm7, %v5952_v29, 0.0  ;;  %v2974_v33 = vadd.f32 %v2936_v35, %v5136_v39  ;;  %v2938_v47 = vsel %vm2925_vm9, %v4043_v38, %v4047_v30  ;;  %v5981_v9 = vadd.f32 %v3034_v3, %v2975_v12 }
 0x57c   : > { %7122 = vst [vmem:[#allocation120_spill] sm:$0xff] %v5969_v22  ;;  %v4093_v17 = vunpack.i.h.bf16 %v5924_v23  ;;  %v4102_v62 = vunpack.i.l.bf16 %v5965_v43  ;;  %v3036_v8 = vsel %vm3022_vm11, %v4097_v34, %v4098_v58  ;;  %v2978_v37 = vadd.f32 %v2939_v5, %v5157_v53 }
 0x57d   : > { %v5990_v35 = vadd.f32 %v3033_v48, %v2974_v33  ;;  %v1842_v30 = vrot.slane %v1841_v36, 4  ;;  %4140 = vpow2.f32 %v1823_v4  ;;  %v7123_v3 = vunpack.i.h.bf16 %v5852_v0 }
 0x57e   : > { %3113 = vrot.lane.b32.xlu0 %v5957_v26, %s4282_s16  ;;  %3111 = vrot.lane.b32.xlu1 %v5969_v22, %s4282_s16  ;;  %v3035_v12 = vsel %vm3022_vm11, %v4093_v17, %v4097_v34  ;;  %v2977_v39 = vadd.f32 %v2938_v47, %v5159_v18  ;;  %v6001_v5 = vadd.f32 %v3036_v8, %v2978_v37  ;;  %v7124_v33 = vunpack.i.h.bf16 %v5965_v43 }
 0x57f   : > { %v2941_v38 = vsel %vm2925_vm9, %v4052_v1, %v7123_v3  ;;  %v2940_v48 = vsel %vm2925_vm9, %v4048_v7, %v4052_v1  ;;  %v1843_v17 = vadd.f32 %v1842_v30, %v1841_v36  ;;  %v3037_v47 = vsel %vm3022_vm11, %v4098_v58, %v4102_v62 }
 0x580   : > { %v3038_v4 = vsel %vm3022_vm11, %v4102_v62, %v7124_v33  ;;  %v2980_v63 = vadd.f32 %v2941_v38, %v5142_v52  ;;  %v6010_v34 = vadd.f32 %v3035_v12, %v2977_v39  ;;  %v1827_v8 = vsel %vm1796_vm7, %v5996_v50, 0.0 }
 0x581   : > { %v2979_v37 = vadd.f32 %v2940_v48, %v5149_v51  ;;  %v1844_v39 = vrot.slane %v1843_v17, 2  ;;  %v1828_v3 = vrot.slane %v1827_v8, 4  ;;  %v7126_v62 = vunpack.i.l.bf16 %v5841_v59 }
 0x582   : > { %3117 = vrot.lane.b32.xlu0 %v5981_v9, %s4282_s16  ;;  %3115 = vrot.lane.b32.xlu1 %v5990_v35, %s4282_s16  ;;  %7125 = vst [vmem:[#allocation121_spill] sm:$0xff] %v6010_v34  ;;  %v6018_v7 = vadd.f32 %v3038_v4, %v2980_v63  ;;  %v7127_v12 = vunpack.i.l.bf16 %v5869_v41  ;;  %v7128_v4 = vunpack.i.h.bf16 %v5845_v14 }
 0x583   : > { %v6022_v1 = vadd.f32 %v3037_v47, %v2979_v37  ;;  %v2966_v36 = vadd.f32 %v7126_v62, %v5429_v60  ;;  %v1845_v63 = vadd.f32 %v1844_v39, %v1843_v17  ;;  %v1829_v30 = vadd.f32 %v1828_v3, %v1827_v8 }
 0x584   : > { %v2971_v17 = vadd.f32 %v7128_v4, %v5431_v21  ;;  %v7129_v37 = vunpack.i.h.bf16 %v5892_v61  ;;  %v7130_v21 = vunpack.i.l.bf16 %v5847_v15  ;;  %v7135_v4 = vld [vmem:[#allocation26_spill] sm:$0xff] }
 0x585   : > { %v3063_v48 = vadd.f32 %v7127_v12, %v2966_v36  ;;  %v1846_v33 = vrot.slane %v1845_v63, 1  ;;  %v1830_v59 = vrot.slane %v1829_v30, 2 }
 0x586   : > { %3121 = vrot.lane.b32.xlu0 %v6001_v5, %s4282_s16  ;;  %3119 = vrot.lane.b32.xlu1 %v6010_v34, %s4282_s16  ;;  %v3068_v39 = vadd.f32 %v7129_v37, %v2971_v17  ;;  %v2976_v14 = vadd.f32 %v7130_v21, %v5425_v19  ;;  %v7132_v19 = vunpack.i.h.bf16 %v5852_v0  ;;  %v7134_v0 = vld [vmem:[#allocation25_spill] sm:$0xff] }
 0x587   : > { %v6026_v58 = vpop.eup %4140  ;;  %v1847_v41 = vadd.f32 %v1846_v33, %v1845_v63  ;;  %v1831_v47 = vadd.f32 %v1830_v59, %v1829_v30  ;;  %v7131_v63 = vunpack.i.l.bf16 %v5924_v23  ;;  %v7133_v33 = vunpack.i.h.bf16 %v5965_v43  ;;  %v7136_v43 = vld [vmem:[#allocation27_spill] sm:$0xff] }
 0x588   : > { %v1834_v38 = vsel %vm1796_vm7, %v6026_v58, 0.0  ;;  %v2981_v12 = vadd.f32 %v7132_v19, %v5427_v27 }
 0x589   : > { %v1835_v60 = vrot.slane %v1834_v38, 4  ;;  %4142 = vrcp.f32 %v1847_v41  ;;  %v1832_v3 = vrot.slane %v1831_v47, 1  ;;  %v3073_v30 = vadd.f32 %v7131_v63, %v2976_v14 }
 0x58a   : > { %3125 = vrot.lane.b32.xlu0 %v6018_v7, %s4282_s16  ;;  %3123 = vrot.lane.b32.xlu1 %v6022_v1, %s4282_s16  ;;  %v3078_v59 = vadd.f32 %v7133_v33, %v2981_v12  ;;  %s4295_s16 = smov 75  }
 0x58b   : > { %v1836_v8 = vadd.f32 %v1835_v60, %v1834_v38  ;;  %v1833_v61 = vadd.f32 %v1832_v3, %v1831_v47  ;;  %v7137_v47 = vld [vmem:[#allocation28_spill] sm:$0xff] }
 0x58d   : > { %v1837_v62 = vrot.slane %v1836_v8, 2  ;;  %4144 = vrcp.f32 %v1833_v61 }
 0x58e   : > { %3177 = vrot.lane.b32.xlu0 %v5903_v42, %s4288_s12  ;;  %3175 = vrot.lane.b32.xlu1 %v5871_v20, %s4288_s12 }
 0x58f   : > { %v1838_v36 = vadd.f32 %v1837_v62, %v1836_v8 }
 0x591   : > { %v1839_v38 = vrot.slane %v1838_v36, 1 }
 0x592   : > { %3181 = vrot.lane.b32.xlu0 %v3063_v48, %s4288_s12  ;;  %3179 = vrot.lane.b32.xlu1 %v5894_v31, %s4288_s12 }
 0x593   : > { %v4143_v15 = vpop.eup %4142  ;;  %v1840_v23 = vadd.f32 %v1839_v38, %v1838_v36 }
 0x594   : > { %v1853_v48 = vmul.f32 %v4143_v15, %v5952_v29 }
 0x595   : > { %4146 = vrcp.f32 %v1840_v23 }
 0x596   : > { %3185 = vrot.lane.b32.xlu0 %v5944_v16, %s4288_s12  ;;  %3183 = vrot.lane.b32.xlu1 %v5914_v13, %s4288_s12  ;;  %v1889_v27 = vrot.slane %v1853_v48, %v7134_v0  ;;  %v2286_v17 = vrot.slane %v1853_v48, %v7135_v4  ;;  %v2759_v41 = vrot.slane %v1853_v48, %v7136_v43  ;;  %v7151_v13 = vld [vmem:[#allocation22_spill] sm:$0xff] }
 0x597   : > { %v4145_v60 = vpop.eup %4144  ;;  %v3279_v8 = vrot.slane %v1853_v48, %v7137_v47 }
 0x598   : > { %v1851_v29 = vmul.f32 %v4145_v60, %v5996_v50 }
 0x59a   : > { %3189 = vrot.lane.b32.xlu0 %v3068_v39, %s4288_s12  ;;  %3187 = vrot.lane.b32.xlu1 %v5935_v56, %s4288_s12  ;;  %v1881_v37 = vrot.slane %v1851_v29, %v7134_v0  ;;  %v2278_v3 = vrot.slane %v1851_v29, %v7135_v4  ;;  %v2751_v50 = vrot.slane %v1851_v29, %v7136_v43 }
 0x59b   : > { %v3271_v21 = vrot.slane %v1851_v29, %v7137_v47 }
 0x59e   : > { %3193 = vrot.lane.b32.xlu0 %v5990_v35, %s4288_s12  ;;  %3191 = vrot.lane.b32.xlu1 %v5957_v26, %s4288_s12 }
 0x59f   : > { %v4147_v39 = vpop.eup %4146 }
 0x5a0   : > { %v1852_v62 = vmul.f32 %v4147_v39, %v6026_v58 }
 0x5a2   : > { %3197 = vrot.lane.b32.xlu0 %v3073_v30, %s4288_s12  ;;  %3195 = vrot.lane.b32.xlu1 %v5981_v9, %s4288_s12  ;;  %v2282_v14 = vrot.slane %v1852_v62, %v7135_v4  ;;  %v1885_v61 = vrot.slane %v1852_v62, %v7134_v0  ;;  %v3275_v36 = vrot.slane %v1852_v62, %v7137_v47 }
 0x5a3   : > { %v2755_v63 = vrot.slane %v1852_v62, %v7136_v43 }
 0x5a6   : > { %3201 = vrot.lane.b32.xlu0 %v6022_v1, %s4288_s12  ;;  %3199 = vrot.lane.b32.xlu1 %v6001_v5, %s4288_s12 }
 0x5aa   : > { %3205 = vrot.lane.b32.xlu0 %v3078_v59, %s4288_s12  ;;  %3203 = vrot.lane.b32.xlu1 %v6018_v7, %s4288_s12  ;;  %s6765_s12 = scalar_lea.hbm %s6819_s5, %s3690_s29 }
 0x5ae   : > { %1897 = vrot.lane.b32.xlu0 %v1889_v27, %s4289_s9  ;;  %2294 = vrot.lane.b32.xlu1 %v2286_v17, %s4290_s10 }
 0x5b2   : > { %2767 = vrot.lane.b32.xlu0 %v2759_v41, %s4291_s13  ;;  %3287 = vrot.lane.b32.xlu1 %v3279_v8, %s4292_s17 }
 0x5b6   : > { %1893 = vrot.lane.b32.xlu0 %v1881_v37, %s4289_s9  ;;  %2290 = vrot.lane.b32.xlu1 %v2278_v3, %s4290_s10 }
 0x5ba   : > { %2763 = vrot.lane.b32.xlu0 %v2751_v50, %s4291_s13  ;;  %3283 = vrot.lane.b32.xlu1 %v3271_v21, %s4292_s17 }
 0x5be   : > { %2292 = vrot.lane.b32.xlu0 %v2282_v14, %s4290_s10  ;;  %1895 = vrot.lane.b32.xlu1 %v1885_v61, %s4289_s9  ;;  %s4296_s10 = smov [#allocation7]  }
 0x5c2   : > { %3285 = vrot.lane.b32.xlu0 %v3275_v36, %s4292_s17  ;;  %2765 = vrot.lane.b32.xlu1 %v2755_v63, %s4291_s13  ;;  %s4186_s13 = sshll.u32 %s4296_s10, 4  ;;  %s4187_s13 = int_to_ptr.vmem [resolvable:$false] %s4186_s13 }
 0x5c3   : > { %s4188_s17 = scalar_lea.vmem %s4187_s13, 3072 }
 0x5e0   : > { %v6093_v58 = vpop.permute.xlu0 %3097  ;;  %v6095_v30 = vpop.permute.xlu1 %3095 }
 0x5e4   : > { %v6097_v38 = vpop.permute.xlu0 %3101  ;;  %v6099_v15 = vpop.permute.xlu1 %3099 }
 0x5e5   : > { %7138 = vst [vmem:[#allocation25_spill] sm:$0xff] %v6099_v15 }
 0x5e8   : > { %v6101_v19 = vpop.permute.xlu0 %3105  ;;  %v6103_v12 = vpop.permute.xlu1 %3103 }
 0x5ec   : > { %v6105_v23 = vpop.permute.xlu0 %3109  ;;  %v6107_v48 = vpop.permute.xlu1 %3107 }
 0x5f0   : > { %v6109_v33 = vpop.permute.xlu0 %3113  ;;  %v6111_v59 = vpop.permute.xlu1 %3111 }
 0x5f1   : > { %7139 = vst [vmem:[#allocation26_spill] sm:$0xff] %v6109_v33  ;;  %7140 = vst [vmem:[#allocation27_spill] sm:$0xff] %v6111_v59  ;;  %v7172_v59 = vld [vmem:[#allocation73_spill] sm:$0xff] }
 0x5f4   : > { %v6113_v0 = vpop.permute.xlu0 %3117  ;;  %v3116_v27 = vpop.permute.xlu1 %3115 }
 0x5f5   : > { %v3135_v60 = vsel %vm1595_vm14, %v3116_v27, %v6113_v0 }
 0x5f6   : > { %v3165_v53 = vadd.f32 %v3135_v60, %v5990_v35 }
 0x5f8   : > { %v3122_v4 = vpop.permute.xlu0 %3121  ;;  %v3120_v17 = vpop.permute.xlu1 %3119 }
 0x5f9   : > { %v6118_v29 = vsel %vm1595_vm14, %v3120_v17, %v3122_v4 }
 0x5fa   : > { %7141 = vst [vmem:[#allocation28_spill] sm:$0xff] %v6118_v29 }
 0x5fc   : > { %v3126_v43 = vpop.permute.xlu0 %3125  ;;  %v3124_v41 = vpop.permute.xlu1 %3123 }
 0x5fd   : > { %v3137_v47 = vsel %vm1595_vm14, %v3122_v4, %v3124_v41  ;;  %v3138_v8 = vsel %vm1595_vm14, %v3124_v41, %v3126_v43  ;;  %v3170_v35 = vadd.f32 %v3126_v43, %v6018_v7 }
 0x5fe   : > { %v3168_v34 = vadd.f32 %v3137_v47, %v6001_v5  ;;  %v7161_v47 = vld [vmem:[#allocation62_spill] sm:$0xff] }
 0x600   : > { %v6122_v37 = vpop.permute.xlu0 %3177  ;;  %v6124_v39 = vpop.permute.xlu1 %3175 }
 0x604   : > { %v6126_v3 = vpop.permute.xlu0 %3181  ;;  %v3180_v62 = vpop.permute.xlu1 %3179 }
 0x605   : > { %v6130_v50 = vsel %vm3207_vm12, %v6122_v37, %v3180_v62  ;;  %v6134_v21 = vsel %vm3207_vm12, %v3180_v62, %v6126_v3  ;;  %v3134_v62 = vsel %vm1595_vm14, %v6109_v33, %v3116_v27 }
 0x606   : > { %7142 = vst [vmem:[#allocation122_spill] sm:$0xff] %v6130_v50  ;;  %v3164_v40 = vadd.f32 %v3134_v62, %v5957_v26  ;;  %v7152_v50 = vld [vmem:[#allocation49_spill] sm:$0xff] }
 0x607   : > { %v2170_v26 = vadd.f32 %v7152_v50, %v7151_v13  ;;  %v7153_v62 = vld [vmem:[#allocation65_spill] sm:$0xff]  ;;  %v7163_v50 = vld [vmem:[#allocation15_spill] sm:$0xff] }
 0x608   : > { %v6136_v14 = vpop.permute.xlu0 %3185  ;;  %v6138_v61 = vpop.permute.xlu1 %3183 }
 0x609   : > { %7143 = vst [vmem:[#allocation123_spill] sm:$0xff] %v6136_v14  ;;  %7144 = vst [vmem:[#allocation124_spill] sm:$0xff] %v6138_v61  ;;  %v2246_v20 = vadd.f32 %v7153_v62, %v2170_v26 }
 0x60c   : > { %v6140_v36 = vpop.permute.xlu0 %3189  ;;  %v3188_v63 = vpop.permute.xlu1 %3187 }
 0x60d   : > { %v6144_v4 = vsel %vm3207_vm12, %v6136_v14, %v3188_v63  ;;  %v6148_v17 = vsel %vm3207_vm12, %v3188_v63, %v6140_v36 }
 0x60e   : > { %7145 = vst [vmem:[#allocation125_spill] sm:$0xff] %v6144_v4 }
 0x610   : > { %v6150_v41 = vpop.permute.xlu0 %3193  ;;  %v6152_v51 = vpop.permute.xlu1 %3191 }
 0x611   : > { %7146 = vst [vmem:[#allocation126_spill] sm:$0xff] %v6150_v41  ;;  %7147 = vst [vmem:[#allocation127_spill] sm:$0xff] %v6152_v51  ;;  %v7165_v51 = vld [vmem:[#allocation50_spill] sm:$0xff] }
 0x614   : > { %v6156_v52 = vpop.permute.xlu0 %3197  ;;  %v3196_v11 = vpop.permute.xlu1 %3195 }
 0x615   : > { %v3215_v18 = vsel %vm3207_vm12, %v6150_v41, %v3196_v11  ;;  %v3216_v63 = vsel %vm3207_vm12, %v3196_v11, %v6156_v52  ;;  %v7155_v11 = vld [vmem:[#allocation46_spill] sm:$0xff] }
 0x616   : > { %v6164_v55 = vadd.f32 %v3215_v18, %v3164_v40  ;;  %v6166_v44 = vadd.f32 %v3216_v63, %v3165_v53  ;;  %v3169_v40 = vadd.f32 %v3138_v8, %v6022_v1  ;;  %v7154_v53 = vld [vmem:[#allocation47_spill] sm:$0xff] }
 0x617   : > { %v2139_v63 = vsel %vm739_vm6, %v7155_v11, %v7154_v53  ;;  %v7160_v1 = vld [vmem:[#allocation63_spill] sm:$0xff]  ;;  %v7162_v11 = vld [vmem:[#allocation69_spill] sm:$0xff] }
 0x618   : > { %7148 = vst [vmem:[#allocation128_spill] sm:$0xff] %v6164_v55  ;;  %v6168_v4 = vpop.permute.xlu0 %3201  ;;  %v6170_v27 = vpop.permute.xlu1 %3199  ;;  %v7156_v55 = vld [vmem:[#allocation37_spill] sm:$0xff]  ;;  %v2215_v8 = vsel %vm892_vm8, %v7161_v47, %v7160_v1 }
 0x619   : > { %7149 = vst [vmem:[#allocation129_spill] sm:$0xff] %v6168_v4  ;;  %7150 = vst [vmem:[#allocation130_spill] sm:$0xff] %v6170_v27  ;;  %v7157_v27 = vld [vmem:[#allocation53_spill] sm:$0xff] }
 0x61a   : > { %v2174_v22 = vadd.f32 %v7157_v27, %v7156_v55  ;;  %v2167_v55 = vadd.f32 %v2139_v63, %v7163_v50  ;;  %v7171_v50 = vld [vmem:[#allocation66_spill] sm:$0xff] }
 0x61c   : > { %v3206_v60 = vpop.permute.xlu0 %3205  ;;  %v3204_v18 = vpop.permute.xlu1 %3203  ;;  %v2250_v62 = vadd.f32 %v7162_v11, %v2174_v22  ;;  %v7170_v22 = vld [vmem:[#allocation67_spill] sm:$0xff] }
 0x61d   : > { %v3251_v29 = vadd.f32 %v3206_v60, %v3170_v35  ;;  %v3218_v13 = vsel %vm3207_vm12, %v6168_v4, %v3204_v18  ;;  %v3219_v7 = vsel %vm3207_vm12, %v3204_v18, %v3206_v60  ;;  %v2262_v35 = vmul.f32 0.11111111, %v2246_v20  ;;  %v7164_v4 = vld [vmem:[#allocation51_spill] sm:$0xff]  ;;  %v7166_v60 = vld [vmem:[#allocation41_spill] sm:$0xff] }
 0x61e   : > { %v6186_v43 = vadd.f32 %v3218_v13, %v3168_v34  ;;  %v6188_v26 = vadd.f32 %v3219_v7, %v3169_v40  ;;  %v2142_v34 = vsel %vm739_vm6, %v7165_v51, %v7164_v4  ;;  %v7167_v40 = vld [vmem:[#allocation57_spill] sm:$0xff]  ;;  %v7168_v7 = vld [vmem:[#allocation55_spill] sm:$0xff]  ;;  %v2243_v20 = vadd.f32 %v2215_v8, %v2167_v55 }
 0x61f   : > { %v2178_v18 = vadd.f32 %v7167_v40, %v7166_v60  ;;  %v2218_v63 = vsel %vm892_vm8, %v7171_v50, %v7170_v22  ;;  %v2266_v11 = vmul.f32 0.11111111, %v2250_v62  ;;  %v3267_v51 = vmul.f32 0.11111111, %v3251_v29  ;;  %v7173_v60 = vld [vmem:[#allocation24_spill] sm:$0xff]  ;;  %v7176_v55 = vld [vmem:[#allocation45_spill] sm:$0xff] }
 0x620   : > { %7158 = vst [vmem:[#allocation22_spill] sm:$0xff] %v6186_v43  ;;  %v6190_v5 = vpop.permute.xlu0 %1897  ;;  %v6197_v27 = vpop.permute.xlu1 %2294  ;;  %v7169_v43 = vld [vmem:[#allocation54_spill] sm:$0xff] }
 0x621   : > { %7159 = vst [vmem:[#allocation47_spill] sm:$0xff] %v6190_v5  ;;  %v2306_v13 = vmul.f32 %v6197_v27, %v2262_v35  ;;  %v2145_v47 = vsel %vm739_vm6, %v7169_v43, %v7168_v7  ;;  %v2254_v33 = vadd.f32 %v7172_v59, %v2178_v18  ;;  %v2171_v35 = vadd.f32 %v2142_v34, %v7173_v60  ;;  %v7175_v43 = vld [vmem:[#allocation58_spill] sm:$0xff]  ;;  %v7177_v7 = vld [vmem:[#allocation61_spill] sm:$0xff]  ;;  %v7181_v34 = vld [vmem:[#allocation71_spill] sm:$0xff] }
 0x622   : > { %v2148_v8 = vsel %vm739_vm6, %v7175_v43, %v7174_v2  ;;  %v2182_v4 = vadd.f32 %v7177_v7, %v7176_v55  ;;  %v2310_v50 = vmul.f32 %v6197_v27, %v2266_v11  ;;  %v7179_v29 = vld [vmem:[#allocation38_spill] sm:$0xff]  ;;  %v2259_v59 = vmul.f32 0.11111111, %v2243_v20  ;;  %v7183_v43 = vld [vmem:[#allocation77_spill] sm:$0xff] }
 0x623   : > { %2341 = vrot.lane.b32.xlu1 %v2306_v13, %s4293_s25  ;;  %v2175_v18 = vadd.f32 %v2145_v47, %v7179_v29  ;;  %v2247_v13 = vadd.f32 %v2218_v63, %v2171_v35  ;;  %v7182_v60 = vld [vmem:[#allocation70_spill] sm:$0xff]  ;;  %v2270_v14 = vmul.f32 0.11111111, %v2254_v33  ;;  %v2638_v20 = vadd.f32 %v5775_v45, %v5590_v6 }
 0x624   : > { %v6208_v41 = vpop.permute.xlu0 %2767  ;;  %v6216_v40 = vpop.permute.xlu1 %3287  ;;  %v2221_v61 = vsel %vm892_vm8, %v7182_v60, %v7181_v34  ;;  %v2258_v2 = vadd.f32 %v7183_v43, %v2182_v4  ;;  %v7184_v11 = vld [vmem:[#allocation42_spill] sm:$0xff]  ;;  %v2690_v63 = vsel %vm2687_vm13, %v5805_v10, %v5807_v46  ;;  %v3129_v33 = vsel %vm1595_vm14, %v6099_v15, %v6097_v38 }
 0x625   : > { %v6225_v62 = vmul.f32 %v6216_v40, %v3267_v51  ;;  %v2179_v55 = vadd.f32 %v2148_v8, %v7184_v11  ;;  %v7185_v51 = vld [vmem:[#allocation75_spill] sm:$0xff]  ;;  %v3132_v4 = vsel %vm1595_vm14, %v6107_v48, %v6105_v23  ;;  %v2314_v8 = vmul.f32 %v6197_v27, %v2270_v14 }
 0x626   : > { %v2251_v6 = vadd.f32 %v2221_v61, %v2175_v18  ;;  %v2693_v46 = vsel %vm2687_vm13, %v5813_v28, %v5815_v49  ;;  %v2274_v11 = vmul.f32 0.11111111, %v2258_v2  ;;  %v2642_v15 = vadd.f32 %v5783_v32, %v5628_v25 }
 0x627   : > { %7178 = vst [vmem:[#allocation46_spill] sm:$0xff] %v6225_v62  ;;  %2349 = vrot.lane.b32.xlu1 %v2310_v50, %s4293_s25  ;;  %v7186_v62 = vld [vmem:[#allocation74_spill] sm:$0xff]  ;;  %v2719_v10 = vadd.f32 %v2690_v63, %v2638_v20  ;;  %v3161_v14 = vadd.f32 %v3132_v4, %v5944_v16  ;;  %v2607_v49 = vsel %vm892_vm8, %v5771_v57, %v5769_v24  ;;  %v7187_v63 = vld [vmem:[#allocation79_spill] sm:$0xff] }
 0x628   : > { %v6228_v22 = vpop.permute.xlu0 %1893  ;;  %v2224_v47 = vsel %vm892_vm8, %v7186_v62, %v7185_v51  ;;  %v6244_v35 = vpop.permute.xlu1 %2290  ;;  %v2263_v62 = vmul.f32 0.11111111, %v2247_v13  ;;  %v2723_v18 = vadd.f32 %v2693_v46, %v2642_v15  ;;  %v2318_v2 = vmul.f32 %v6197_v27, %v2274_v11  ;;  %v7188_v15 = vld [vmem:[#allocation94_spill] sm:$0xff] }
 0x629   : > { %7180 = vst [vmem:[#allocation37_spill] sm:$0xff] %v6228_v22  ;;  %v2303_v50 = vmul.f32 %v6244_v35, %v2259_v59  ;;  %v2255_v60 = vadd.f32 %v2224_v47, %v2179_v55  ;;  %v3157_v59 = vadd.f32 %v3129_v33, %v5903_v42  ;;  %v3242_v55 = vadd.f32 %v6148_v17, %v3161_v14  ;;  %v7189_v33 = vld [vmem:[#allocation93_spill] sm:$0xff] }
 0x62a   : > { %v2307_v25 = vmul.f32 %v6244_v35, %v2263_v62  ;;  %v2267_v42 = vmul.f32 0.11111111, %v2251_v6  ;;  %v2735_v16 = vmul.f32 0.11111111, %v2719_v10  ;;  %v2635_v57 = vadd.f32 %v2607_v49, %v7187_v63  ;;  %v7192_v62 = vld [vmem:[#allocation87_spill] sm:$0xff] }
 0x62b   : > { %2357 = vrot.lane.b32.xlu1 %v2314_v8, %s4293_s25  ;;  %2335 = vrot.lane.b32.xlu0 %v2303_v50, %s4293_s25  ;;  %v3238_v13 = vadd.f32 %v6134_v21, %v3157_v59  ;;  %v2271_v20 = vmul.f32 0.11111111, %v2255_v60  ;;  %v2610_v4 = vsel %vm892_vm8, %v7189_v33, %v7188_v15  ;;  %v7190_v8 = vld [vmem:[#allocation112_spill] sm:$0xff]  ;;  %v7191_v50 = vld [vmem:[#allocation111_spill] sm:$0xff]  ;;  %v2739_v10 = vmul.f32 0.11111111, %v2723_v18 }
 0x62c   : > { %v6257_v29 = vpop.permute.xlu0 %2763  ;;  %v6265_v61 = vpop.permute.xlu1 %3283  ;;  %v2696_v21 = vsel %vm2687_vm13, %v7191_v50, %v7190_v8  ;;  %v7193_v6 = vld [vmem:[#allocation99_spill] sm:$0xff]  ;;  %v2779_v60 = vmul.f32 %v6208_v41, %v2735_v16  ;;  %v2311_v11 = vmul.f32 %v6244_v35, %v2267_v42  ;;  %v3258_v14 = vmul.f32 0.11111111, %v3242_v55  ;;  %v7197_v55 = vld [vmem:[#allocation104_spill] sm:$0xff] }
 0x62d   : > { %v2646_v46 = vadd.f32 %v7193_v6, %v7192_v62  ;;  %v3254_v59 = vmul.f32 0.11111111, %v3238_v13  ;;  %v3262_v33 = vmul.f32 0.11111111, %v6166_v44  ;;  %v3266_v18 = vmul.f32 0.11111111, %v6188_v26 }
 0x62e   : > { %v2716_v42 = vadd.f32 %v7197_v55, %v2635_v57  ;;  %v7198_v16 = vld [vmem:[#allocation116_spill] sm:$0xff]  ;;  %v7199_v8 = vld [vmem:[#allocation115_spill] sm:$0xff]  ;;  %v2315_v57 = vmul.f32 %v6244_v35, %v2271_v20 }
 0x62f   : > { %2365 = vrot.lane.b32.xlu1 %v2318_v2, %s4293_s25  ;;  %2343 = vrot.lane.b32.xlu0 %v2307_v25, %s4293_s25  ;;  %v2727_v63 = vadd.f32 %v2696_v21, %v2646_v46  ;;  %v7201_v26 = vld [vmem:[#allocation91_spill] sm:$0xff] }
 0x630   : > { %v6274_v47 = vpop.permute.xlu0 %2292  ;;  %v1896_v17 = vpop.permute.xlu1 %1895  ;;  %v7202_v62 = vld [vmem:[#allocation103_spill] sm:$0xff] }
 0x631   : > { %v6291_v49 = vsel %vm941_vm10, %v6228_v22, %v1896_v17  ;;  %v6295_v2 = vsel %vm941_vm10, %v1896_v17, %v6190_v5  ;;  %v2699_v17 = vsel %vm2687_vm13, %v7199_v8, %v7198_v16  ;;  %v2650_v46 = vadd.f32 %v7202_v62, %v7201_v26  ;;  %v7203_v5 = vld [vmem:[#allocation81_spill] sm:$0xff]  ;;  %v7206_v26 = vld [vmem:[#allocation107_spill] sm:$0xff] }
 0x632   : > { %7194 = vst [vmem:[#allocation63_spill] sm:$0xff] %v6291_v49  ;;  %7195 = vst [vmem:[#allocation62_spill] sm:$0xff] %v6295_v2  ;;  %v2783_v2 = vmul.f32 %v6208_v41, %v2739_v10  ;;  %v2639_v49 = vadd.f32 %v2610_v4, %v7203_v5  ;;  %v7204_v22 = vld [vmem:[#allocation97_spill] sm:$0xff]  ;;  %v2743_v16 = vmul.f32 0.11111111, %v2727_v63  ;;  %v3158_v10 = vadd.f32 %v6097_v38, %v5894_v31  ;;  %v7207_v4 = vld [vmem:[#allocation84_spill] sm:$0xff] }
 0x633   : > { %2814 = vrot.lane.b32.xlu1 %v2779_v60, %s4294_s26  ;;  %2351 = vrot.lane.b32.xlu0 %v2311_v11, %s4293_s25  ;;  %v3162_v31 = vadd.f32 %v6105_v23, %v5935_v56  ;;  %v3166_v56 = vadd.f32 %v6113_v0, %v5981_v9  ;;  %v3208_v23 = vsel %vm3207_vm12, %v6124_v39, %v6122_v37  ;;  %v7214_v0 = vld [vmem:[#allocation64_spill] sm:$0xff]  ;;  %vm2296_vm10 = vcmask 580608  }
 0x634   : > { %v6297_v25 = vpop.permute.xlu0 %3285  ;;  %v2787_v5 = vmul.f32 %v6208_v41, %v2743_v16  ;;  %v2216_v37 = vsel %vm892_vm8, %v7160_v1, %v7214_v0 }
 0x635   : > { %7196 = vst [vmem:[#allocation15_spill] sm:$0xff] %v6297_v25  ;;  %v3291_v13 = vsel %vm3289_vm15, %v6297_v25, %v6216_v40  ;;  %v7205_v25 = vld [vmem:[#allocation96_spill] sm:$0xff]  ;;  %v3247_v9 = vadd.f32 %v6156_v52, %v3166_v56  ;;  %v7224_v56 = vld [vmem:[#allocation67_spill] sm:$0xff] }
 0x636   : > { %v6310_v21 = vmul.f32 %v3291_v13, %v3254_v59  ;;  %v6312_v44 = vmul.f32 %v3291_v13, %v3258_v14  ;;  %v6316_v60 = vmul.f32 %v3291_v13, %v3262_v33  ;;  %v6318_v11 = vmul.f32 %v3291_v13, %v3266_v18  ;;  %v7208_v13 = vld [vmem:[#allocation101_spill] sm:$0xff]  ;;  %v7218_v52 = vld [vmem:[#allocation52_spill] sm:$0xff] }
 0x637   : > { %v2613_v59 = vsel %vm892_vm8, %v7205_v25, %v7204_v22  ;;  %v2731_v14 = vadd.f32 %v2699_v17, %v2650_v46  ;;  %2822 = vrot.lane.b32.xlu1 %v2783_v2, %s4294_s26  ;;  %v2720_v33 = vadd.f32 %v7206_v26, %v2639_v49  ;;  %2359 = vrot.lane.b32.xlu0 %v2315_v57, %s4293_s25  ;;  %v7209_v25 = vld [vmem:[#allocation100_spill] sm:$0xff] }
 0x638   : > { %7200 = vst [vmem:[#allocation50_spill] sm:$0xff] %v6312_v44  ;;  %v2732_v44 = vmul.f32 0.11111111, %v2716_v42  ;;  %v2643_v20 = vadd.f32 %v2613_v59, %v7207_v4  ;;  %v2616_v63 = vsel %vm892_vm8, %v7209_v25, %v7208_v13  ;;  %v3239_v2 = vadd.f32 %v6126_v3, %v3158_v10  ;;  %v7210_v42 = vld [vmem:[#allocation109_spill] sm:$0xff] }
 0x639   : > { %v2747_v17 = vmul.f32 0.11111111, %v2731_v14  ;;  %v2736_v49 = vmul.f32 0.11111111, %v2720_v33  ;;  %v3127_v3 = vsel %vm1595_vm14, %v6095_v30, %v6093_v58  ;;  %v3243_v14 = vadd.f32 %v6140_v36, %v3162_v31  ;;  %v7212_v10 = vld [vmem:[#allocation113_spill] sm:$0xff]  ;;  %v7213_v30 = vld [vmem:[#allocation48_spill] sm:$0xff] }
 0x63a   : > { %v2776_v18 = vmul.f32 %v6257_v29, %v2732_v44  ;;  %v2724_v46 = vadd.f32 %v7210_v42, %v2643_v20  ;;  %v7211_v44 = vld [vmem:[#allocation88_spill] sm:$0xff]  ;;  %v3255_v16 = vmul.f32 0.11111111, %v3239_v2  ;;  %v2140_v36 = vsel %vm739_vm6, %v7154_v53, %v7213_v30  ;;  %v7216_v2 = vld [vmem:[#allocation123_spill] sm:$0xff] }
 0x63b   : > { %2830 = vrot.lane.b32.xlu1 %v2787_v5, %s4294_s26  ;;  %v2791_v38 = vmul.f32 %v6208_v41, %v2747_v17  ;;  %v2647_v57 = vadd.f32 %v2616_v63, %v7211_v44  ;;  %v2780_v59 = vmul.f32 %v6257_v29, %v2736_v49  ;;  %v3155_v20 = vadd.f32 %v3127_v3, %v5880_v54  ;;  %v7215_v54 = vld [vmem:[#allocation20_spill] sm:$0xff]  ;;  %v7219_v31 = vld [vmem:[#allocation51_spill] sm:$0xff]  ;;  %v7221_v3 = vld [vmem:[#allocation26_spill] sm:$0xff] }
 0x63c   : > { %2808 = vrot.lane.b32.xlu0 %v2776_v18, %s4294_s26  ;;  %v2740_v33 = vmul.f32 0.11111111, %v2724_v46  ;;  %v3299_v4 = vmul.f32 %v6216_v40, %v3255_v16  ;;  %v3130_v25 = vsel %vm1595_vm14, %v6103_v12, %v6101_v19  ;;  %v3259_v63 = vmul.f32 0.11111111, %v3243_v14  ;;  %v7217_v49 = vld [vmem:[#allocation124_spill] sm:$0xff]  ;;  %v7220_v44 = vld [vmem:[#allocation119_spill] sm:$0xff] }
 0x63d   : > { %v2728_v5 = vadd.f32 %v7212_v10, %v2647_v57  ;;  %v3236_v53 = vadd.f32 %v3208_v23, %v3155_v20  ;;  %v2168_v17 = vadd.f32 %v2140_v36, %v7215_v54  ;;  %v3211_v12 = vsel %vm3207_vm12, %v7217_v49, %v7216_v2  ;;  %v7222_v16 = vld [vmem:[#allocation27_spill] sm:$0xff]  ;;  %v7230_v2 = vld [vmem:[#allocation120_spill] sm:$0xff] }
 0x63e   : > { %v2784_v18 = vmul.f32 %v6257_v29, %v2740_v33  ;;  %v3303_v46 = vmul.f32 %v6216_v40, %v3259_v63  ;;  %v3159_v57 = vadd.f32 %v3130_v25, %v7220_v44  ;;  %v3133_v14 = vsel %vm1595_vm14, %v7222_v16, %v7221_v3  ;;  %v7225_v20 = vld [vmem:[#allocation35_spill] sm:$0xff]  ;;  %v7226_v25 = vld [vmem:[#allocation126_spill] sm:$0xff]  ;;  %v7233_v16 = vld [vmem:[#allocation129_spill] sm:$0xff] }
 0x63f   : > { %2838 = vrot.lane.b32.xlu1 %v2791_v38, %s4294_s26  ;;  %v2744_v39 = vmul.f32 0.11111111, %v2728_v5  ;;  %v2143_v38 = vsel %vm739_vm6, %v7219_v31, %v7218_v52  ;;  %v3263_v33 = vmul.f32 0.11111111, %v3247_v9  ;;  %v7223_v5 = vld [vmem:[#allocation68_spill] sm:$0xff]  ;;  %v7227_v63 = vld [vmem:[#allocation127_spill] sm:$0xff]  ;;  %v3163_v49 = vadd.f32 %v3133_v14, %v7230_v2 }
 0x640   : > { %2816 = vrot.lane.b32.xlu0 %v2780_v59, %s4294_s26  ;;  %v2244_v59 = vadd.f32 %v2216_v37, %v2168_v17  ;;  %v2219_v23 = vsel %vm892_vm8, %v7224_v56, %v7223_v5  ;;  %v3240_v36 = vadd.f32 %v3211_v12, %v3159_v57  ;;  %v3214_v37 = vsel %vm3207_vm12, %v7227_v63, %v7226_v25  ;;  %v7228_v9 = vld [vmem:[#allocation56_spill] sm:$0xff]  ;;  %v7229_v54 = vld [vmem:[#allocation55_spill] sm:$0xff]  ;;  %v7234_v14 = vld [vmem:[#allocation130_spill] sm:$0xff] }
 0x641   : > { %v2788_v1 = vmul.f32 %v6257_v29, %v2744_v39  ;;  %v3307_v39 = vmul.f32 %v6216_v40, %v3263_v33  ;;  %v2146_v17 = vsel %vm739_vm6, %v7229_v54, %v7228_v9  ;;  %v3244_v57 = vadd.f32 %v3214_v37, %v3163_v49  ;;  %v7235_v56 = vld [vmem:[#allocation60_spill] sm:$0xff]  ;;  %v7241_v49 = vld [vmem:[#allocation43_spill] sm:$0xff] }
 0x642   : > { %v3256_v44 = vmul.f32 0.11111111, %v3240_v36  ;;  %v7239_v36 = vld [vmem:[#allocation49_spill] sm:$0xff] }
 0x643   : > { %3334 = vrot.lane.b32.xlu1 %v3299_v4, %s4295_s16  ;;  %v3252_v4 = vmul.f32 0.11111111, %v3236_v53  ;;  %v2297_v53 = vsel %vm2296_vm10, %v6244_v35, %v6274_v47  ;;  %v3217_v35 = vsel %vm3207_vm12, %v7234_v14, %v7233_v16  ;;  %v2141_v25 = vsel %vm739_vm6, %v7213_v30, %v7239_v36  ;;  %v7243_v30 = vld [vmem:[#allocation17_spill] sm:$0xff] }
 0x644   : > { %2824 = vrot.lane.b32.xlu0 %v2784_v18, %s4294_s26  ;;  %v2172_v18 = vadd.f32 %v2143_v38, %v7225_v20  ;;  %v7231_v38 = vld [vmem:[#allocation72_spill] sm:$0xff] }
 0x645   : > { %v3296_v12 = vmul.f32 %v6265_v61, %v3252_v4  ;;  %v2222_v40 = vsel %vm892_vm8, %v7181_v34, %v7231_v38  ;;  %v7237_v4 = vld [vmem:[#allocation121_spill] sm:$0xff]  ;;  %v7238_v20 = vld [vmem:[#allocation28_spill] sm:$0xff]  ;;  %v3300_v34 = vmul.f32 %v6265_v61, %v3256_v44 }
 0x646   : > { %v2248_v31 = vadd.f32 %v2219_v23, %v2172_v18  ;;  %v3167_v18 = vadd.f32 %v7238_v20, %v7237_v4  ;;  %v7247_v4 = vld [vmem:[#allocation69_spill] sm:$0xff]  ;;  %v7248_v20 = vld [vmem:[#allocation78_spill] sm:$0xff] }
 0x647   : > { %3342 = vrot.lane.b32.xlu1 %v3303_v46, %s4295_s16  ;;  %v2260_v46 = vmul.f32 0.11111111, %v2244_v59  ;;  %v7236_v59 = vld [vmem:[#allocation59_spill] sm:$0xff] }
 0x648   : > { %2832 = vrot.lane.b32.xlu0 %v2788_v1, %s4294_s26  ;;  %v7232_v1 = vld [vmem:[#allocation39_spill] sm:$0xff]  ;;  %v2149_v23 = vsel %vm739_vm6, %v7236_v59, %v7235_v56  ;;  %v2264_v63 = vmul.f32 0.11111111, %v2248_v31  ;;  %v3248_v2 = vadd.f32 %v3217_v35, %v3167_v18  ;;  %v2169_v31 = vadd.f32 %v2141_v25, %v7243_v30  ;;  %v7246_v59 = vld [vmem:[#allocation105_spill] sm:$0xff]  ;;  %v7254_v30 = vld [vmem:[#allocation82_spill] sm:$0xff] }
 0x649   : > { %v2176_v3 = vadd.f32 %v2146_v17, %v7232_v1  ;;  %v2304_v33 = vmul.f32 %v2297_v53, %v2260_v46  ;;  %v3260_v17 = vmul.f32 0.11111111, %v3244_v57  ;;  %v7242_v46 = vld [vmem:[#allocation65_spill] sm:$0xff] }
 0x64a   : > { %v2217_v44 = vsel %vm892_vm8, %v7214_v0, %v7242_v46  ;;  %v2308_v1 = vmul.f32 %v2297_v53, %v2264_v63  ;;  %v2688_v0 = vsel %vm2687_vm13, %v7197_v55, %v7246_v59  ;;  %v7250_v25 = vld [vmem:[#allocation57_spill] sm:$0xff] }
 0x64b   : > { %3350 = vrot.lane.b32.xlu1 %v3307_v39, %s4295_s16  ;;  %v2252_v37 = vadd.f32 %v2222_v40, %v2176_v3  ;;  %v7240_v39 = vld [vmem:[#allocation76_spill] sm:$0xff]  ;;  %v3304_v16 = vmul.f32 %v6265_v61, %v3260_v17  ;;  %v2147_v63 = vsel %vm739_vm6, %v7228_v9, %v7250_v25 }
 0x64c   : > { %3328 = vrot.lane.b32.xlu0 %v3296_v12, %s4295_s16  ;;  %v2225_v54 = vsel %vm892_vm8, %v7185_v51, %v7240_v39  ;;  %v2180_v12 = vadd.f32 %v2149_v23, %v7241_v49  ;;  %v7244_v40 = vld [vmem:[#allocation92_spill] sm:$0xff]  ;;  %v7245_v51 = vld [vmem:[#allocation53_spill] sm:$0xff]  ;;  %v3264_v23 = vmul.f32 0.11111111, %v3248_v2  ;;  %v2766_v49 = vpop.permute.xlu1 %2765 }
 0x64d   : > { %v2608_v3 = vsel %vm892_vm8, %v5769_v24, %v7244_v40  ;;  %v2144_v57 = vsel %vm739_vm6, %v7218_v52, %v7245_v51  ;;  %v2268_v14 = vmul.f32 0.11111111, %v2252_v37  ;;  %v2220_v24 = vsel %vm892_vm8, %v7223_v5, %v7247_v4  ;;  %v7249_v52 = vld [vmem:[#allocation36_spill] sm:$0xff]  ;;  %v7251_v37 = vld [vmem:[#allocation95_spill] sm:$0xff] }
 0x64e   : > { %v2256_v35 = vadd.f32 %v2225_v54, %v2180_v12  ;;  %v2636_v18 = vadd.f32 %v2608_v3, %v7248_v20  ;;  %v2173_v36 = vadd.f32 %v2144_v57, %v7249_v52  ;;  %v2611_v55 = vsel %vm892_vm8, %v7188_v15, %v7251_v37  ;;  %v7253_v15 = vld [vmem:[#allocation73_spill] sm:$0xff]  ;;  %v7260_v20 = vld [vmem:[#allocation102_spill] sm:$0xff] }
 0x64f   : > { %2337 = vrot.lane.b32.xlu1 %v2304_v33, %s4293_s25  ;;  %v2245_v33 = vadd.f32 %v2217_v44, %v2169_v31  ;;  %v3308_v54 = vmul.f32 %v6265_v61, %v3264_v23  ;;  %v2298_v5 = vsel %vm2296_vm10, %v6274_v47, %v6197_v27  ;;  %v7252_v44 = vld [vmem:[#allocation108_spill] sm:$0xff]  ;;  %v2640_v31 = vadd.f32 %v2611_v55, %v7254_v30  ;;  %v7262_v55 = vld [vmem:[#allocation89_spill] sm:$0xff] }
 0x650   : > { %3336 = vrot.lane.b32.xlu0 %v3300_v34, %s4295_s16  ;;  %v2312_v34 = vmul.f32 %v2297_v53, %v2268_v14  ;;  %v2272_v17 = vmul.f32 0.11111111, %v2256_v35  ;;  %v2717_v2 = vadd.f32 %v2688_v0, %v2636_v18  ;;  %v2249_v46 = vadd.f32 %v2220_v24, %v2173_v36  ;;  %v7255_v27 = vld [vmem:[#allocation40_spill] sm:$0xff]  ;;  %v7257_v0 = vld [vmem:[#allocation110_spill] sm:$0xff] }
 0x651   : > { %v2261_v12 = vmul.f32 0.11111111, %v2245_v33  ;;  %v2691_v9 = vsel %vm2687_vm13, %v7206_v26, %v7252_v44  ;;  %v2177_v47 = vadd.f32 %v2147_v63, %v7255_v27  ;;  %v2770_v14 = vsel %vm2769_vm1, %v6257_v29, %v2766_v49  ;;  %v7258_v29 = vld [vmem:[#allocation85_spill] sm:$0xff] }
 0x652   : > { %v2316_v3 = vmul.f32 %v2297_v53, %v2272_v17  ;;  %v2150_v26 = vsel %vm739_vm6, %v7235_v56, %v7177_v7  ;;  %v2733_v35 = vmul.f32 0.11111111, %v2717_v2  ;;  %v2721_v33 = vadd.f32 %v2691_v9, %v2640_v31  ;;  %v7259_v7 = vld [vmem:[#allocation44_spill] sm:$0xff] }
 0x653   : > { %2345 = vrot.lane.b32.xlu1 %v2308_v1, %s4293_s25  ;;  %v2223_v1 = vsel %vm892_vm8, %v7231_v38, %v7253_v15  ;;  %v2305_v57 = vmul.f32 %v2298_v5, %v2261_v12  ;;  %v2265_v38 = vmul.f32 0.11111111, %v2249_v46  ;;  %v2694_v23 = vsel %vm2687_vm13, %v7210_v42, %v7257_v0  ;;  %v7265_v12 = vld [vmem:[#allocation25_spill] sm:$0xff] }
 0x654   : > { %3344 = vrot.lane.b32.xlu0 %v3304_v16, %s4295_s16  ;;  %v7256_v16 = vld [vmem:[#allocation98_spill] sm:$0xff]  ;;  %v2253_v53 = vadd.f32 %v2223_v1, %v2177_v47  ;;  %v2777_v24 = vmul.f32 %v2770_v14, %v2733_v35  ;;  %v2181_v56 = vadd.f32 %v2150_v26, %v7259_v7  ;;  %v2617_v18 = vsel %vm892_vm8, %v7208_v13, %v7260_v20  ;;  %v7267_v47 = vld [vmem:[#allocation83_spill] sm:$0xff] }
 0x655   : > { %v2614_v51 = vsel %vm892_vm8, %v7204_v22, %v7256_v16  ;;  %v2226_v22 = vsel %vm892_vm8, %v7240_v39, %v7183_v43  ;;  %v2609_v42 = vsel %vm892_vm8, %v7244_v40, %v5775_v45  ;;  %v2737_v52 = vmul.f32 0.11111111, %v2721_v33  ;;  %v7261_v39 = vld [vmem:[#allocation114_spill] sm:$0xff]  ;;  %v7264_v45 = vld [vmem:[#allocation80_spill] sm:$0xff] }
 0x656   : > { %v2644_v4 = vadd.f32 %v2614_v51, %v7258_v29  ;;  %v2269_v25 = vmul.f32 0.11111111, %v2253_v53  ;;  %v2257_v43 = vadd.f32 %v2226_v22, %v2181_v56  ;;  %v2697_v63 = vsel %vm2687_vm13, %v7212_v10, %v7261_v39  ;;  %v7263_v13 = vld [vmem:[#allocation106_spill] sm:$0xff] }
 0x657   : > { %2353 = vrot.lane.b32.xlu1 %v2312_v34, %s4293_s25  ;;  %v2309_v34 = vmul.f32 %v2298_v5, %v2265_v38  ;;  %v2689_v17 = vsel %vm2687_vm13, %v7246_v59, %v7263_v13  ;;  %v2781_v2 = vmul.f32 %v2770_v14, %v2737_v52  ;;  %v2637_v40 = vadd.f32 %v2609_v42, %v7264_v45  ;;  %v7268_v35 = vld [vmem:[#allocation122_spill] sm:$0xff] }
 0x658   : > { %3352 = vrot.lane.b32.xlu0 %v3308_v54, %s4295_s16  ;;  %v2725_v36 = vadd.f32 %v2694_v23, %v2644_v4  ;;  %v2648_v54 = vadd.f32 %v2617_v18, %v7262_v55  ;;  %v3128_v46 = vsel %vm1595_vm14, %v6093_v58, %v7265_v12  ;;  %v2313_v9 = vmul.f32 %v2298_v5, %v2269_v25  ;;  %v7271_v23 = vld [vmem:[#allocation15_spill] sm:$0xff]  ;;  %v7272_v4 = vld [vmem:[#allocation125_spill] sm:$0xff]  ;;  %v7276_v13 = vld [vmem:[#allocation46_spill] sm:$0xff] }
 0x659   : > { %v2612_v10 = vsel %vm892_vm8, %v7251_v37, %v5783_v32  ;;  %v2273_v30 = vmul.f32 0.11111111, %v2257_v43  ;;  %v2718_v31 = vadd.f32 %v2689_v17, %v2637_v40  ;;  %v2692_v59 = vsel %vm2687_vm13, %v7252_v44, %v5813_v28  ;;  %v7277_v17 = vld [vmem:[#allocation50_spill] sm:$0xff] }
 0x65a   : > { %v2741_v15 = vmul.f32 0.11111111, %v2725_v36  ;;  %v2729_v1 = vadd.f32 %v2697_v63, %v2648_v54  ;;  %v2641_v51 = vadd.f32 %v2612_v10, %v7267_v47  ;;  %v3131_v32 = vsel %vm1595_vm14, %v6101_v19, %v6107_v48  ;;  %v7269_v48 = vld [vmem:[#allocation118_spill] sm:$0xff]  ;;  %v7274_v36 = vld [vmem:[#allocation128_spill] sm:$0xff] }
 0x65b   : > { %2361 = vrot.lane.b32.xlu1 %v2316_v3, %s4293_s25  ;;  %v7266_v3 = vld [vmem:[#allocation117_spill] sm:$0xff]  ;;  %v2317_v37 = vmul.f32 %v2298_v5, %v2273_v30  ;;  %v2771_v28 = vsel %vm2769_vm1, %v2766_v49, %v6208_v41  ;;  %v2734_v44 = vmul.f32 0.11111111, %v2718_v31  ;;  %v2695_v19 = vsel %vm2687_vm13, %v7257_v0, %v7191_v50  ;;  %v7275_v63 = vld [vmem:[#allocation22_spill] sm:$0xff] }
 0x65c   : > { %2339 = vrot.lane.b32.xlu0 %v2305_v57, %s4293_s25  ;;  %v3156_v27 = vadd.f32 %v3128_v46, %v7266_v3  ;;  %v2785_v58 = vmul.f32 %v2770_v14, %v2741_v15  ;;  %v2615_v57 = vsel %vm892_vm8, %v7256_v16, %v7193_v6  ;;  %v2745_v26 = vmul.f32 0.11111111, %v2729_v1  ;;  %v7270_v6 = vld [vmem:[#allocation86_spill] sm:$0xff] }
 0x65d   : > { %v2722_v38 = vadd.f32 %v2692_v59, %v2641_v51  ;;  %v3160_v5 = vadd.f32 %v3131_v32, %v7269_v48  ;;  %v2645_v16 = vadd.f32 %v2615_v57, %v7270_v6  ;;  %v3290_v22 = vsel %vm3289_vm15, %v6265_v61, %v7271_v23  ;;  %v7273_v61 = vld [vmem:[#allocation90_spill] sm:$0xff]  ;;  %v7280_v57 = vld [vmem:[#allocation19_spill] sm:$0xff] }
 0x65e   : > { %v3237_v33 = vadd.f32 %v7268_v35, %v3156_v27  ;;  %v2789_v53 = vmul.f32 %v2770_v14, %v2745_v26  ;;  %v2778_v41 = vmul.f32 %v2771_v28, %v2734_v44  ;;  %v2618_v49 = vsel %vm892_vm8, %v7260_v20, %v7202_v62  ;;  %v7278_v27 = vld [vmem:[#allocation13_spill] sm:$0xff] }
 0x65f   : > { %2810 = vrot.lane.b32.xlu1 %v2777_v24, %s4294_s26  ;;  %v3241_v24 = vadd.f32 %v7272_v4, %v3160_v5  ;;  %v2738_v50 = vmul.f32 0.11111111, %v2722_v38  ;;  %v2726_v0 = vadd.f32 %v2695_v19, %v2645_v16  ;;  %v2698_v14 = vsel %vm2687_vm13, %v7261_v39, %v7199_v8  ;;  %v7281_v19 = vld [vmem:[#allocation23_spill] sm:$0xff] }
 0x660   : > { %2347 = vrot.lane.b32.xlu0 %v2309_v34, %s4293_s25  ;;  %v3253_v29 = vmul.f32 0.11111111, %v3237_v33  ;;  %v2649_v56 = vadd.f32 %v2618_v49, %v7273_v61  ;;  %v3261_v25 = vmul.f32 0.11111111, %v7274_v36  ;;  %v3265_v55 = vmul.f32 0.11111111, %v7275_v63 }
 0x661   : > { %v2782_v18 = vmul.f32 %v2771_v28, %v2738_v50  ;;  %v3257_v34 = vmul.f32 0.11111111, %v3241_v24  ;;  %v2742_v62 = vmul.f32 0.11111111, %v2726_v0  ;;  %vm2367_vm6 = vcmask 203776   ;;  %v7284_v4 = vld [vmem:[#allocation63_spill] sm:$0xff] }
 0x662   : > { %v3297_v7 = vmul.f32 %v3290_v22, %v3253_v29  ;;  %v2730_v20 = vadd.f32 %v2698_v14, %v2649_v56  ;;  %v3305_v8 = vmul.f32 %v3290_v22, %v3261_v25  ;;  %v3309_v54 = vmul.f32 %v3290_v22, %v3265_v55  ;;  %v7283_v29 = vld [vmem:[#allocation16_spill] sm:$0xff]  ;;  %v7287_v63 = vld [vmem:[#allocation10_spill] sm:$0xff]  ;;  %v7288_v55 = vld [vmem:[#allocation47_spill] sm:$0xff] }
 0x663   : > { %2818 = vrot.lane.b32.xlu1 %v2781_v2, %s4294_s26  ;;  %v3301_v42 = vmul.f32 %v3290_v22, %v3257_v34  ;;  %v2786_v52 = vmul.f32 %v2771_v28, %v2742_v62  ;;  %v7282_v22 = vld [vmem:[#allocation34_spill] sm:$0xff]  ;;  %v1910_v24 = vmul.f32 %v7284_v4, %v7283_v29  ;;  %v7285_v34 = vld [vmem:[#allocation21_spill] sm:$0xff]  ;;  %vm2840_vm8 = vcmask 408576  }
 0x664   : > { %2355 = vrot.lane.b32.xlu0 %v2313_v9, %s4293_s25  ;;  %v2746_v43 = vmul.f32 0.11111111, %v2730_v20  ;;  %v1914_v62 = vmul.f32 %v7284_v4, %v7285_v34  ;;  %vm3360_vm14 = vcmask 613376  }
 0x666   : > { %v2790_v39 = vmul.f32 %v2771_v28, %v2746_v43  ;;  %v7286_v43 = vld [vmem:[#allocation33_spill] sm:$0xff] }
 0x667   : > { %2826 = vrot.lane.b32.xlu1 %v2785_v58, %s4294_s26  ;;  %v7279_v58 = vld [vmem:[#allocation37_spill] sm:$0xff] }
 0x668   : > { %2363 = vrot.lane.b32.xlu0 %v2317_v37, %s4293_s25  ;;  %v1905_v47 = vmul.f32 %v7279_v58, %v7278_v27  ;;  %v1909_v26 = vmul.f32 %v7279_v58, %v7280_v57  ;;  %v1913_v48 = vmul.f32 %v7279_v58, %v7281_v19 }
 0x66b   : > { %2834 = vrot.lane.b32.xlu1 %v2789_v53, %s4294_s26 }
 0x66c   : > { %2812 = vrot.lane.b32.xlu0 %v2778_v41, %s4294_s26  ;;  %v1917_v41 = vmul.f32 %v7279_v58, %v7282_v22 }
 0x66f   : > { %3330 = vrot.lane.b32.xlu1 %v3297_v7, %s4295_s16 }
 0x670   : > { %2820 = vrot.lane.b32.xlu0 %v2782_v18, %s4294_s26 }
 0x673   : > { %3338 = vrot.lane.b32.xlu1 %v3301_v42, %s4295_s16 }
 0x674   : > { %2828 = vrot.lane.b32.xlu0 %v2786_v52, %s4294_s26 }
 0x677   : > { %3346 = vrot.lane.b32.xlu1 %v3305_v8, %s4295_s16  ;;  %v1918_v8 = vmul.f32 %v7284_v4, %v7286_v43 }
 0x678   : > { %2836 = vrot.lane.b32.xlu0 %v2790_v39, %s4294_s26 }
 0x67b   : > { %3354 = vrot.lane.b32.xlu1 %v3309_v54, %s4295_s16  ;;  %v1908_v54 = vmul.f32 %v7288_v55, %v7287_v63 }
 0x67c   : > { %3332 = vrot.lane.b32.xlu0 %v6310_v21, %s4295_s16 }
 0x67f   : > { %3358 = vrot.lane.b32.xlu1 %v7276_v13, %s4295_s16 }
 0x680   : > { %3340 = vrot.lane.b32.xlu0 %v7277_v17, %s4295_s16 }
 0x684   : > { %3348 = vrot.lane.b32.xlu0 %v6316_v60, %s4295_s16 }
 0x688   : > { %3356 = vrot.lane.b32.xlu0 %v6318_v11, %s4295_s16 }
 0x695   : > { %v2342_v2 = vpop.permute.xlu1 %2341 }
 0x699   : > { %v6564_v45 = vpop.permute.xlu1 %2349 }
 0x69d   : > { %v6566_v40 = vpop.permute.xlu0 %2335  ;;  %v6568_v12 = vpop.permute.xlu1 %2357 }
 0x69e   : > { %v2396_v37 = vadd.f32 %v6566_v40, %v1905_v47  ;;  %v7289_v47 = vld [vmem:[#allocation14_spill] sm:$0xff] }
 0x6a1   : > { %v2344_v21 = vpop.permute.xlu0 %2343  ;;  %v6570_v46 = vpop.permute.xlu1 %2365 }
 0x6a2   : > { %v2400_v44 = vadd.f32 %v2344_v21, %v1909_v26 }
 0x6a5   : > { %v2352_v9 = vpop.permute.xlu0 %2351  ;;  %v6572_v10 = vpop.permute.xlu1 %2814 }
 0x6a6   : > { %v2404_v16 = vadd.f32 %v2352_v9, %v1913_v48 }
 0x6a9   : > { %v6574_v15 = vpop.permute.xlu1 %2822  ;;  %v2360_v1 = vpop.permute.xlu0 %2359 }
 0x6aa   : > { %v2408_v7 = vadd.f32 %v2360_v1, %v1917_v41 }
 0x6ad   : > { %v6576_v60 = vpop.permute.xlu1 %2830 }
 0x6ae   : > { %v6578_v30 = vpop.permute.xlu0 %2808 }
 0x6af   : > { %v2869_v35 = vadd.f32 %v6578_v30, %v2396_v37  ;;  %v1912_v37 = vmul.f32 %v7288_v55, %v7289_v47 }
 0x6b1   : > { %v6580_v11 = vpop.permute.xlu1 %2838 }
 0x6b2   : > { %v6582_v31 = vpop.permute.xlu0 %2816 }
 0x6b3   : > { %v2873_v5 = vadd.f32 %v6582_v31, %v2400_v44 }
 0x6b5   : > { %v6584_v59 = vpop.permute.xlu1 %3334 }
 0x6b6   : > { %v2825_v3 = vpop.permute.xlu0 %2824 }
 0x6b7   : > { %v2877_v49 = vadd.f32 %v2825_v3, %v2404_v16  ;;  %v7291_v16 = vld [vmem:[#allocation31_spill] sm:$0xff] }
 0x6b9   : > { %v6588_v51 = vpop.permute.xlu1 %3342 }
 0x6ba   : > { %v6590_v32 = vpop.permute.xlu0 %2832 }
 0x6bb   : > { %v2881_v18 = vadd.f32 %v6590_v32, %v2408_v7 }
 0x6bd   : > { %v6596_v33 = vpop.permute.xlu1 %3350 }
 0x6be   : > { %v6598_v28 = vpop.permute.xlu0 %3328 }
 0x6bf   : > { %v3389_v38 = vadd.f32 %v6598_v28, %v2869_v35 }
 0x6c1   : > { %3421 = vrot.lane.b32.xlu0 %v3389_v38, %s4285_s8  ;;  %v6605_v53 = vpop.permute.xlu1 %2337  ;;  %v7290_v38 = vld [vmem:[#allocation30_spill] sm:$0xff] }
 0x6c2   : > { %v6607_v6 = vpop.permute.xlu0 %3336  ;;  %v1916_v19 = vmul.f32 %v7288_v55, %v7290_v38  ;;  %v2368_v29 = vsel %vm2367_vm6, %v6566_v40, %v6605_v53 }
 0x6c3   : > { %v3393_v23 = vadd.f32 %v6607_v6, %v2873_v5 }
 0x6c5   : > { %3429 = vrot.lane.b32.xlu0 %v3393_v23, %s4285_s8  ;;  %v6615_v50 = vpop.permute.xlu1 %2345  ;;  %v1920_v23 = vmul.f32 %v7288_v55, %v7291_v16 }
 0x6c6   : > { %v6617_v0 = vpop.permute.xlu0 %3344  ;;  %v2371_v14 = vsel %vm2367_vm6, %v2344_v21, %v6615_v50 }
 0x6c7   : > { %v3397_v61 = vadd.f32 %v6617_v0, %v2877_v49  ;;  %v6622_v56 = vadd.f32 %v2371_v14, %v1910_v24 }
 0x6c9   : > { %3437 = vrot.lane.b32.xlu0 %v3397_v61, %s4285_s8  ;;  %v6628_v20 = vpop.permute.xlu1 %2353 }
 0x6ca   : > { %v6630_v42 = vpop.permute.xlu0 %3352  ;;  %v2374_v52 = vsel %vm2367_vm6, %v2352_v9, %v6628_v20 }
 0x6cb   : > { %v3401_v36 = vadd.f32 %v6630_v42, %v2881_v18  ;;  %v2405_v25 = vadd.f32 %v2374_v52, %v1914_v62 }
 0x6cd   : > { %3445 = vrot.lane.b32.xlu0 %v3401_v36, %s4285_s8  ;;  %v6638_v39 = vpop.permute.xlu1 %2361 }
 0x6ce   : > { %v2340_v13 = vpop.permute.xlu0 %2339  ;;  %v2377_v17 = vsel %vm2367_vm6, %v2360_v1, %v6638_v39 }
 0x6cf   : > { %v2370_v21 = vsel %vm2367_vm6, %v2340_v13, %v2342_v2  ;;  %v2409_v9 = vadd.f32 %v2377_v17, %v1918_v8  ;;  %v2369_v55 = vsel %vm2367_vm6, %v6605_v53, %v2340_v13  ;;  %v7294_v17 = vld [vmem:[#allocation62_spill] sm:$0xff] }
 0x6d0   : > { %v2399_v27 = vadd.f32 %v2370_v21, %v1908_v54  ;;  %v7293_v54 = vld [vmem:[#allocation12_spill] sm:$0xff] }
 0x6d1   : > { %v2811_v58 = vpop.permute.xlu1 %2810  ;;  %v1907_v21 = vmul.f32 %v7294_v17, %v7293_v54 }
 0x6d2   : > { %v2348_v57 = vpop.permute.xlu0 %2347  ;;  %v2841_v61 = vsel %vm2840_vm8, %v6578_v30, %v2811_v58 }
 0x6d3   : > { %v2373_v26 = vsel %vm2367_vm6, %v2348_v57, %v6564_v45 }
 0x6d4   : > { %v2403_v35 = vadd.f32 %v2373_v26, %v1912_v37  ;;  %v2372_v37 = vsel %vm2367_vm6, %v6615_v50, %v2348_v57  ;;  %v7295_v26 = vld [vmem:[#allocation18_spill] sm:$0xff] }
 0x6d5   : > { %v2819_v44 = vpop.permute.xlu1 %2818 }
 0x6d6   : > { %v2356_v48 = vpop.permute.xlu0 %2355  ;;  %v2844_v13 = vsel %vm2840_vm8, %v6582_v31, %v2819_v44 }
 0x6d7   : > { %v2376_v1 = vsel %vm2367_vm6, %v2356_v48, %v6568_v12  ;;  %v7292_v12 = vld [vmem:[#allocation11_spill] sm:$0xff]  ;;  %v2375_v50 = vsel %vm2367_vm6, %v6628_v20, %v2356_v48  ;;  %v2874_v31 = vadd.f32 %v2844_v13, %v6622_v56 }
 0x6d8   : > { %v2407_v2 = vadd.f32 %v2376_v1, %v1916_v19  ;;  %v1906_v14 = vmul.f32 %v7284_v4, %v7292_v12 }
 0x6d9   : > { %v2827_v5 = vpop.permute.xlu1 %2826 }
 0x6da   : > { %v2364_v22 = vpop.permute.xlu0 %2363  ;;  %v2847_v41 = vsel %vm2840_vm8, %v2825_v3, %v2827_v5  ;;  %v2397_v34 = vadd.f32 %v2368_v29, %v1906_v14  ;;  %v7297_v14 = vld [vmem:[#allocation32_spill] sm:$0xff] }
 0x6db   : > { %v2379_v45 = vsel %vm2367_vm6, %v2364_v22, %v6570_v46  ;;  %v6658_v49 = vadd.f32 %v2847_v41, %v2405_v25 }
 0x6dc   : > { %v2411_v24 = vadd.f32 %v2379_v45, %v1920_v23  ;;  %v2870_v52 = vadd.f32 %v2841_v61, %v2397_v34  ;;  %v7296_v23 = vld [vmem:[#allocation29_spill] sm:$0xff]  ;;  %v1919_v61 = vmul.f32 %v7294_v17, %v7297_v14 }
 0x6dd   : > { %v2835_v7 = vpop.permute.xlu1 %2834  ;;  %v1915_v41 = vmul.f32 %v7294_v17, %v7296_v23 }
 0x6de   : > { %v2813_v18 = vpop.permute.xlu0 %2812  ;;  %v2850_v3 = vsel %vm2840_vm8, %v6590_v32, %v2835_v7 }
 0x6df   : > { %v2843_v46 = vsel %vm2840_vm8, %v2813_v18, %v6572_v10  ;;  %v6671_v62 = vadd.f32 %v2850_v3, %v2409_v9 }
 0x6e0   : > { %v2872_v40 = vadd.f32 %v2843_v46, %v2399_v27  ;;  %v2398_v27 = vadd.f32 %v2369_v55, %v1907_v21 }
 0x6e1   : > { %v3331_v36 = vpop.permute.xlu1 %3330 }
 0x6e2   : > { %v2821_v25 = vpop.permute.xlu0 %2820  ;;  %v3361_v4 = vsel %vm3360_vm14, %v6598_v28, %v3331_v36  ;;  %v2842_v28 = vsel %vm2840_vm8, %v2811_v58, %v2813_v18 }
 0x6e3   : > { %v2846_v30 = vsel %vm2840_vm8, %v2821_v25, %v6574_v15  ;;  %v3390_v43 = vadd.f32 %v3361_v4, %v2870_v52  ;;  %v2845_v19 = vsel %vm2840_vm8, %v2819_v44, %v2821_v25 }
 0x6e4   : > { %v2876_v8 = vadd.f32 %v2846_v30, %v2403_v35  ;;  %v2871_v35 = vadd.f32 %v2842_v28, %v2398_v27 }
 0x6e5   : > { %3423 = vrot.lane.b32.xlu1 %v3390_v43, %s4285_s8  ;;  %v3339_v38 = vpop.permute.xlu1 %3338 }
 0x6e6   : > { %v2829_v32 = vpop.permute.xlu0 %2828  ;;  %v3364_v57 = vsel %vm3360_vm14, %v6607_v6, %v3339_v38  ;;  %v2378_v6 = vsel %vm2367_vm6, %v6638_v39, %v2364_v22 }
 0x6e7   : > { %v2849_v10 = vsel %vm2840_vm8, %v2829_v32, %v6576_v60  ;;  %v1911_v60 = vmul.f32 %v7294_v17, %v7295_v26  ;;  %v3394_v20 = vadd.f32 %v3364_v57, %v2874_v31  ;;  %v2410_v39 = vadd.f32 %v2378_v6, %v1919_v61 }
 0x6e8   : > { %v2880_v63 = vadd.f32 %v2849_v10, %v2407_v2 }
 0x6e9   : > { %v2402_v1 = vadd.f32 %v2372_v37, %v1911_v60  ;;  %v3347_v48 = vpop.permute.xlu1 %3346 }
 0x6ea   : > { %v2837_v9 = vpop.permute.xlu0 %2836  ;;  %v3367_v52 = vsel %vm3360_vm14, %v6617_v0, %v3347_v48 }
 0x6eb   : > { %v2852_v15 = vsel %vm2840_vm8, %v2837_v9, %v6580_v11  ;;  %v2875_v44 = vadd.f32 %v2845_v19, %v2402_v1  ;;  %v3398_v30 = vadd.f32 %v3367_v52, %v6658_v49 }
 0x6ec   : > { %v2884_v47 = vadd.f32 %v2852_v15, %v2411_v24  ;;  %v2406_v24 = vadd.f32 %v2375_v50, %v1915_v41 }
 0x6ed   : > { %v3355_v25 = vpop.permute.xlu1 %3354 }
 0x6ee   : > { %v3333_v53 = vpop.permute.xlu0 %3332  ;;  %v3370_v0 = vsel %vm3360_vm14, %v6630_v42, %v3355_v25 }
 0x6ef   : > { %v3362_v58 = vsel %vm3360_vm14, %v3331_v36, %v3333_v53  ;;  %v3363_v11 = vsel %vm3360_vm14, %v3333_v53, %v6584_v59  ;;  %v2848_v59 = vsel %vm2840_vm8, %v2827_v5, %v2829_v32  ;;  %v2851_v5 = vsel %vm2840_vm8, %v2835_v7, %v2837_v9 }
 0x6f0   : > { %v3391_v2 = vadd.f32 %v3362_v58, %v2871_v35  ;;  %v3392_v16 = vadd.f32 %v3363_v11, %v2872_v40  ;;  %v2879_v18 = vadd.f32 %v2848_v59, %v2406_v24  ;;  %v2883_v36 = vadd.f32 %v2851_v5, %v2410_v39 }
 0x6f1   : > { %v3402_v43 = vadd.f32 %v3370_v0, %v6671_v62 }
 0x6f2   : > { %v3341_v45 = vpop.permute.xlu0 %3340  ;;  %3425 = vrot.lane.b32.xlu0 %v3391_v2, %s4285_s8  ;;  %3427 = vrot.lane.b32.xlu1 %v3392_v16, %s4285_s8 }
 0x6f3   : > { %v3365_v29 = vsel %vm3360_vm14, %v3339_v38, %v3341_v45  ;;  %v3366_v56 = vsel %vm3360_vm14, %v3341_v45, %v6588_v51 }
 0x6f4   : > { %v3395_v12 = vadd.f32 %v3365_v29, %v2875_v44  ;;  %v3396_v22 = vadd.f32 %v3366_v56, %v2876_v8  ;;  %v3359_v8 = vpop.permute.xlu1 %3358 }
 0x6f6   : > { %v3349_v3 = vpop.permute.xlu0 %3348  ;;  %3433 = vrot.lane.b32.xlu0 %v3395_v12, %s4285_s8  ;;  %3431 = vrot.lane.b32.xlu1 %v3394_v20, %s4285_s8 }
 0x6f7   : > { %v3368_v34 = vsel %vm3360_vm14, %v3347_v48, %v3349_v3  ;;  %v3369_v46 = vsel %vm3360_vm14, %v3349_v3, %v6596_v33 }
 0x6f8   : > { %v3399_v40 = vadd.f32 %v3368_v34, %v2879_v18  ;;  %v3400_v51 = vadd.f32 %v3369_v46, %v2880_v63 }
 0x6fa   : > { %v3357_v4 = vpop.permute.xlu0 %3356  ;;  %3435 = vrot.lane.b32.xlu1 %v3396_v22, %s4285_s8  ;;  %3441 = vrot.lane.b32.xlu0 %v3399_v40, %s4285_s8 }
 0x6fb   : > { %v3371_v7 = vsel %vm3360_vm14, %v3355_v25, %v3357_v4  ;;  %v3372_v32 = vsel %vm3360_vm14, %v3357_v4, %v3359_v8 }
 0x6fc   : > { %v3403_v33 = vadd.f32 %v3371_v7, %v2883_v36  ;;  %v3404_v10 = vadd.f32 %v3372_v32, %v2884_v47 }
 0x6fe   : > { %3439 = vrot.lane.b32.xlu1 %v3398_v30, %s4285_s8  ;;  %3449 = vrot.lane.b32.xlu0 %v3403_v33, %s4285_s8 }
 0x702   : > { %3443 = vrot.lane.b32.xlu1 %v3400_v51, %s4285_s8 }
 0x706   : > { %3447 = vrot.lane.b32.xlu1 %v3402_v43, %s4285_s8 }
 0x70a   : > { %3451 = vrot.lane.b32.xlu1 %v3404_v10, %s4285_s8  ;;  %s3503_s8 = sshll.u32 %s6737_s11, 4  ;;  %s6767_s8 = int_to_ptr.vmem [resolvable:$true] %s3503_s8 }
 0x70b   : > { %s4182_s9 = scalar_lea.vmem %s6767_s8, 1536  ;;  %p4189_p8 = scmp.lt.s32.totalorder %s6767_s8, %s4187_s13 }
 0x70c   : > { %p4183_p6 = scmp.ne.s32.totalorder %s6767_s8, %s4182_s9  ;;  %p4190_p10 = scmp.lt.s32.totalorder %s4188_s17, %s4182_s9 }
 0x70e   : > { %p4184_p12 = pnand %p4183_p6, %p7298_p11  ;;  %p4191_p0 = por %p4190_p10, %p4189_p8 }
 0x710   : > { %p4185_p13 = pneg %p4184_p12 }
 0x712   : > { %p4192_p2 = pnand %p4191_p0, %p4185_p13 }
 0x733   : > { %v3422_v49 = vpop.permute.xlu0 %3421 }
 0x737   : > { %v3430_v63 = vpop.permute.xlu0 %3429 }
 0x73b   : > { %v3438_v42 = vpop.permute.xlu0 %3437 }
 0x73f   : > { %v3446_v62 = vpop.permute.xlu0 %3445 }
 0x757   : > { %v3424_v55 = vpop.permute.xlu1 %3423 }
 0x758   : > { %v3453_v54 = vsel %vm2687_vm13, %v3422_v49, %v3424_v55 }
 0x759   : > { %3477 = vst [vmem:[%s6737_s11] sm:$0xff] %v3453_v54 }
 0x764   : > { %v3426_v17 = vpop.permute.xlu0 %3425  ;;  %v3428_v21 = vpop.permute.xlu1 %3427 }
 0x765   : > { %v3454_v9 = vsel %vm2687_vm13, %v3424_v55, %v3426_v17  ;;  %v3455_v28 = vsel %vm2687_vm13, %v3426_v17, %v3428_v21 }
 0x766   : > { %3478 = vst [vmem:[%s6737_s11 + $0x8] sm:$0xff] %v3454_v9  ;;  %3479 = vst [vmem:[%s6737_s11 + $0x10] sm:$0xff] %v3455_v28 }
 0x768   : > { %v3434_v15 = vpop.permute.xlu0 %3433  ;;  %v3432_v27 = vpop.permute.xlu1 %3431 }
 0x769   : > { %v3456_v47 = vsel %vm2687_vm13, %v3430_v63, %v3432_v27  ;;  %v3457_v37 = vsel %vm2687_vm13, %v3432_v27, %v3434_v15 }
 0x76a   : > { %3480 = vst [vmem:[%s6737_s11 + $0x18] sm:$0xff] %v3456_v47  ;;  %3481 = vst [vmem:[%s6737_s11 + $0x20] sm:$0xff] %v3457_v37 }
 0x76c   : > { %v3436_v26 = vpop.permute.xlu1 %3435  ;;  %v3442_v35 = vpop.permute.xlu0 %3441 }
 0x76d   : > { %v3458_v60 = vsel %vm2687_vm13, %v3434_v15, %v3436_v26 }
 0x76e   : > { %3482 = vst [vmem:[%s6737_s11 + $0x28] sm:$0xff] %v3458_v60 }
 0x770   : > { %v3440_v38 = vpop.permute.xlu1 %3439  ;;  %v3450_v11 = vpop.permute.xlu0 %3449 }
 0x771   : > { %v3459_v53 = vsel %vm2687_vm13, %v3438_v42, %v3440_v38  ;;  %v3460_v13 = vsel %vm2687_vm13, %v3440_v38, %v3442_v35 }
 0x772   : > { %3483 = vst [vmem:[%s6737_s11 + $0x30] sm:$0xff] %v3459_v53  ;;  %3484 = vst [vmem:[%s6737_s11 + $0x38] sm:$0xff] %v3460_v13 }
 0x774   : > { %v3444_v19 = vpop.permute.xlu1 %3443 }
 0x775   : > { %v3461_v58 = vsel %vm2687_vm13, %v3442_v35, %v3444_v19 }
 0x776   : > { %3485 = vst [vmem:[%s6737_s11 + $0x40] sm:$0xff] %v3461_v58 }
 0x778   : > { %v3448_v1 = vpop.permute.xlu1 %3447 }
 0x779   : > { %v3462_v2 = vsel %vm2687_vm13, %v3446_v62, %v3448_v1  ;;  %v3463_v16 = vsel %vm2687_vm13, %v3448_v1, %v3450_v11 }
 0x77a   : > { %3486 = vst [vmem:[%s6737_s11 + $0x48] sm:$0xff] %v3462_v2  ;;  %3487 = vst [vmem:[%s6737_s11 + $0x50] sm:$0xff] %v3463_v16 }
 0x77c   : > { %v3452_v50 = vpop.permute.xlu1 %3451 }
 0x77d   : > { %v3464_v57 = vsel %vm2687_vm13, %v3450_v11, %v3452_v50 }
 0x77e   : > { %3488 = vst [vmem:[%s6737_s11 + $0x58] sm:$0xff] %v3464_v57 }
 0x77f   : > { %4195 = shalt.err (!%p4192_p2)
}
 0x780   : > { %s4196_s25 = scalar_lea.hbm %s6765_s12, 1536  ;;  %s4200_s7 = scalar_lea.hbm %s6819_s5, 3072 }
 0x781   : > { %p4197_p4 = scmp.ne.s32.totalorder %s6765_s12, %s4196_s25  ;;  %p4201_p9 = scmp.lt.u32.totalorder %s6765_s12, %s6819_s5 }
 0x782   : > { %p4202_p1 = scmp.lt.u32.totalorder %s4200_s7, %s4196_s25  ;;  %p4204_p6 = scmp.lt.u32.totalorder %s4196_s25, %s6765_s12 }
 0x783   : > { %p4198_p5 = pnand %p4197_p4, %p7298_p11 }
 0x784   : > { %p4203_p3 = por %p4202_p1, %p4201_p9 }
 0x785   : > { %p4199_p7 = pneg %p4198_p5 }
 0x786   : > { %p4205_p12 = por %p4204_p6, %p4203_p3 }
 0x788   : > { %p4206_p13 = pnand %p4205_p12, %p4199_p7 }
 0x78a   : > { %4209 = shalt.err (!%p4206_p13)
}
 0x78b   : > { %s4297_s15 = smov 384  }
 0x78c   : > { %3693 = dma.vmem_to_hbm [thread:$0]  (%p7298_p11), %s6767_s8, 1536, %s6765_s12, %s3490_s22, %s4297_s15, %s4297_s15, %s4270_s14  }
 0x78d PF: > { %s3518_s28 = sand.u32 1, %s4236_s18   ;;  %p7299_p8 = scmp.ne.s32.totalorder %s6976_s6, 0 }
 0x78e   : > { %p7300_p10 = scmp.ge.s32.totalorder %s4248_s21, 2  ;;  %s3519_s9 = scalar_lea.sflag [#allocation6], %s3518_s28 }
 0x790   : > { %p3700_p0 = pnand %p7300_p10, %p7299_p8 }
 0x792   : > { %4231 = dma.done.wait (!%p3700_p0), %s3519_s9, 1536  }
 0x793   : > { %4233 = vsyncadd (!%p3700_p0), %s3519_s9, 4294965760  ;;  %p18_p2 = scmp.ge.s32.totalorder %s4353_s24, 4   ;;  %s7301_s18 = smov %s4240_s19 }
 0x794   : > { %s7302_s19 = smov %s4244_s20  ;;  %s7303_s20 = smov %s4365_s27 }
 0x795   : > { %s7304_s21 = smov %s4353_s24  ;;  %20 = sbr.rel (!%p18_p2) target bundleno = 5 (0x5), region = 87 }
 0x79c   :  { %3524 = vsyncpa [#allocation5], 1 }
 0x79d   :  { %3526 = vsyncpa [#allocation5 + $0x1], 1 }
 0x79e   :  { %3527 = vsyncpa [#allocation6], 1 }
 0x79f   :  { %3529 = vsyncpa [#allocation6 + $0x1], 1 }

</bundles_post_ra>
